<compile_context>
chip_gen: v5e
topology: v5e:2x2
jax: 0.10.0
libtpu: 0.0.40
codegen_flags: <defaults>
</compile_context>

<pallas_src>
import functools

import numpy as np

import jax
import jax.numpy as jnp
from jax import lax
from jax.experimental import pallas as pl
from jax.experimental.pallas import tpu as pltpu


KERNEL_PARAM_KEYS = [
    'w_embed',
    'ln1_g', 'ln1_b', 'wq', 'wk', 'wv', 'out_w', 'out_b',
    'ln2_g', 'ln2_b', 'ff1_w', 'ff1_b', 'ff2_w', 'ff2_b',
    'lnf_g', 'lnf_b', 'head_w', 'head_b',
]


def _layer_norm(x, g, b, eps=1e-5):
    mu = jnp.mean(x, axis=-1, keepdims=True)
    var = jnp.mean(jnp.square(x - mu), axis=-1, keepdims=True)
    return (x - mu) * lax.rsqrt(var + eps) * g + b


def fvit_kernel(x_in_ref, mask_ref, pool_ref,
                w_embed_ref,
                ln1_g_ref, ln1_b_ref, wq_ref, wk_ref, wv_ref, out_w_ref, out_b_ref,
                ln2_g_ref, ln2_b_ref, ff1_w_ref, ff1_b_ref, ff2_w_ref, ff2_b_ref,
                lnf_g_ref, lnf_b_ref, head_w_ref, head_b_ref,
                o_ref,
                *, depth, heads):
    x_in = x_in_ref[0, 0]          # (T, PD+POS+2) combined token features
    mask = mask_ref[...]           # (T, T)  static additive attention bias
    pool = pool_ref[...]           # (bb, T) static mean-pool matrix
    T = x_in.shape[0]

    # [cls | patch+pos | zero-padding] token rows assembled by ONE matmul.
    x = jnp.dot(x_in, w_embed_ref[0], preferred_element_type=jnp.float32)    # (T, E)
    E = x.shape[-1]
    # TODO(synk): nn.Dropout layers (dropout=0.0, emb_dropout) are identity in eval mode.

    for l in range(depth):
        # ---- PreNorm + batched multi-head self-attention ----
        h = _layer_norm(x, ln1_g_ref[0, l], ln1_b_ref[0, l])                  # (T, E)
        hb = jnp.broadcast_to(h[None], (heads, T, E))                         # (H, T, E)
        wq = wq_ref[0, l * heads:(l + 1) * heads]                             # (H, E, dh), scale folded
        wk = wk_ref[0, l * heads:(l + 1) * heads]
        wv = wv_ref[0, l * heads:(l + 1) * heads]
        q = jnp.einsum('hte,hed->htd', hb, wq, preferred_element_type=jnp.float32)
        k = jnp.einsum('hte,hed->htd', hb, wk, preferred_element_type=jnp.float32)
        v = jnp.einsum('hte,hed->htd', hb, wv, preferred_element_type=jnp.float32)
        dots = jnp.einsum('hid,hjd->hij', q, k,
                          preferred_element_type=jnp.float32) + mask          # (H, T, T)
        m = jnp.max(dots, axis=-1, keepdims=True)
        ex = jnp.exp(dots - m)
        s = jnp.sum(ex, axis=-1, keepdims=True)
        attn = ex * pl.reciprocal(s, approx=True)       # divide on the EUP slot
        o_h = jnp.einsum('hij,hjd->hid', attn, v,
                         preferred_element_type=jnp.float32)                  # (H, T, dh)
        ow = out_w_ref[0, l * heads:(l + 1) * heads]                          # (H, dh, E)
        proj = jnp.einsum('htd,hde->hte', o_h, ow,
                          preferred_element_type=jnp.float32)                 # (H, T, E)
        x = x + jnp.sum(proj, axis=0) + out_b_ref[0, l]

        # ---- PreNorm + FeedForward ----
        h2 = _layer_norm(x, ln2_g_ref[0, l], ln2_b_ref[0, l])
        f = jnp.dot(h2, ff1_w_ref[0, l], preferred_element_type=jnp.float32) + ff1_b_ref[0, l]
        # TODO(synk): torch nn.GELU() is exact erf GELU; tanh-approx GELU used here.
        f = jax.nn.gelu(f, approximate=True)
        x = x + jnp.dot(f, ff2_w_ref[0, l], preferred_element_type=jnp.float32) + ff2_b_ref[0, l]

    # ---- per-element mean pool (one matmul), final LayerNorm + head ----
    pooled = jnp.dot(pool, x, preferred_element_type=jnp.float32)             # (bb, E)
    pooled = _layer_norm(pooled, lnf_g_ref[0], lnf_b_ref[0])
    code = jnp.dot(pooled, head_w_ref[0], preferred_element_type=jnp.float32) + head_b_ref[0]
    o_ref[0, 0] = code                                                        # (bb, code_pad)


def _pick_block_batch(batch, np_tokens, target_tokens=128):
    """Largest divisor bb of `batch` with bb * NP <= target (lane-dense T)."""
    best = 1
    for cand in range(1, batch + 1):
        if batch % cand == 0 and cand * np_tokens <= target_tokens:
            best = cand
    return best


def tfvit_kl_forward(params1, params2, patch_img1, pos_data1, patch_img2, pos_data2, cfg):
    B, P = patch_img1.shape[0], patch_img1.shape[1]
    PD = cfg['channels'] * cfg['patch_size'] ** 2
    POS = cfg['pos_dim']
    E, code, D = cfg['emb_dim'], cfg['code_dim'], cfg['depth']
    heads, dh, M = cfg['heads'], cfg['dim_head'], cfg['mlp_dim']
    inner = heads * dh
    scale = dh ** (-0.5)
    N = P + 1                                    # real tokens per element (cls + patches)
    NP = ((N + 7) // 8) * 8                      # sublane-aligned tokens per element
    IN = PD + POS + 2                            # patch feats | pos feats | is_cls | is_patch
    code_pad = ((code + 127) // 128) * 128       # lane-dense output block
    bb = _pick_block_batch(B, NP)
    nb = B // bb
    T = bb * NP

    # ---- static block-diag attention bias + mean-pool matrix (hoisted out of kernel) ----
    rows = np.arange(T)
    elem = rows // NP
    real = (rows % NP) < N
    allowed = (elem[:, None] == elem[None, :]) & real[None, :]
    mask_bias = jnp.asarray(np.where(allowed, 0.0, -1e9), dtype=jnp.float32)           # (T, T)
    pool_mat = jnp.asarray(
        np.where((np.arange(bb)[:, None] == elem[None, :]) & real[None, :], 1.0 / N, 0.0),
        dtype=jnp.float32)                                                              # (bb, T)

    # ---- token-feature matrix: one in-kernel matmul builds [cls | patch | pad] ----
    # TODO(synk): at realistic sizes, accept this pre-assembled layout as the canonical
    # input format instead of rebuilding it (extra HBM copies) on every call.
    def build_tokens(patch_img, pos_data):
        pf = patch_img.reshape(B, P, PD).astype(jnp.float32)      # 'b p h w c -> b p (h w c)'
        pos = pos_data.astype(jnp.float32)
        feat = jnp.concatenate(
            [pf, pos, jnp.zeros((B, P, 1), jnp.float32), jnp.ones((B, P, 1), jnp.float32)],
            axis=-1)                                              # patch rows
        cls_row = jnp.zeros((B, 1, IN), jnp.float32).at[:, :, PD + POS].set(1.0)
        pad_row = jnp.zeros((B, NP - N, IN), jnp.float32)
        return jnp.concatenate([cls_row, feat, pad_row], axis=1).reshape(nb, T, IN)

    x_in = jnp.stack([build_tokens(patch_img1, pos_data1),
                      build_tokens(patch_img2, pos_data2)], axis=0)           # (2, nb, T, IN)

    # ---- per-tower weights rearranged to head-major / fused layouts ----
    def prep(p):
        w_embed = jnp.concatenate(
            [p['pe_w'], p['pos_w'], p['cls'] + p['cls_pos'], p['pe_b'] + p['pos_b']],
            axis=0)                                                            # (IN, E)
        qkv = p['qkv_w'].reshape(D, E, 3, heads, dh)                           # cols = (3, h, d)

        def head_major(c, s=1.0):
            return (jnp.transpose(qkv[:, :, c], (0, 2, 1, 3)) * s).reshape(D * heads, E, dh)

        return {
            'w_embed': w_embed,
            'ln1_g': p['ln1_g'], 'ln1_b': p['ln1_b'],
            'wq': head_major(0, scale),           # attention scale folded into Q weights
            'wk': head_major(1), 'wv': head_major(2),
            'out_w': p['out_w'].reshape(D * heads, dh, E), 'out_b': p['out_b'],
            'ln2_g': p['ln2_g'], 'ln2_b': p['ln2_b'],
            'ff1_w': p['ff1_w'], 'ff1_b': p['ff1_b'],
            'ff2_w': p['ff2_w'], 'ff2_b': p['ff2_b'],
            'lnf_g': p['lnf_g'], 'lnf_b': p['lnf_b'],
            'head_w': jnp.pad(p['head_w'], ((0, 0), (0, code_pad - code))),
            'head_b': jnp.pad(p['head_b'], ((0, 0), (0, code_pad - code))),
        }

    t1, t2 = prep(params1), prep(params2)
    weight_args = [jnp.stack([t1[k], t2[k]], axis=0).astype(jnp.float32)
                   for k in KERNEL_PARAM_KEYS]

    # TODO(synk): at realistic ViT sizes, stream per-layer weights (an "arbitrary" depth
    # grid axis / emit_pipeline) and cast matmul operands to bf16 on v6e/v7x; unnecessary
    # at these toy sizes and bf16 elementwise would regress on v5e.
    def w_spec(arr):
        nd = arr.ndim
        return pl.BlockSpec((1,) + arr.shape[1:],
                            lambda t, b, _nd=nd: (t,) + (0,) * (_nd - 1))

    in_specs = ([pl.BlockSpec((1, 1, T, IN), lambda t, b: (t, b, 0, 0)),
                 pl.BlockSpec((T, T), lambda t, b: (0, 0)),
                 pl.BlockSpec((bb, T), lambda t, b: (0, 0))]
                + [w_spec(a) for a in weight_args])
    out_spec = pl.BlockSpec((1, 1, bb, code_pad), lambda t, b: (t, b, 0, 0))

    kernel = functools.partial(fvit_kernel, depth=D, heads=heads)

    flops_block = (2 * T * IN * E
                   + D * (6 * T * E * inner + 4 * T * T * inner
                          + 2 * T * inner * E + 4 * T * E * M)
                   + 2 * bb * T * E + 2 * bb * E * code_pad)
    trans_block = D * (heads * T * T + T * M)
    bytes_total = 4 * int(sum(int(a.size) for a in weight_args)
                          + int(x_in.size) + T * T + bb * T + 2 * B * code_pad)
    cost = pl.CostEstimate(flops=2 * nb * flops_block,
                           transcendentals=2 * nb * trans_block,
                           bytes_accessed=bytes_total)

    codes = pl.pallas_call(
        kernel,
        out_shape=jax.ShapeDtypeStruct((2, nb, bb, code_pad), jnp.float32),
        grid=(2, nb),
        in_specs=in_specs,
        out_specs=out_spec,
        compiler_params=pltpu.CompilerParams(
            dimension_semantics=("parallel", "parallel")),
        cost_estimate=cost,
    )(x_in, mask_bias, pool_mat, *weight_args)

    codes = codes.reshape(2, B, code_pad)[..., :code]
    x1, x2 = codes[0], codes[1]

    # --- KL-div + (1 - sigmoid) head; tiny, so plain JAX (no extra kernel launch) ---
    patch_total = cfg['num_patches'] * cfg['patch_size'] ** 2 * cfg['channels']
    # NOTE: mirrors torch.kl_div(x1, x2, log_target=False) on raw targets:
    # x2 == 0 contributes 0; x2 < 0 gives NaN just like the PyTorch reference.
    safe_x2 = jnp.where(x2 == 0.0, 1.0, x2)
    point = jnp.where(x2 == 0.0, 0.0, x2 * jnp.log(safe_x2)) - x2 * x1
    kl = jnp.sum(point) / B                          # reduction='batchmean'
    div = kl / patch_total
    # TODO(synk): tFViT_KL.mlp_head is defined in __init__ but never used in forward; omitted.
    return 1.0 - jax.nn.sigmoid(div)


def init_fvit_params(key, cfg):
    E, D = cfg['emb_dim'], cfg['depth']
    H, DH = cfg['heads'], cfg['dim_head']
    M, C = cfg['mlp_dim'], cfg['code_dim']
    PD = cfg['channels'] * cfg['patch_size'] ** 2
    POS = cfg['pos_dim']
    inner = H * DH
    ks = iter(jax.random.split(key, 16))

    def nrm(shape, s=0.05):
        return (jax.random.normal(next(ks), shape) * s).astype(jnp.float32)

    return {
        'pe_w': nrm((PD, E)), 'pe_b': nrm((1, E)),
        'pos_w': nrm((POS, E)), 'pos_b': nrm((1, E)),
        'cls': nrm((1, E), 1.0), 'cls_pos': nrm((1, E), 1.0),
        'ln1_g': jnp.ones((D, 1, E), jnp.float32), 'ln1_b': jnp.zeros((D, 1, E), jnp.float32),
        'qkv_w': nrm((D, E, 3 * inner)),
        'out_w': nrm((D, inner, E)), 'out_b': nrm((D, 1, E)),
        'ln2_g': jnp.ones((D, 1, E), jnp.float32), 'ln2_b': jnp.zeros((D, 1, E), jnp.float32),
        'ff1_w': nrm((D, E, M)), 'ff1_b': nrm((D, 1, M)),
        'ff2_w': nrm((D, M, E)), 'ff2_b': nrm((D, 1, E)),
        'lnf_g': jnp.ones((1, E), jnp.float32), 'lnf_b': jnp.zeros((1, E), jnp.float32),
        'head_w': nrm((E, C)), 'head_b': nrm((1, C)),
    }


if __name__ == "__main__":
    cfg = dict(num_patches=8, patch_size=4, channels=3, pos_dim=4,
               emb_dim=32, depth=2, heads=4, dim_head=8, mlp_dim=64, code_dim=16)

    key = jax.random.PRNGKey(0)
    k1, k2, kd1, kd2, kd3, kd4 = jax.random.split(key, 6)
    params1 = init_fvit_params(k1, cfg)
    params2 = init_fvit_params(k2, cfg)

    B = 2
    patch_shape = (B, cfg['num_patches'], cfg['patch_size'], cfg['patch_size'], cfg['channels'])
    pos_shape = (B, cfg['num_patches'], cfg['pos_dim'])
    patch_img1 = jax.random.normal(kd1, patch_shape, jnp.float32)
    pos_data1 = jax.random.normal(kd2, pos_shape, jnp.float32)
    patch_img2 = jax.random.normal(kd3, patch_shape, jnp.float32)
    pos_data2 = jax.random.normal(kd4, pos_shape, jnp.float32)

    out = tfvit_kl_forward(params1, params2, patch_img1, pos_data1, patch_img2, pos_data2, cfg)
    jax.block_until_ready(out)
    print("KERNEL_OK")
</pallas_src>

<mosaic_0001>
module attributes {stable_mosaic.version = 11 : i64} {
  func.func @fvit_kernel(%arg0: i32, %arg1: i32, %arg2: memref<1x1x32x54xf32, #tpu.memory_space<vmem>>, %arg3: memref<32x32xf32, #tpu.memory_space<vmem>>, %arg4: memref<2x32xf32, #tpu.memory_space<vmem>>, %arg5: memref<1x54x32xf32, #tpu.memory_space<vmem>>, %arg6: memref<1x2x1x32xf32, #tpu.memory_space<vmem>>, %arg7: memref<1x2x1x32xf32, #tpu.memory_space<vmem>>, %arg8: memref<1x8x32x8xf32, #tpu.memory_space<vmem>>, %arg9: memref<1x8x32x8xf32, #tpu.memory_space<vmem>>, %arg10: memref<1x8x32x8xf32, #tpu.memory_space<vmem>>, %arg11: memref<1x8x8x32xf32, #tpu.memory_space<vmem>>, %arg12: memref<1x2x1x32xf32, #tpu.memory_space<vmem>>, %arg13: memref<1x2x1x32xf32, #tpu.memory_space<vmem>>, %arg14: memref<1x2x1x32xf32, #tpu.memory_space<vmem>>, %arg15: memref<1x2x32x64xf32, #tpu.memory_space<vmem>>, %arg16: memref<1x2x1x64xf32, #tpu.memory_space<vmem>>, %arg17: memref<1x2x64x32xf32, #tpu.memory_space<vmem>>, %arg18: memref<1x2x1x32xf32, #tpu.memory_space<vmem>>, %arg19: memref<1x1x32xf32, #tpu.memory_space<vmem>>, %arg20: memref<1x1x32xf32, #tpu.memory_space<vmem>>, %arg21: memref<1x32x128xf32, #tpu.memory_space<vmem>>, %arg22: memref<1x1x128xf32, #tpu.memory_space<vmem>>, %arg23: memref<1x1x2x128xf32, #tpu.memory_space<vmem>>) attributes {dimension_semantics = [#tpu.dimension_semantics<parallel>, #tpu.dimension_semantics<parallel>], iteration_bounds = array<i64: 2, 1>, scalar_prefetch = 0 : i64, scratch_operands = 0 : i64, tpu.core_type = #tpu.core_type<tc>, window_params = [{transform_indices = @transform_0, window_bounds = array<i64: 1, 1, 32, 54>}, {pipeline_mode = #tpu.pipeline_mode<synchronous>, transform_indices = @transform_1, window_bounds = array<i64: 32, 32>}, {pipeline_mode = #tpu.pipeline_mode<synchronous>, transform_indices = @transform_2, window_bounds = array<i64: 2, 32>}, {transform_indices = @transform_3, window_bounds = array<i64: 1, 54, 32>}, {transform_indices = @transform_4, window_bounds = array<i64: 1, 2, 1, 32>}, {transform_indices = @transform_5, window_bounds = array<i64: 1, 2, 1, 32>}, {transform_indices = @transform_6, window_bounds = array<i64: 1, 8, 32, 8>}, {transform_indices = @transform_7, window_bounds = array<i64: 1, 8, 32, 8>}, {transform_indices = @transform_8, window_bounds = array<i64: 1, 8, 32, 8>}, {transform_indices = @transform_9, window_bounds = array<i64: 1, 8, 8, 32>}, {transform_indices = @transform_10, window_bounds = array<i64: 1, 2, 1, 32>}, {transform_indices = @transform_11, window_bounds = array<i64: 1, 2, 1, 32>}, {transform_indices = @transform_12, window_bounds = array<i64: 1, 2, 1, 32>}, {transform_indices = @transform_13, window_bounds = array<i64: 1, 2, 32, 64>}, {transform_indices = @transform_14, window_bounds = array<i64: 1, 2, 1, 64>}, {transform_indices = @transform_15, window_bounds = array<i64: 1, 2, 64, 32>}, {transform_indices = @transform_16, window_bounds = array<i64: 1, 2, 1, 32>}, {transform_indices = @transform_17, window_bounds = array<i64: 1, 1, 32>}, {transform_indices = @transform_18, window_bounds = array<i64: 1, 1, 32>}, {transform_indices = @transform_19, window_bounds = array<i64: 1, 32, 128>}, {transform_indices = @transform_20, window_bounds = array<i64: 1, 1, 128>}, {transform_indices = @transform_21, window_bounds = array<i64: 1, 1, 2, 128>}]} {
    %c0 = arith.constant 0 : index
    %c0_0 = arith.constant 0 : index
    %c0_1 = arith.constant 0 : index
    %c0_2 = arith.constant 0 : index
    %0 = vector.load %arg2[%c0, %c0_0, %c0_1, %c0_2] : memref<1x1x32x54xf32, #tpu.memory_space<vmem>>, vector<1x1x32x54xf32>
    %1 = vector.shape_cast %0 : vector<1x1x32x54xf32> to vector<32x54xf32>
    %c0_3 = arith.constant 0 : index
    %c0_4 = arith.constant 0 : index
    %2 = vector.load %arg3[%c0_3, %c0_4] : memref<32x32xf32, #tpu.memory_space<vmem>>, vector<32x32xf32>
    %c0_5 = arith.constant 0 : index
    %c0_6 = arith.constant 0 : index
    %3 = vector.load %arg4[%c0_5, %c0_6] : memref<2x32xf32, #tpu.memory_space<vmem>>, vector<2x32xf32>
    %c0_7 = arith.constant 0 : index
    %c0_8 = arith.constant 0 : index
    %c0_9 = arith.constant 0 : index
    %4 = vector.load %arg5[%c0_7, %c0_8, %c0_9] : memref<1x54x32xf32, #tpu.memory_space<vmem>>, vector<1x54x32xf32>
    %5 = vector.shape_cast %4 : vector<1x54x32xf32> to vector<54x32xf32>
    %cst = arith.constant dense<0.000000e+00> : vector<32x32xf32>
    %6 = tpu.matmul %1, %5, %cst {dimension_numbers = #tpu.dot_dimension_numbers<[1], [0], [0], [1], [0, 0, 1, 1], [], []>} : vector<32x54xf32>, vector<54x32xf32>, vector<32x32xf32> -> vector<32x32xf32>
    %c0_10 = arith.constant 0 : index
    %c0_11 = arith.constant 0 : index
    %c0_12 = arith.constant 0 : index
    %c0_13 = arith.constant 0 : index
    %7 = vector.load %arg6[%c0_10, %c0_11, %c0_12, %c0_13] : memref<1x2x1x32xf32, #tpu.memory_space<vmem>>, vector<1x1x1x32xf32>
    %8 = vector.shape_cast %7 : vector<1x1x1x32xf32> to vector<1x32xf32>
    %c0_14 = arith.constant 0 : index
    %c0_15 = arith.constant 0 : index
    %c0_16 = arith.constant 0 : index
    %c0_17 = arith.constant 0 : index
    %9 = vector.load %arg7[%c0_14, %c0_15, %c0_16, %c0_17] : memref<1x2x1x32xf32, #tpu.memory_space<vmem>>, vector<1x1x1x32xf32>
    %10 = vector.shape_cast %9 : vector<1x1x1x32xf32> to vector<1x32xf32>
    %cst_18 = arith.constant dense<0.000000e+00> : vector<32xf32>
    %11 = vector.multi_reduction <add>, %6, %cst_18 [1] : vector<32x32xf32> to vector<32xf32>
    %12 = vector.shape_cast %11 : vector<32xf32> to vector<32x1xf32>
    %cst_19 = arith.constant 3.200000e+01 : f32
    %13 = vector.broadcast %cst_19 : f32 to vector<32x1xf32>
    %14 = arith.divf %12, %13 : vector<32x1xf32>
    %15 = vector.broadcast %14 : vector<32x1xf32> to vector<32x32xf32>
    %16 = arith.subf %6, %15 : vector<32x32xf32>
    %17 = arith.mulf %16, %16 : vector<32x32xf32>
    %cst_20 = arith.constant dense<0.000000e+00> : vector<32xf32>
    %18 = vector.multi_reduction <add>, %17, %cst_20 [1] : vector<32x32xf32> to vector<32xf32>
    %19 = vector.shape_cast %18 : vector<32xf32> to vector<32x1xf32>
    %cst_21 = arith.constant 3.200000e+01 : f32
    %20 = vector.broadcast %cst_21 : f32 to vector<32x1xf32>
    %21 = arith.divf %19, %20 : vector<32x1xf32>
    %22 = vector.broadcast %14 : vector<32x1xf32> to vector<32x32xf32>
    %23 = arith.subf %6, %22 : vector<32x32xf32>
    %cst_22 = arith.constant 9.99999974E-6 : f32
    %24 = vector.broadcast %cst_22 : f32 to vector<32x1xf32>
    %25 = arith.addf %21, %24 : vector<32x1xf32>
    %26 = math.rsqrt %25 : vector<32x1xf32>
    %27 = vector.broadcast %26 : vector<32x1xf32> to vector<32x32xf32>
    %28 = arith.mulf %23, %27 : vector<32x32xf32>
    %29 = vector.broadcast %8 : vector<1x32xf32> to vector<32x32xf32>
    %30 = arith.mulf %28, %29 : vector<32x32xf32>
    %31 = vector.broadcast %10 : vector<1x32xf32> to vector<32x32xf32>
    %32 = arith.addf %30, %31 : vector<32x32xf32>
    %33 = vector.shape_cast %32 : vector<32x32xf32> to vector<1x32x32xf32>
    %34 = vector.shape_cast %33 : vector<1x32x32xf32> to vector<1x32x32xf32>
    %35 = vector.broadcast %34 : vector<1x32x32xf32> to vector<4x32x32xf32>
    %c0_23 = arith.constant 0 : index
    %c0_24 = arith.constant 0 : index
    %c0_25 = arith.constant 0 : index
    %c0_26 = arith.constant 0 : index
    %36 = vector.load %arg8[%c0_23, %c0_24, %c0_25, %c0_26] : memref<1x8x32x8xf32, #tpu.memory_space<vmem>>, vector<1x4x32x8xf32>
    %37 = vector.shape_cast %36 : vector<1x4x32x8xf32> to vector<4x32x8xf32>
    %c0_27 = arith.constant 0 : index
    %c0_28 = arith.constant 0 : index
    %c0_29 = arith.constant 0 : index
    %c0_30 = arith.constant 0 : index
    %38 = vector.load %arg9[%c0_27, %c0_28, %c0_29, %c0_30] : memref<1x8x32x8xf32, #tpu.memory_space<vmem>>, vector<1x4x32x8xf32>
    %39 = vector.shape_cast %38 : vector<1x4x32x8xf32> to vector<4x32x8xf32>
    %c0_31 = arith.constant 0 : index
    %c0_32 = arith.constant 0 : index
    %c0_33 = arith.constant 0 : index
    %c0_34 = arith.constant 0 : index
    %40 = vector.load %arg10[%c0_31, %c0_32, %c0_33, %c0_34] : memref<1x8x32x8xf32, #tpu.memory_space<vmem>>, vector<1x4x32x8xf32>
    %41 = vector.shape_cast %40 : vector<1x4x32x8xf32> to vector<4x32x8xf32>
    "tpu.trace_start"() <{level = 10 : i32, message = "hte,hed->htd"}> : () -> ()
    %cst_35 = arith.constant dense<0.000000e+00> : vector<4x32x8xf32>
    %42 = tpu.matmul %35, %37, %cst_35 {dimension_numbers = #tpu.dot_dimension_numbers<[2], [1], [1], [2], [0, 0, 0, 1, 1, 2], [0], [0]>} : vector<4x32x32xf32>, vector<4x32x8xf32>, vector<4x32x8xf32> -> vector<4x32x8xf32>
    %cst_36 = arith.constant dense<0.000000e+00> : vector<4x32x8xf32>
    %43 = tpu.matmul %35, %39, %cst_36 {dimension_numbers = #tpu.dot_dimension_numbers<[2], [1], [1], [2], [0, 0, 0, 1, 1, 2], [0], [0]>} : vector<4x32x32xf32>, vector<4x32x8xf32>, vector<4x32x8xf32> -> vector<4x32x8xf32>
    %cst_37 = arith.constant dense<0.000000e+00> : vector<4x32x8xf32>
    %44 = tpu.matmul %35, %41, %cst_37 {dimension_numbers = #tpu.dot_dimension_numbers<[2], [1], [1], [2], [0, 0, 0, 1, 1, 2], [0], [0]>} : vector<4x32x32xf32>, vector<4x32x8xf32>, vector<4x32x8xf32> -> vector<4x32x8xf32>
    "tpu.trace_stop"() : () -> ()
    "tpu.trace_start"() <{level = 10 : i32, message = "hid,hjd->hij"}> : () -> ()
    %cst_38 = arith.constant dense<0.000000e+00> : vector<4x32x32xf32>
    %45 = tpu.matmul %42, %43, %cst_38 {dimension_numbers = #tpu.dot_dimension_numbers<[2], [2], [1], [1], [0, 0, 0, 1, 1, 1], [0], [0]>} : vector<4x32x8xf32>, vector<4x32x8xf32>, vector<4x32x32xf32> -> vector<4x32x32xf32>
    "tpu.trace_stop"() : () -> ()
    %46 = vector.shape_cast %2 : vector<32x32xf32> to vector<1x32x32xf32>
    %47 = vector.broadcast %46 : vector<1x32x32xf32> to vector<4x32x32xf32>
    %48 = arith.addf %45, %47 : vector<4x32x32xf32>
    %cst_39 = arith.constant dense<0xFF800000> : vector<4x32xf32>
    %49 = vector.multi_reduction <maximumf>, %48, %cst_39 [2] : vector<4x32x32xf32> to vector<4x32xf32>
    %50 = vector.shape_cast %49 : vector<4x32xf32> to vector<4x32x1xf32>
    %51 = vector.broadcast %50 : vector<4x32x1xf32> to vector<4x32x32xf32>
    %52 = arith.subf %48, %51 : vector<4x32x32xf32>
    %53 = math.exp %52 : vector<4x32x32xf32>
    %cst_40 = arith.constant dense<0.000000e+00> : vector<4x32xf32>
    %54 = vector.multi_reduction <add>, %53, %cst_40 [2] : vector<4x32x32xf32> to vector<4x32xf32>
    %55 = vector.shape_cast %54 : vector<4x32xf32> to vector<4x32x1xf32>
    %56 = tpu.reciprocal %55 {approx = true} : vector<4x32x1xf32> -> vector<4x32x1xf32>
    %57 = vector.broadcast %56 : vector<4x32x1xf32> to vector<4x32x32xf32>
    %58 = arith.mulf %53, %57 : vector<4x32x32xf32>
    "tpu.trace_start"() <{level = 10 : i32, message = "hij,hjd->hid"}> : () -> ()
    %cst_41 = arith.constant dense<0.000000e+00> : vector<4x32x8xf32>
    %59 = tpu.matmul %58, %44, %cst_41 {dimension_numbers = #tpu.dot_dimension_numbers<[2], [1], [1], [2], [0, 0, 0, 1, 1, 2], [0], [0]>} : vector<4x32x32xf32>, vector<4x32x8xf32>, vector<4x32x8xf32> -> vector<4x32x8xf32>
    "tpu.trace_stop"() : () -> ()
    %c0_42 = arith.constant 0 : index
    %c0_43 = arith.constant 0 : index
    %c0_44 = arith.constant 0 : index
    %c0_45 = arith.constant 0 : index
    %60 = vector.load %arg11[%c0_42, %c0_43, %c0_44, %c0_45] : memref<1x8x8x32xf32, #tpu.memory_space<vmem>>, vector<1x4x8x32xf32>
    %61 = vector.shape_cast %60 : vector<1x4x8x32xf32> to vector<4x8x32xf32>
    "tpu.trace_start"() <{level = 10 : i32, message = "htd,hde->hte"}> : () -> ()
    %cst_46 = arith.constant dense<0.000000e+00> : vector<4x32x32xf32>
    %62 = tpu.matmul %59, %61, %cst_46 {dimension_numbers = #tpu.dot_dimension_numbers<[2], [1], [1], [2], [0, 0, 0, 1, 1, 2], [0], [0]>} : vector<4x32x8xf32>, vector<4x8x32xf32>, vector<4x32x32xf32> -> vector<4x32x32xf32>
    "tpu.trace_stop"() : () -> ()
    %cst_47 = arith.constant dense<0.000000e+00> : vector<32x32xf32>
    %63 = vector.multi_reduction <add>, %62, %cst_47 [0] : vector<4x32x32xf32> to vector<32x32xf32>
    %64 = arith.addf %6, %63 : vector<32x32xf32>
    %c0_48 = arith.constant 0 : index
    %c0_49 = arith.constant 0 : index
    %c0_50 = arith.constant 0 : index
    %c0_51 = arith.constant 0 : index
    %65 = vector.load %arg12[%c0_48, %c0_49, %c0_50, %c0_51] : memref<1x2x1x32xf32, #tpu.memory_space<vmem>>, vector<1x1x1x32xf32>
    %66 = vector.shape_cast %65 : vector<1x1x1x32xf32> to vector<1x32xf32>
    %67 = vector.broadcast %66 : vector<1x32xf32> to vector<32x32xf32>
    %68 = arith.addf %64, %67 : vector<32x32xf32>
    %c0_52 = arith.constant 0 : index
    %c0_53 = arith.constant 0 : index
    %c0_54 = arith.constant 0 : index
    %c0_55 = arith.constant 0 : index
    %69 = vector.load %arg13[%c0_52, %c0_53, %c0_54, %c0_55] : memref<1x2x1x32xf32, #tpu.memory_space<vmem>>, vector<1x1x1x32xf32>
    %70 = vector.shape_cast %69 : vector<1x1x1x32xf32> to vector<1x32xf32>
    %c0_56 = arith.constant 0 : index
    %c0_57 = arith.constant 0 : index
    %c0_58 = arith.constant 0 : index
    %c0_59 = arith.constant 0 : index
    %71 = vector.load %arg14[%c0_56, %c0_57, %c0_58, %c0_59] : memref<1x2x1x32xf32, #tpu.memory_space<vmem>>, vector<1x1x1x32xf32>
    %72 = vector.shape_cast %71 : vector<1x1x1x32xf32> to vector<1x32xf32>
    %cst_60 = arith.constant dense<0.000000e+00> : vector<32xf32>
    %73 = vector.multi_reduction <add>, %68, %cst_60 [1] : vector<32x32xf32> to vector<32xf32>
    %74 = vector.shape_cast %73 : vector<32xf32> to vector<32x1xf32>
    %cst_61 = arith.constant 3.200000e+01 : f32
    %75 = vector.broadcast %cst_61 : f32 to vector<32x1xf32>
    %76 = arith.divf %74, %75 : vector<32x1xf32>
    %77 = vector.broadcast %76 : vector<32x1xf32> to vector<32x32xf32>
    %78 = arith.subf %68, %77 : vector<32x32xf32>
    %79 = arith.mulf %78, %78 : vector<32x32xf32>
    %cst_62 = arith.constant dense<0.000000e+00> : vector<32xf32>
    %80 = vector.multi_reduction <add>, %79, %cst_62 [1] : vector<32x32xf32> to vector<32xf32>
    %81 = vector.shape_cast %80 : vector<32xf32> to vector<32x1xf32>
    %cst_63 = arith.constant 3.200000e+01 : f32
    %82 = vector.broadcast %cst_63 : f32 to vector<32x1xf32>
    %83 = arith.divf %81, %82 : vector<32x1xf32>
    %84 = vector.broadcast %76 : vector<32x1xf32> to vector<32x32xf32>
    %85 = arith.subf %68, %84 : vector<32x32xf32>
    %cst_64 = arith.constant 9.99999974E-6 : f32
    %86 = vector.broadcast %cst_64 : f32 to vector<32x1xf32>
    %87 = arith.addf %83, %86 : vector<32x1xf32>
    %88 = math.rsqrt %87 : vector<32x1xf32>
    %89 = vector.broadcast %88 : vector<32x1xf32> to vector<32x32xf32>
    %90 = arith.mulf %85, %89 : vector<32x32xf32>
    %91 = vector.broadcast %70 : vector<1x32xf32> to vector<32x32xf32>
    %92 = arith.mulf %90, %91 : vector<32x32xf32>
    %93 = vector.broadcast %72 : vector<1x32xf32> to vector<32x32xf32>
    %94 = arith.addf %92, %93 : vector<32x32xf32>
    %c0_65 = arith.constant 0 : index
    %c0_66 = arith.constant 0 : index
    %c0_67 = arith.constant 0 : index
    %c0_68 = arith.constant 0 : index
    %95 = vector.load %arg15[%c0_65, %c0_66, %c0_67, %c0_68] : memref<1x2x32x64xf32, #tpu.memory_space<vmem>>, vector<1x1x32x64xf32>
    %96 = vector.shape_cast %95 : vector<1x1x32x64xf32> to vector<32x64xf32>
    %cst_69 = arith.constant dense<0.000000e+00> : vector<32x64xf32>
    %97 = tpu.matmul %94, %96, %cst_69 {dimension_numbers = #tpu.dot_dimension_numbers<[1], [0], [0], [1], [0, 0, 1, 1], [], []>} : vector<32x32xf32>, vector<32x64xf32>, vector<32x64xf32> -> vector<32x64xf32>
    %c0_70 = arith.constant 0 : index
    %c0_71 = arith.constant 0 : index
    %c0_72 = arith.constant 0 : index
    %c0_73 = arith.constant 0 : index
    %98 = vector.load %arg16[%c0_70, %c0_71, %c0_72, %c0_73] : memref<1x2x1x64xf32, #tpu.memory_space<vmem>>, vector<1x1x1x64xf32>
    %99 = vector.shape_cast %98 : vector<1x1x1x64xf32> to vector<1x64xf32>
    %100 = vector.broadcast %99 : vector<1x64xf32> to vector<32x64xf32>
    %101 = arith.addf %97, %100 : vector<32x64xf32>
    %102 = arith.mulf %101, %101 : vector<32x64xf32>
    %103 = arith.mulf %101, %102 : vector<32x64xf32>
    %cst_74 = arith.constant 4.471500e-02 : f32
    %104 = vector.broadcast %cst_74 : f32 to vector<32x64xf32>
    %105 = arith.mulf %104, %103 : vector<32x64xf32>
    %106 = arith.addf %101, %105 : vector<32x64xf32>
    %cst_75 = arith.constant 0.797884583 : f32
    %107 = vector.broadcast %cst_75 : f32 to vector<32x64xf32>
    %108 = arith.mulf %107, %106 : vector<32x64xf32>
    %109 = math.tanh %108 : vector<32x64xf32>
    %cst_76 = arith.constant 1.000000e+00 : f32
    %110 = vector.broadcast %cst_76 : f32 to vector<32x64xf32>
    %111 = arith.addf %110, %109 : vector<32x64xf32>
    %cst_77 = arith.constant 5.000000e-01 : f32
    %112 = vector.broadcast %cst_77 : f32 to vector<32x64xf32>
    %113 = arith.mulf %112, %111 : vector<32x64xf32>
    %114 = arith.mulf %101, %113 : vector<32x64xf32>
    %c0_78 = arith.constant 0 : index
    %c0_79 = arith.constant 0 : index
    %c0_80 = arith.constant 0 : index
    %c0_81 = arith.constant 0 : index
    %115 = vector.load %arg17[%c0_78, %c0_79, %c0_80, %c0_81] : memref<1x2x64x32xf32, #tpu.memory_space<vmem>>, vector<1x1x64x32xf32>
    %116 = vector.shape_cast %115 : vector<1x1x64x32xf32> to vector<64x32xf32>
    %cst_82 = arith.constant dense<0.000000e+00> : vector<32x32xf32>
    %117 = tpu.matmul %114, %116, %cst_82 {dimension_numbers = #tpu.dot_dimension_numbers<[1], [0], [0], [1], [0, 0, 1, 1], [], []>} : vector<32x64xf32>, vector<64x32xf32>, vector<32x32xf32> -> vector<32x32xf32>
    %118 = arith.addf %68, %117 : vector<32x32xf32>
    %c0_83 = arith.constant 0 : index
    %c0_84 = arith.constant 0 : index
    %c0_85 = arith.constant 0 : index
    %c0_86 = arith.constant 0 : index
    %119 = vector.load %arg18[%c0_83, %c0_84, %c0_85, %c0_86] : memref<1x2x1x32xf32, #tpu.memory_space<vmem>>, vector<1x1x1x32xf32>
    %120 = vector.shape_cast %119 : vector<1x1x1x32xf32> to vector<1x32xf32>
    %121 = vector.broadcast %120 : vector<1x32xf32> to vector<32x32xf32>
    %122 = arith.addf %118, %121 : vector<32x32xf32>
    %c0_87 = arith.constant 0 : index
    %c1 = arith.constant 1 : index
    %c0_88 = arith.constant 0 : index
    %c0_89 = arith.constant 0 : index
    %123 = vector.load %arg6[%c0_87, %c1, %c0_88, %c0_89] : memref<1x2x1x32xf32, #tpu.memory_space<vmem>>, vector<1x1x1x32xf32>
    %124 = vector.shape_cast %123 : vector<1x1x1x32xf32> to vector<1x32xf32>
    %c0_90 = arith.constant 0 : index
    %c1_91 = arith.constant 1 : index
    %c0_92 = arith.constant 0 : index
    %c0_93 = arith.constant 0 : index
    %125 = vector.load %arg7[%c0_90, %c1_91, %c0_92, %c0_93] : memref<1x2x1x32xf32, #tpu.memory_space<vmem>>, vector<1x1x1x32xf32>
    %126 = vector.shape_cast %125 : vector<1x1x1x32xf32> to vector<1x32xf32>
    %cst_94 = arith.constant dense<0.000000e+00> : vector<32xf32>
    %127 = vector.multi_reduction <add>, %122, %cst_94 [1] : vector<32x32xf32> to vector<32xf32>
    %128 = vector.shape_cast %127 : vector<32xf32> to vector<32x1xf32>
    %cst_95 = arith.constant 3.200000e+01 : f32
    %129 = vector.broadcast %cst_95 : f32 to vector<32x1xf32>
    %130 = arith.divf %128, %129 : vector<32x1xf32>
    %131 = vector.broadcast %130 : vector<32x1xf32> to vector<32x32xf32>
    %132 = arith.subf %122, %131 : vector<32x32xf32>
    %133 = arith.mulf %132, %132 : vector<32x32xf32>
    %cst_96 = arith.constant dense<0.000000e+00> : vector<32xf32>
    %134 = vector.multi_reduction <add>, %133, %cst_96 [1] : vector<32x32xf32> to vector<32xf32>
    %135 = vector.shape_cast %134 : vector<32xf32> to vector<32x1xf32>
    %cst_97 = arith.constant 3.200000e+01 : f32
    %136 = vector.broadcast %cst_97 : f32 to vector<32x1xf32>
    %137 = arith.divf %135, %136 : vector<32x1xf32>
    %138 = vector.broadcast %130 : vector<32x1xf32> to vector<32x32xf32>
    %139 = arith.subf %122, %138 : vector<32x32xf32>
    %cst_98 = arith.constant 9.99999974E-6 : f32
    %140 = vector.broadcast %cst_98 : f32 to vector<32x1xf32>
    %141 = arith.addf %137, %140 : vector<32x1xf32>
    %142 = math.rsqrt %141 : vector<32x1xf32>
    %143 = vector.broadcast %142 : vector<32x1xf32> to vector<32x32xf32>
    %144 = arith.mulf %139, %143 : vector<32x32xf32>
    %145 = vector.broadcast %124 : vector<1x32xf32> to vector<32x32xf32>
    %146 = arith.mulf %144, %145 : vector<32x32xf32>
    %147 = vector.broadcast %126 : vector<1x32xf32> to vector<32x32xf32>
    %148 = arith.addf %146, %147 : vector<32x32xf32>
    %149 = vector.shape_cast %148 : vector<32x32xf32> to vector<1x32x32xf32>
    %150 = vector.shape_cast %149 : vector<1x32x32xf32> to vector<1x32x32xf32>
    %151 = vector.broadcast %150 : vector<1x32x32xf32> to vector<4x32x32xf32>
    %c0_99 = arith.constant 0 : index
    %c4 = arith.constant 4 : index
    %c0_100 = arith.constant 0 : index
    %c0_101 = arith.constant 0 : index
    %152 = vector.load %arg8[%c0_99, %c4, %c0_100, %c0_101] : memref<1x8x32x8xf32, #tpu.memory_space<vmem>>, vector<1x4x32x8xf32>
    %153 = vector.shape_cast %152 : vector<1x4x32x8xf32> to vector<4x32x8xf32>
    %c0_102 = arith.constant 0 : index
    %c4_103 = arith.constant 4 : index
    %c0_104 = arith.constant 0 : index
    %c0_105 = arith.constant 0 : index
    %154 = vector.load %arg9[%c0_102, %c4_103, %c0_104, %c0_105] : memref<1x8x32x8xf32, #tpu.memory_space<vmem>>, vector<1x4x32x8xf32>
    %155 = vector.shape_cast %154 : vector<1x4x32x8xf32> to vector<4x32x8xf32>
    %c0_106 = arith.constant 0 : index
    %c4_107 = arith.constant 4 : index
    %c0_108 = arith.constant 0 : index
    %c0_109 = arith.constant 0 : index
    %156 = vector.load %arg10[%c0_106, %c4_107, %c0_108, %c0_109] : memref<1x8x32x8xf32, #tpu.memory_space<vmem>>, vector<1x4x32x8xf32>
    %157 = vector.shape_cast %156 : vector<1x4x32x8xf32> to vector<4x32x8xf32>
    "tpu.trace_start"() <{level = 10 : i32, message = "hte,hed->htd"}> : () -> ()
    %cst_110 = arith.constant dense<0.000000e+00> : vector<4x32x8xf32>
    %158 = tpu.matmul %151, %153, %cst_110 {dimension_numbers = #tpu.dot_dimension_numbers<[2], [1], [1], [2], [0, 0, 0, 1, 1, 2], [0], [0]>} : vector<4x32x32xf32>, vector<4x32x8xf32>, vector<4x32x8xf32> -> vector<4x32x8xf32>
    %cst_111 = arith.constant dense<0.000000e+00> : vector<4x32x8xf32>
    %159 = tpu.matmul %151, %155, %cst_111 {dimension_numbers = #tpu.dot_dimension_numbers<[2], [1], [1], [2], [0, 0, 0, 1, 1, 2], [0], [0]>} : vector<4x32x32xf32>, vector<4x32x8xf32>, vector<4x32x8xf32> -> vector<4x32x8xf32>
    %cst_112 = arith.constant dense<0.000000e+00> : vector<4x32x8xf32>
    %160 = tpu.matmul %151, %157, %cst_112 {dimension_numbers = #tpu.dot_dimension_numbers<[2], [1], [1], [2], [0, 0, 0, 1, 1, 2], [0], [0]>} : vector<4x32x32xf32>, vector<4x32x8xf32>, vector<4x32x8xf32> -> vector<4x32x8xf32>
    "tpu.trace_stop"() : () -> ()
    "tpu.trace_start"() <{level = 10 : i32, message = "hid,hjd->hij"}> : () -> ()
    %cst_113 = arith.constant dense<0.000000e+00> : vector<4x32x32xf32>
    %161 = tpu.matmul %158, %159, %cst_113 {dimension_numbers = #tpu.dot_dimension_numbers<[2], [2], [1], [1], [0, 0, 0, 1, 1, 1], [0], [0]>} : vector<4x32x8xf32>, vector<4x32x8xf32>, vector<4x32x32xf32> -> vector<4x32x32xf32>
    "tpu.trace_stop"() : () -> ()
    %162 = vector.shape_cast %2 : vector<32x32xf32> to vector<1x32x32xf32>
    %163 = vector.broadcast %162 : vector<1x32x32xf32> to vector<4x32x32xf32>
    %164 = arith.addf %161, %163 : vector<4x32x32xf32>
    %cst_114 = arith.constant dense<0xFF800000> : vector<4x32xf32>
    %165 = vector.multi_reduction <maximumf>, %164, %cst_114 [2] : vector<4x32x32xf32> to vector<4x32xf32>
    %166 = vector.shape_cast %165 : vector<4x32xf32> to vector<4x32x1xf32>
    %167 = vector.broadcast %166 : vector<4x32x1xf32> to vector<4x32x32xf32>
    %168 = arith.subf %164, %167 : vector<4x32x32xf32>
    %169 = math.exp %168 : vector<4x32x32xf32>
    %cst_115 = arith.constant dense<0.000000e+00> : vector<4x32xf32>
    %170 = vector.multi_reduction <add>, %169, %cst_115 [2] : vector<4x32x32xf32> to vector<4x32xf32>
    %171 = vector.shape_cast %170 : vector<4x32xf32> to vector<4x32x1xf32>
    %172 = tpu.reciprocal %171 {approx = true} : vector<4x32x1xf32> -> vector<4x32x1xf32>
    %173 = vector.broadcast %172 : vector<4x32x1xf32> to vector<4x32x32xf32>
    %174 = arith.mulf %169, %173 : vector<4x32x32xf32>
    "tpu.trace_start"() <{level = 10 : i32, message = "hij,hjd->hid"}> : () -> ()
    %cst_116 = arith.constant dense<0.000000e+00> : vector<4x32x8xf32>
    %175 = tpu.matmul %174, %160, %cst_116 {dimension_numbers = #tpu.dot_dimension_numbers<[2], [1], [1], [2], [0, 0, 0, 1, 1, 2], [0], [0]>} : vector<4x32x32xf32>, vector<4x32x8xf32>, vector<4x32x8xf32> -> vector<4x32x8xf32>
    "tpu.trace_stop"() : () -> ()
    %c0_117 = arith.constant 0 : index
    %c4_118 = arith.constant 4 : index
    %c0_119 = arith.constant 0 : index
    %c0_120 = arith.constant 0 : index
    %176 = vector.load %arg11[%c0_117, %c4_118, %c0_119, %c0_120] : memref<1x8x8x32xf32, #tpu.memory_space<vmem>>, vector<1x4x8x32xf32>
    %177 = vector.shape_cast %176 : vector<1x4x8x32xf32> to vector<4x8x32xf32>
    "tpu.trace_start"() <{level = 10 : i32, message = "htd,hde->hte"}> : () -> ()
    %cst_121 = arith.constant dense<0.000000e+00> : vector<4x32x32xf32>
    %178 = tpu.matmul %175, %177, %cst_121 {dimension_numbers = #tpu.dot_dimension_numbers<[2], [1], [1], [2], [0, 0, 0, 1, 1, 2], [0], [0]>} : vector<4x32x8xf32>, vector<4x8x32xf32>, vector<4x32x32xf32> -> vector<4x32x32xf32>
    "tpu.trace_stop"() : () -> ()
    %cst_122 = arith.constant dense<0.000000e+00> : vector<32x32xf32>
    %179 = vector.multi_reduction <add>, %178, %cst_122 [0] : vector<4x32x32xf32> to vector<32x32xf32>
    %180 = arith.addf %122, %179 : vector<32x32xf32>
    %c0_123 = arith.constant 0 : index
    %c1_124 = arith.constant 1 : index
    %c0_125 = arith.constant 0 : index
    %c0_126 = arith.constant 0 : index
    %181 = vector.load %arg12[%c0_123, %c1_124, %c0_125, %c0_126] : memref<1x2x1x32xf32, #tpu.memory_space<vmem>>, vector<1x1x1x32xf32>
    %182 = vector.shape_cast %181 : vector<1x1x1x32xf32> to vector<1x32xf32>
    %183 = vector.broadcast %182 : vector<1x32xf32> to vector<32x32xf32>
    %184 = arith.addf %180, %183 : vector<32x32xf32>
    %c0_127 = arith.constant 0 : index
    %c1_128 = arith.constant 1 : index
    %c0_129 = arith.constant 0 : index
    %c0_130 = arith.constant 0 : index
    %185 = vector.load %arg13[%c0_127, %c1_128, %c0_129, %c0_130] : memref<1x2x1x32xf32, #tpu.memory_space<vmem>>, vector<1x1x1x32xf32>
    %186 = vector.shape_cast %185 : vector<1x1x1x32xf32> to vector<1x32xf32>
    %c0_131 = arith.constant 0 : index
    %c1_132 = arith.constant 1 : index
    %c0_133 = arith.constant 0 : index
    %c0_134 = arith.constant 0 : index
    %187 = vector.load %arg14[%c0_131, %c1_132, %c0_133, %c0_134] : memref<1x2x1x32xf32, #tpu.memory_space<vmem>>, vector<1x1x1x32xf32>
    %188 = vector.shape_cast %187 : vector<1x1x1x32xf32> to vector<1x32xf32>
    %cst_135 = arith.constant dense<0.000000e+00> : vector<32xf32>
    %189 = vector.multi_reduction <add>, %184, %cst_135 [1] : vector<32x32xf32> to vector<32xf32>
    %190 = vector.shape_cast %189 : vector<32xf32> to vector<32x1xf32>
    %cst_136 = arith.constant 3.200000e+01 : f32
    %191 = vector.broadcast %cst_136 : f32 to vector<32x1xf32>
    %192 = arith.divf %190, %191 : vector<32x1xf32>
    %193 = vector.broadcast %192 : vector<32x1xf32> to vector<32x32xf32>
    %194 = arith.subf %184, %193 : vector<32x32xf32>
    %195 = arith.mulf %194, %194 : vector<32x32xf32>
    %cst_137 = arith.constant dense<0.000000e+00> : vector<32xf32>
    %196 = vector.multi_reduction <add>, %195, %cst_137 [1] : vector<32x32xf32> to vector<32xf32>
    %197 = vector.shape_cast %196 : vector<32xf32> to vector<32x1xf32>
    %cst_138 = arith.constant 3.200000e+01 : f32
    %198 = vector.broadcast %cst_138 : f32 to vector<32x1xf32>
    %199 = arith.divf %197, %198 : vector<32x1xf32>
    %200 = vector.broadcast %192 : vector<32x1xf32> to vector<32x32xf32>
    %201 = arith.subf %184, %200 : vector<32x32xf32>
    %cst_139 = arith.constant 9.99999974E-6 : f32
    %202 = vector.broadcast %cst_139 : f32 to vector<32x1xf32>
    %203 = arith.addf %199, %202 : vector<32x1xf32>
    %204 = math.rsqrt %203 : vector<32x1xf32>
    %205 = vector.broadcast %204 : vector<32x1xf32> to vector<32x32xf32>
    %206 = arith.mulf %201, %205 : vector<32x32xf32>
    %207 = vector.broadcast %186 : vector<1x32xf32> to vector<32x32xf32>
    %208 = arith.mulf %206, %207 : vector<32x32xf32>
    %209 = vector.broadcast %188 : vector<1x32xf32> to vector<32x32xf32>
    %210 = arith.addf %208, %209 : vector<32x32xf32>
    %c0_140 = arith.constant 0 : index
    %c1_141 = arith.constant 1 : index
    %c0_142 = arith.constant 0 : index
    %c0_143 = arith.constant 0 : index
    %211 = vector.load %arg15[%c0_140, %c1_141, %c0_142, %c0_143] : memref<1x2x32x64xf32, #tpu.memory_space<vmem>>, vector<1x1x32x64xf32>
    %212 = vector.shape_cast %211 : vector<1x1x32x64xf32> to vector<32x64xf32>
    %cst_144 = arith.constant dense<0.000000e+00> : vector<32x64xf32>
    %213 = tpu.matmul %210, %212, %cst_144 {dimension_numbers = #tpu.dot_dimension_numbers<[1], [0], [0], [1], [0, 0, 1, 1], [], []>} : vector<32x32xf32>, vector<32x64xf32>, vector<32x64xf32> -> vector<32x64xf32>
    %c0_145 = arith.constant 0 : index
    %c1_146 = arith.constant 1 : index
    %c0_147 = arith.constant 0 : index
    %c0_148 = arith.constant 0 : index
    %214 = vector.load %arg16[%c0_145, %c1_146, %c0_147, %c0_148] : memref<1x2x1x64xf32, #tpu.memory_space<vmem>>, vector<1x1x1x64xf32>
    %215 = vector.shape_cast %214 : vector<1x1x1x64xf32> to vector<1x64xf32>
    %216 = vector.broadcast %215 : vector<1x64xf32> to vector<32x64xf32>
    %217 = arith.addf %213, %216 : vector<32x64xf32>
    %218 = arith.mulf %217, %217 : vector<32x64xf32>
    %219 = arith.mulf %217, %218 : vector<32x64xf32>
    %cst_149 = arith.constant 4.471500e-02 : f32
    %220 = vector.broadcast %cst_149 : f32 to vector<32x64xf32>
    %221 = arith.mulf %220, %219 : vector<32x64xf32>
    %222 = arith.addf %217, %221 : vector<32x64xf32>
    %cst_150 = arith.constant 0.797884583 : f32
    %223 = vector.broadcast %cst_150 : f32 to vector<32x64xf32>
    %224 = arith.mulf %223, %222 : vector<32x64xf32>
    %225 = math.tanh %224 : vector<32x64xf32>
    %cst_151 = arith.constant 1.000000e+00 : f32
    %226 = vector.broadcast %cst_151 : f32 to vector<32x64xf32>
    %227 = arith.addf %226, %225 : vector<32x64xf32>
    %cst_152 = arith.constant 5.000000e-01 : f32
    %228 = vector.broadcast %cst_152 : f32 to vector<32x64xf32>
    %229 = arith.mulf %228, %227 : vector<32x64xf32>
    %230 = arith.mulf %217, %229 : vector<32x64xf32>
    %c0_153 = arith.constant 0 : index
    %c1_154 = arith.constant 1 : index
    %c0_155 = arith.constant 0 : index
    %c0_156 = arith.constant 0 : index
    %231 = vector.load %arg17[%c0_153, %c1_154, %c0_155, %c0_156] : memref<1x2x64x32xf32, #tpu.memory_space<vmem>>, vector<1x1x64x32xf32>
    %232 = vector.shape_cast %231 : vector<1x1x64x32xf32> to vector<64x32xf32>
    %cst_157 = arith.constant dense<0.000000e+00> : vector<32x32xf32>
    %233 = tpu.matmul %230, %232, %cst_157 {dimension_numbers = #tpu.dot_dimension_numbers<[1], [0], [0], [1], [0, 0, 1, 1], [], []>} : vector<32x64xf32>, vector<64x32xf32>, vector<32x32xf32> -> vector<32x32xf32>
    %234 = arith.addf %184, %233 : vector<32x32xf32>
    %c0_158 = arith.constant 0 : index
    %c1_159 = arith.constant 1 : index
    %c0_160 = arith.constant 0 : index
    %c0_161 = arith.constant 0 : index
    %235 = vector.load %arg18[%c0_158, %c1_159, %c0_160, %c0_161] : memref<1x2x1x32xf32, #tpu.memory_space<vmem>>, vector<1x1x1x32xf32>
    %236 = vector.shape_cast %235 : vector<1x1x1x32xf32> to vector<1x32xf32>
    %237 = vector.broadcast %236 : vector<1x32xf32> to vector<32x32xf32>
    %238 = arith.addf %234, %237 : vector<32x32xf32>
    %cst_162 = arith.constant dense<0.000000e+00> : vector<2x32xf32>
    %239 = tpu.matmul %3, %238, %cst_162 {dimension_numbers = #tpu.dot_dimension_numbers<[1], [0], [0], [1], [0, 0, 1, 1], [], []>} : vector<2x32xf32>, vector<32x32xf32>, vector<2x32xf32> -> vector<2x32xf32>
    %c0_163 = arith.constant 0 : index
    %c0_164 = arith.constant 0 : index
    %c0_165 = arith.constant 0 : index
    %240 = vector.load %arg19[%c0_163, %c0_164, %c0_165] : memref<1x1x32xf32, #tpu.memory_space<vmem>>, vector<1x1x32xf32>
    %241 = vector.shape_cast %240 : vector<1x1x32xf32> to vector<1x32xf32>
    %c0_166 = arith.constant 0 : index
    %c0_167 = arith.constant 0 : index
    %c0_168 = arith.constant 0 : index
    %242 = vector.load %arg20[%c0_166, %c0_167, %c0_168] : memref<1x1x32xf32, #tpu.memory_space<vmem>>, vector<1x1x32xf32>
    %243 = vector.shape_cast %242 : vector<1x1x32xf32> to vector<1x32xf32>
    %cst_169 = arith.constant dense<0.000000e+00> : vector<2xf32>
    %244 = vector.multi_reduction <add>, %239, %cst_169 [1] : vector<2x32xf32> to vector<2xf32>
    %245 = vector.shape_cast %244 : vector<2xf32> to vector<2x1xf32>
    %cst_170 = arith.constant 3.200000e+01 : f32
    %246 = vector.broadcast %cst_170 : f32 to vector<2x1xf32>
    %247 = arith.divf %245, %246 : vector<2x1xf32>
    %248 = vector.broadcast %247 : vector<2x1xf32> to vector<2x32xf32>
    %249 = arith.subf %239, %248 : vector<2x32xf32>
    %250 = arith.mulf %249, %249 : vector<2x32xf32>
    %cst_171 = arith.constant dense<0.000000e+00> : vector<2xf32>
    %251 = vector.multi_reduction <add>, %250, %cst_171 [1] : vector<2x32xf32> to vector<2xf32>
    %252 = vector.shape_cast %251 : vector<2xf32> to vector<2x1xf32>
    %cst_172 = arith.constant 3.200000e+01 : f32
    %253 = vector.broadcast %cst_172 : f32 to vector<2x1xf32>
    %254 = arith.divf %252, %253 : vector<2x1xf32>
    %255 = vector.broadcast %247 : vector<2x1xf32> to vector<2x32xf32>
    %256 = arith.subf %239, %255 : vector<2x32xf32>
    %cst_173 = arith.constant 9.99999974E-6 : f32
    %257 = vector.broadcast %cst_173 : f32 to vector<2x1xf32>
    %258 = arith.addf %254, %257 : vector<2x1xf32>
    %259 = math.rsqrt %258 : vector<2x1xf32>
    %260 = vector.broadcast %259 : vector<2x1xf32> to vector<2x32xf32>
    %261 = arith.mulf %256, %260 : vector<2x32xf32>
    %262 = vector.broadcast %241 : vector<1x32xf32> to vector<2x32xf32>
    %263 = arith.mulf %261, %262 : vector<2x32xf32>
    %264 = vector.broadcast %243 : vector<1x32xf32> to vector<2x32xf32>
    %265 = arith.addf %263, %264 : vector<2x32xf32>
    %c0_174 = arith.constant 0 : index
    %c0_175 = arith.constant 0 : index
    %c0_176 = arith.constant 0 : index
    %266 = vector.load %arg21[%c0_174, %c0_175, %c0_176] : memref<1x32x128xf32, #tpu.memory_space<vmem>>, vector<1x32x128xf32>
    %267 = vector.shape_cast %266 : vector<1x32x128xf32> to vector<32x128xf32>
    %cst_177 = arith.constant dense<0.000000e+00> : vector<2x128xf32>
    %268 = tpu.matmul %265, %267, %cst_177 {dimension_numbers = #tpu.dot_dimension_numbers<[1], [0], [0], [1], [0, 0, 1, 1], [], []>} : vector<2x32xf32>, vector<32x128xf32>, vector<2x128xf32> -> vector<2x128xf32>
    %c0_178 = arith.constant 0 : index
    %c0_179 = arith.constant 0 : index
    %c0_180 = arith.constant 0 : index
    %269 = vector.load %arg22[%c0_178, %c0_179, %c0_180] : memref<1x1x128xf32, #tpu.memory_space<vmem>>, vector<1x1x128xf32>
    %270 = vector.shape_cast %269 : vector<1x1x128xf32> to vector<1x128xf32>
    %271 = vector.broadcast %270 : vector<1x128xf32> to vector<2x128xf32>
    %272 = arith.addf %268, %271 : vector<2x128xf32>
    %c0_181 = arith.constant 0 : index
    %c0_182 = arith.constant 0 : index
    %c0_183 = arith.constant 0 : index
    %c0_184 = arith.constant 0 : index
    %273 = vector.load %arg23[%c0_181, %c0_182, %c0_183, %c0_184] : memref<1x1x2x128xf32, #tpu.memory_space<vmem>>, vector<1x1x2x128xf32>
    %274 = vector.shape_cast %273 : vector<1x1x2x128xf32> to vector<2x128xf32>
    %275 = vector.shape_cast %272 : vector<2x128xf32> to vector<1x1x2x128xf32>
    tpu.vector_store %arg23[%c0_181, %c0_182, %c0_183, %c0_184], %275 {strides = array<i32>} : memref<1x1x2x128xf32, #tpu.memory_space<vmem>>, vector<1x1x2x128xf32>,
    return
  }
  func.func @transform_0(%arg0: i32, %arg1: i32) -> (i32, i32, i32, i32) {
    %c0_i32 = arith.constant 0 : i32
    %c0_i32_0 = arith.constant 0 : i32
    %c0_i32_1 = arith.constant 0 : i32
    return %arg0, %arg1, %c0_i32, %c0_i32_0 : i32, i32, i32, i32
  }
  func.func @transform_1(%arg0: i32, %arg1: i32) -> (i32, i32) {
    %c0_i32 = arith.constant 0 : i32
    %c0_i32_0 = arith.constant 0 : i32
    %c0_i32_1 = arith.constant 0 : i32
    return %c0_i32, %c0_i32_0 : i32, i32
  }
  func.func @transform_2(%arg0: i32, %arg1: i32) -> (i32, i32) {
    %c0_i32 = arith.constant 0 : i32
    %c0_i32_0 = arith.constant 0 : i32
    %c0_i32_1 = arith.constant 0 : i32
    return %c0_i32, %c0_i32_0 : i32, i32
  }
  func.func @transform_3(%arg0: i32, %arg1: i32) -> (i32, i32, i32) {
    %c0_i32 = arith.constant 0 : i32
    %c0_i32_0 = arith.constant 0 : i32
    %c0_i32_1 = arith.constant 0 : i32
    return %arg0, %c0_i32, %c0_i32_0 : i32, i32, i32
  }
  func.func @transform_4(%arg0: i32, %arg1: i32) -> (i32, i32, i32, i32) {
    %c0_i32 = arith.constant 0 : i32
    %c0_i32_0 = arith.constant 0 : i32
    %c0_i32_1 = arith.constant 0 : i32
    %c0_i32_2 = arith.constant 0 : i32
    return %arg0, %c0_i32, %c0_i32_0, %c0_i32_1 : i32, i32, i32, i32
  }
  func.func @transform_5(%arg0: i32, %arg1: i32) -> (i32, i32, i32, i32) {
    %c0_i32 = arith.constant 0 : i32
    %c0_i32_0 = arith.constant 0 : i32
    %c0_i32_1 = arith.constant 0 : i32
    %c0_i32_2 = arith.constant 0 : i32
    return %arg0, %c0_i32, %c0_i32_0, %c0_i32_1 : i32, i32, i32, i32
  }
  func.func @transform_6(%arg0: i32, %arg1: i32) -> (i32, i32, i32, i32) {
    %c0_i32 = arith.constant 0 : i32
    %c0_i32_0 = arith.constant 0 : i32
    %c0_i32_1 = arith.constant 0 : i32
    %c0_i32_2 = arith.constant 0 : i32
    return %arg0, %c0_i32, %c0_i32_0, %c0_i32_1 : i32, i32, i32, i32
  }
  func.func @transform_7(%arg0: i32, %arg1: i32) -> (i32, i32, i32, i32) {
    %c0_i32 = arith.constant 0 : i32
    %c0_i32_0 = arith.constant 0 : i32
    %c0_i32_1 = arith.constant 0 : i32
    %c0_i32_2 = arith.constant 0 : i32
    return %arg0, %c0_i32, %c0_i32_0, %c0_i32_1 : i32, i32, i32, i32
  }
  func.func @transform_8(%arg0: i32, %arg1: i32) -> (i32, i32, i32, i32) {
    %c0_i32 = arith.constant 0 : i32
    %c0_i32_0 = arith.constant 0 : i32
    %c0_i32_1 = arith.constant 0 : i32
    %c0_i32_2 = arith.constant 0 : i32
    return %arg0, %c0_i32, %c0_i32_0, %c0_i32_1 : i32, i32, i32, i32
  }
  func.func @transform_9(%arg0: i32, %arg1: i32) -> (i32, i32, i32, i32) {
    %c0_i32 = arith.constant 0 : i32
    %c0_i32_0 = arith.constant 0 : i32
    %c0_i32_1 = arith.constant 0 : i32
    %c0_i32_2 = arith.constant 0 : i32
    return %arg0, %c0_i32, %c0_i32_0, %c0_i32_1 : i32, i32, i32, i32
  }
  func.func @transform_10(%arg0: i32, %arg1: i32) -> (i32, i32, i32, i32) {
    %c0_i32 = arith.constant 0 : i32
    %c0_i32_0 = arith.constant 0 : i32
    %c0_i32_1 = arith.constant 0 : i32
    %c0_i32_2 = arith.constant 0 : i32
    return %arg0, %c0_i32, %c0_i32_0, %c0_i32_1 : i32, i32, i32, i32
  }
  func.func @transform_11(%arg0: i32, %arg1: i32) -> (i32, i32, i32, i32) {
    %c0_i32 = arith.constant 0 : i32
    %c0_i32_0 = arith.constant 0 : i32
    %c0_i32_1 = arith.constant 0 : i32
    %c0_i32_2 = arith.constant 0 : i32
    return %arg0, %c0_i32, %c0_i32_0, %c0_i32_1 : i32, i32, i32, i32
  }
  func.func @transform_12(%arg0: i32, %arg1: i32) -> (i32, i32, i32, i32) {
    %c0_i32 = arith.constant 0 : i32
    %c0_i32_0 = arith.constant 0 : i32
    %c0_i32_1 = arith.constant 0 : i32
    %c0_i32_2 = arith.constant 0 : i32
    return %arg0, %c0_i32, %c0_i32_0, %c0_i32_1 : i32, i32, i32, i32
  }
  func.func @transform_13(%arg0: i32, %arg1: i32) -> (i32, i32, i32, i32) {
    %c0_i32 = arith.constant 0 : i32
    %c0_i32_0 = arith.constant 0 : i32
    %c0_i32_1 = arith.constant 0 : i32
    %c0_i32_2 = arith.constant 0 : i32
    return %arg0, %c0_i32, %c0_i32_0, %c0_i32_1 : i32, i32, i32, i32
  }
  func.func @transform_14(%arg0: i32, %arg1: i32) -> (i32, i32, i32, i32) {
    %c0_i32 = arith.constant 0 : i32
    %c0_i32_0 = arith.constant 0 : i32
    %c0_i32_1 = arith.constant 0 : i32
    %c0_i32_2 = arith.constant 0 : i32
    return %arg0, %c0_i32, %c0_i32_0, %c0_i32_1 : i32, i32, i32, i32
  }
  func.func @transform_15(%arg0: i32, %arg1: i32) -> (i32, i32, i32, i32) {
    %c0_i32 = arith.constant 0 : i32
    %c0_i32_0 = arith.constant 0 : i32
    %c0_i32_1 = arith.constant 0 : i32
    %c0_i32_2 = arith.constant 0 : i32
    return %arg0, %c0_i32, %c0_i32_0, %c0_i32_1 : i32, i32, i32, i32
  }
  func.func @transform_16(%arg0: i32, %arg1: i32) -> (i32, i32, i32, i32) {
    %c0_i32 = arith.constant 0 : i32
    %c0_i32_0 = arith.constant 0 : i32
    %c0_i32_1 = arith.constant 0 : i32
    %c0_i32_2 = arith.constant 0 : i32
    return %arg0, %c0_i32, %c0_i32_0, %c0_i32_1 : i32, i32, i32, i32
  }
  func.func @transform_17(%arg0: i32, %arg1: i32) -> (i32, i32, i32) {
    %c0_i32 = arith.constant 0 : i32
    %c0_i32_0 = arith.constant 0 : i32
    %c0_i32_1 = arith.constant 0 : i32
    return %arg0, %c0_i32, %c0_i32_0 : i32, i32, i32
  }
  func.func @transform_18(%arg0: i32, %arg1: i32) -> (i32, i32, i32) {
    %c0_i32 = arith.constant 0 : i32
    %c0_i32_0 = arith.constant 0 : i32
    %c0_i32_1 = arith.constant 0 : i32
    return %arg0, %c0_i32, %c0_i32_0 : i32, i32, i32
  }
  func.func @transform_19(%arg0: i32, %arg1: i32) -> (i32, i32, i32) {
    %c0_i32 = arith.constant 0 : i32
    %c0_i32_0 = arith.constant 0 : i32
    %c0_i32_1 = arith.constant 0 : i32
    return %arg0, %c0_i32, %c0_i32_0 : i32, i32, i32
  }
  func.func @transform_20(%arg0: i32, %arg1: i32) -> (i32, i32, i32) {
    %c0_i32 = arith.constant 0 : i32
    %c0_i32_0 = arith.constant 0 : i32
    %c0_i32_1 = arith.constant 0 : i32
    return %arg0, %c0_i32, %c0_i32_0 : i32, i32, i32
  }
  func.func @transform_21(%arg0: i32, %arg1: i32) -> (i32, i32, i32, i32) {
    %c0_i32 = arith.constant 0 : i32
    %c0_i32_0 = arith.constant 0 : i32
    %c0_i32_1 = arith.constant 0 : i32
    return %arg0, %arg1, %c0_i32, %c0_i32_0 : i32, i32, i32, i32
  }
}

</mosaic_0001>

<bundles_post_ra>
// kernel: tpu_custom_call.1
= control target key start
LH: loop header
LB: loop body
LE: loop exit
PB: predicated region body
PF: predicated region fallthrough
CT: control target
= control target key end

     0   :  { %s6744_s0 = inlined_call_operand.vmem [shape: f32[2,1,32,54], index: 0, kind: input, shape index: {}]   ;;  %s6745_s1 = inlined_call_operand.vmem [shape: f32[32,32], index: 1, kind: input, shape index: {}]   ;;  %s6746_s2 = inlined_call_operand.vmem [shape: f32[2,32], index: 2, kind: input, shape index: {}]   ;;  %s6747_s3 = inlined_call_operand.vmem [shape: f32[2,54,32], index: 3, kind: input, shape index: {}]   ;;  %s6748_s4 = inlined_call_operand.vmem [shape: f32[2,2,1,32], index: 4, kind: input, shape index: {}]   ;;  %s6749_s5 = inlined_call_operand.vmem [shape: f32[2,2,1,32], index: 5, kind: input, shape index: {}]   ;;  %s6750_s6 = inlined_call_operand.vmem [shape: f32[2,8,32,8], index: 6, kind: input, shape index: {}]   ;;  %s6751_s7 = inlined_call_operand.vmem [shape: f32[2,8,32,8], index: 7, kind: input, shape index: {}]   ;;  %s6752_s8 = inlined_call_operand.vmem [shape: f32[2,8,32,8], index: 8, kind: input, shape index: {}]   ;;  %s6753_s9 = inlined_call_operand.vmem [shape: f32[2,8,8,32], index: 9, kind: input, shape index: {}]   ;;  %s6754_s10 = inlined_call_operand.vmem [shape: f32[2,2,1,32], index: 10, kind: input, shape index: {}]   ;;  %s6755_s11 = inlined_call_operand.vmem [shape: f32[2,2,1,32], index: 11, kind: input, shape index: {}]   ;;  %s6756_s12 = inlined_call_operand.vmem [shape: f32[2,2,1,32], index: 12, kind: input, shape index: {}]   ;;  %s6757_s13 = inlined_call_operand.vmem [shape: f32[2,2,32,64], index: 13, kind: input, shape index: {}]   ;;  %s6758_s14 = inlined_call_operand.vmem [shape: f32[2,2,1,64], index: 14, kind: input, shape index: {}]   ;;  %s6759_s15 = inlined_call_operand.vmem [shape: f32[2,2,64,32], index: 15, kind: input, shape index: {}]   ;;  %s6760_s16 = inlined_call_operand.vmem [shape: f32[2,2,1,32], index: 16, kind: input, shape index: {}]   ;;  %s6761_s17 = inlined_call_operand.vmem [shape: f32[2,1,32], index: 17, kind: input, shape index: {}]   ;;  %s6762_s18 = inlined_call_operand.vmem [shape: f32[2,1,32], index: 18, kind: input, shape index: {}]   ;;  %s6763_s19 = inlined_call_operand.vmem [shape: f32[2,32,128], index: 19, kind: input, shape index: {}]   ;;  %s6764_s20 = inlined_call_operand.vmem [shape: f32[2,1,128], index: 20, kind: input, shape index: {}]   ;;  %s6765_s21 = inlined_call_operand.hbm [shape: f32[2,1,2,128], index: 21, kind: output, shape index: {}]  }
   0x1   :  { %6776 = sst [smem:[#allocation12_spill]] %s6744_s0 }
   0x2   :  { %6777 = sst [smem:[#allocation13_spill]] %s6745_s1 }
   0x3   :  { %6778 = sst [smem:[#allocation14_spill]] %s6746_s2 }
   0x4   :  { %6779 = sst [smem:[#allocation15_spill]] %s6747_s3 }
   0x5   :  { %6780 = sst [smem:[#allocation16_spill]] %s6748_s4 }
   0x6   :  { %6781 = sst [smem:[#allocation17_spill]] %s6749_s5 }
   0x7   :  { %6782 = sst [smem:[#allocation18_spill]] %s6750_s6 }
   0x8   :  { %6783 = sst [smem:[#allocation19_spill]] %s6751_s7 }
   0x9   :  { %6784 = sst [smem:[#allocation20_spill]] %s6752_s8 }
   0xa   :  { %6785 = sst [smem:[#allocation21_spill]] %s6753_s9 }
   0xb   :  { %6786 = sst [smem:[#allocation22_spill]] %s6754_s10 }
   0xc   :  { %6787 = sst [smem:[#allocation23_spill]] %s6755_s11 }
   0xd   :  { %6788 = sst [smem:[#allocation24_spill]] %s6756_s12 }
   0xe   :  { %6789 = sst [smem:[#allocation25_spill]] %s6757_s13 }
   0xf   :  { %6790 = sst [smem:[#allocation26_spill]] %s6758_s14 }
  0x10   :  { %26 = vsyncpa [#allocation3], 0 }
  0x11   :  { %28 = vsyncpa [#allocation3 + $0x1], 0  ;;  %s5339_s2 = smov 0   ;;  %s5341_s25 = smov 0  }
  0x12   :  { %s5343_s26 = smov 0   ;;  %s5345_s27 = smov 0  }
  0x13   :  { %s5347_s3 = smov 0   ;;  %s5349_s28 = smov 0  }
  0x14 LB: > { %6791 = sst [smem:[#allocation5_spill]] %s5206_s2  ;;  %s4522_s29 = sadd.s32 4294967295, %s5226_s28   ;;  %s5226_s28 = sphi %s5349_s28, %s34_s28   ;;  %s5222_s3 = sphi %s5347_s3, %s6823_s3   ;;  %s5218_s27 = sphi %s5345_s27, %s6822_s27   ;;  %s5214_s26 = sphi %s5343_s26, %s6821_s26   ;;  %s5210_s25 = sphi %s5341_s25, %s6825_s25   ;;  %s5206_s2 = sphi %s5339_s2, %s6824_s2  }
  0x15   : > { %6792 = sst [smem:[#allocation6_spill]] %s5214_s26  ;;  %s4523_s0 = sadd.s32 4294967294, %s5226_s28  }
  0x16   : > { %6793 = sst [smem:[#allocation7_spill]] %s5222_s3  ;;  %s46_s4 = sadd.s32 1, %s5222_s3 }
  0x17   : > { %6794 = sst [smem:[#allocation8_spill]] %s5226_s28  ;;  %s593_s30 = sadd.s32 1, %s5214_s26 }
  0x18   : > { %p48_p0 = scmp.ge.s32.totalorder %s46_s4, 2  ;;  %p603_p1 = scmp.ne.s32.totalorder %s5214_s26, %s5210_s25 }
  0x19   : > { %p604_p2 = scmp.eq.s32.totalorder %s4522_s29, 1  ;;  %p609_p3 = scmp.ne.s32.totalorder %s5210_s25, %s5206_s2 }
  0x1a   : > { %s6827_s4 = smov (%p48_p0, %s46_s4), 0  ;;  %p610_p5 = scmp.eq.s32.totalorder %s4523_s0, 1 }
  0x1b   : > { %6795 = sst [smem:[#allocation9_spill]] %s6827_s4  ;;  %p5379_p4 = por %p604_p2, %p603_p1 }
  0x1c   : > { %s588_s22 = ssub.s32 %s5222_s3, %s6827_s4  ;;  %p4526_p6 = scmp.ge.s32.totalorder %s5226_s28, 1 }
  0x1d   : > { %p591_p7 = scmp.eq.s32.totalorder %s588_s22, 0  ;;  %p5386_p8 = por %p610_p5, %p609_p3 }
  0x1e   : > { %p777_p9 = scmp.lt.s32.totalorder %s5226_s28, 3 }
  0x1f   : > { %s6797_s23 = scalar_select %p5386_p8, 1, 0 }
  0x20   : > { %s5392_s1 = scalar_select %p591_p7, %s5214_s26, %s593_s30  }
  0x21   : > { %6798 = sst [smem:[#allocation10_spill]] %s6797_s23  ;;  %p778_p10 = pnand %p4526_p6, %p777_p9 }
  0x22   : > { %6799 = sst [smem:[#allocation11_spill]] %s5392_s1  ;;  %p918_p11 = scmp.lt.s32.totalorder (!%p778_p10), %s5218_s27, 1 }
  0x23   : > { %781 = sbr.rel (%p778_p10) target bundleno = 4175 (0x104f), region = 104  ;;  %s6800_s4 = sld [smem:[#allocation15_spill]] (!%p778_p10) }
  0x24   : > { %s6801_s23 = sld [smem:[#allocation12_spill]] (!%p778_p10) }
  0x25   : > { %s6803_s0 = sld [smem:[#allocation17_spill]] (!%p778_p10) }
  0x26   : > { %s6804_s6 = sld [smem:[#allocation18_spill]] (!%p778_p10) }
  0x27   : > { %s6805_s7 = sld [smem:[#allocation19_spill]] (!%p778_p10) }
  0x28   : > { %s5396_s24 = scalar_select %p918_p11, %s5218_s27, 1  ;;  %vm1033_vm0 = vcmask 1045504   ;;  %vm1020_vm1 = vcmask 441344   ;;  %vm1068_vm2 = vcmask 261120   ;;  %v5228_v19 = vmov 32.0  }
  0x29   : > { %4964 = vrcp.f32 %v5228_v19  ;;  %s6806_s8 = sld [smem:[#allocation20_spill]] }
  0x2a   : > { %s4890_s29 = smul.u32 56, %s5396_s24  ;;  %s6772_s30 = sshll.u32 %s5396_s24, 5 }
  0x2b   : > { %s926_s2 = scalar_lea.vmem %s6801_s23, %s6772_s30  ;;  %s5470_s26 = sshll.u32 %s5396_s24, 8 }
  0x2c   : > { %s931_s3 = scalar_lea.vmem %s6800_s4, %s4890_s29  ;;  %v1004_v7 = vld [vmem:[%s926_s2] sm:$0xff]  ;;  %v1005_v8 = vld [vmem:[%s926_s2 + $0x8] sm:$0xff]  ;;  %v1006_v9 = vld [vmem:[%s926_s2 + $0x10] sm:$0xff]  ;;  %s6802_s4 = sld [smem:[#allocation16_spill]] }
  0x2d   : > { %v1019_v0 = vld [vmem:[%s931_s3 + $0x30] sm:$0x3f]  ;;  %v1018_v1 = vld [vmem:[%s931_s3 + $0x28] sm:$0xff]  ;;  %v1017_v2 = vld [vmem:[%s931_s3 + $0x20] sm:$0xff]  ;;  %s5476_s1 = scalar_lea.vmem %s6804_s6, %s5470_s26  ;;  %s6807_s29 = sld [smem:[#allocation13_spill]] }
  0x2e   : > { %4552 = vmatpush.msk.msra.mxu0 %vm1033_vm0, %v1019_v0  ;;  %v1016_v3 = vld [vmem:[%s931_s3 + $0x18] sm:$0xff]  ;;  %v1015_v4 = vld [vmem:[%s931_s3 + $0x10] sm:$0xff]  ;;  %v1014_v5 = vld [vmem:[%s931_s3 + $0x8] sm:$0xff]  ;;  %vm1586_vm0 = vcmask 64512   ;;  %s6773_s6 = sshll.u32 %s5396_s24, 6  ;;  %s6808_s9 = sld [smem:[#allocation21_spill]] }
  0x2f   : > { %v1013_v6 = vld [vmem:[%s931_s3] sm:$0xff]  ;;  %v1007_v10 = vld [vmem:[%s926_s2 + $0x18] sm:$0xff]  ;;  %s5423_s2 = sshll.u32 %s5396_s24, 1  ;;  %v4965_v20 = vpop.eup %4964  ;;  %v1180_v47 = vld [vmem:[%s5476_s1 + $0x10] sm:$0xff]  ;;  %s5501_s3 = scalar_lea.vmem %s6805_s7, %s5470_s26 }
  0x30   : > { %1047 = vmatpush.msra.mxu0 %v1018_v1  ;;  %s5435_s22 = scalar_lea.vmem %s6803_s0, %s5423_s2  ;;  %v1082_v21 = vmul.f32 32.0, %v4965_v20  ;;  %vm1086_vm3 = vweird.f32 %v4965_v20  ;;  %v1181_v46 = vld [vmem:[%s5476_s1 + $0x18] sm:$0xff]  ;;  %v1179_v48 = vld [vmem:[%s5476_s1 + $0x8] sm:$0xff]  ;;  %v1178_v49 = vld [vmem:[%s5476_s1] sm:$0xff]  ;;  %s5556_s0 = scalar_lea.vmem %s6806_s8, %s5470_s26 }
  0x31   : > { %4882 = vmatpush.msra.mxu1 %v1181_v46  ;;  %4883 = vmatpush.msra.mxu2 %v1181_v46  ;;  %v1185_v58 = vld [vmem:[%s5476_s1 + $0x38] sm:$0xff]  ;;  %v1184_v62 = vld [vmem:[%s5476_s1 + $0x30] sm:$0xff]  ;;  %s6809_s10 = sld [smem:[#allocation22_spill]]  ;;  %s6813_s26 = sshll.u32 %s5396_s24, 6 }
  0x32   : > { %1048 = vmatpush.msra.mxu0 %v1017_v2  ;;  %s5429_s23 = scalar_lea.vmem %s6802_s4, %s5423_s2  ;;  %v1083_v22 = vsub.f32 1.0, %v1082_v21  ;;  %v1189_v59 = vld [vmem:[%s5476_s1 + $0x58] sm:$0xff]  ;;  %v1188_v63 = vld [vmem:[%s5476_s1 + $0x50] sm:$0xff]  ;;  %s6810_s11 = sld [smem:[#allocation23_spill]] }
  0x33   : > { %4884 = vmatpush.msra.mxu1 %v1180_v47  ;;  %4885 = vmatpush.msra.mxu2 %v1180_v47  ;;  %v1193_v61 = vld [vmem:[%s5476_s1 + $0x78] sm:$0xff]  ;;  %v1192_v0 = vld [vmem:[%s5476_s1 + $0x70] sm:$0xff]  ;;  %v5508_v19 = vld [vmem:[%s5429_s23] ss:$0 sm:$0xff]  ;;  %s6811_s12 = sld [smem:[#allocation24_spill]]  ;;  %s6064_s8 = scalar_lea.vmem %s6760_s16, %s5423_s2 }
  0x34   : > { %1049 = vmatpush.msra.mxu0 %v1016_v3  ;;  %v1084_v23 = vmul.f32 %v4965_v20, %v1083_v22  ;;  %1308 = vmatpush.msra.mxu3 %v1189_v59  ;;  %v1205_v22 = vld [vmem:[%s5501_s3 + $0x58] sm:$0xff]  ;;  %s5905_s4 = scalar_lea.vmem %s6808_s9, %s6773_s6  ;;  %s6812_s14 = sld [smem:[#allocation26_spill]] }
  0x35   : > { %4886 = vmatpush.msra.mxu1 %v1179_v48  ;;  %4887 = vmatpush.msra.mxu2 %v1179_v48  ;;  %v1197_v59 = vld [vmem:[%s5501_s3 + $0x18] sm:$0xff]  ;;  %s6814_s13 = sld [smem:[#allocation25_spill]]  ;;  %s4880_s9 = sshll.u32 %s5396_s24, 7 }
  0x36   : > { %1050 = vmatpush.msra.mxu0 %v1015_v4  ;;  %v1085_v24 = vadd.f32 %v4965_v20, %v1084_v23  ;;  %1309 = vmatpush.msra.mxu3 %v1188_v63  ;;  %v1183_v4 = vld [vmem:[%s5476_s1 + $0x28] sm:$0xff]  ;;  %v1204_v23 = vld [vmem:[%s5501_s3 + $0x50] sm:$0xff] }
  0x37   : > { %4888 = vmatpush.msra.mxu1 %v1178_v49  ;;  %4889 = vmatpush.msra.mxu2 %v1178_v49  ;;  %v1196_v63 = vld [vmem:[%s5501_s3 + $0x10] sm:$0xff]  ;;  %s5946_s6 = scalar_lea.vmem %s6809_s10, %s5423_s2 }
  0x38   : > { %1051 = vmatpush.msra.mxu0 %v1014_v5  ;;  %v5439_v25 = vsel %vm1086_vm3, %v4965_v20, %v1085_v24  ;;  %v1187_v5 = vld [vmem:[%s5476_s1 + $0x48] sm:$0xff]  ;;  %v5514_v24 = vld [vmem:[%s5435_s22] ss:$0 sm:$0xff]  ;;  %s5994_s7 = scalar_lea.vmem %s6810_s11, %s5423_s2 }
  0x39   : > { %1279 = vmatpush.msrb.mxu2 %v1185_v58  ;;  %1337 = vmatpush.msrb.mxu1 %v1193_v61  ;;  %v1209_v61 = vld [vmem:[%s5501_s3 + $0x78] sm:$0xff]  ;;  %s6000_s10 = scalar_lea.vmem %s6811_s12, %s5423_s2 }
  0x3a   : > { %1052 = vmatpush.msra.mxu0 %v1013_v6  ;;  %v1191_v6 = vld [vmem:[%s5476_s1 + $0x68] sm:$0xff]  ;;  %1310 = vmatpush.msra.mxu3 %v1187_v5  ;;  %s6034_s30 = scalar_lea.vmem %s6812_s14, %s5423_s2  ;;  %s6070_s14 = scalar_lea.vmem %s6759_s15, %s4880_s9 }
  0x3b   : > { %4553 = vmatmul.msk.f32.vlgmr.msra.gmra.mxu0 %vm1020_vm1, %v1004_v7  ;;  %1280 = vmatpush.msrb.mxu2 %v1184_v62  ;;  %v1207_v5 = vld [vmem:[%s5501_s3 + $0x68] sm:$0xff]  ;;  %s6041_s28 = scalar_lea.vmem %s6814_s13, %s6813_s26  ;;  %s1003_s13 = scalar_lea.vmem %s6764_s20, %s5396_s24 }
  0x3c   : > { %1250 = vmatpush.msrb.mxu0 %v1181_v46  ;;  %1338 = vmatpush.msrb.mxu1 %v1192_v0  ;;  %v1200_v0 = vld [vmem:[%s5501_s3 + $0x30] sm:$0xff]  ;;  %s6816_s2 = sshll.u32 %s5396_s24, 5 }
  0x3d   : > { %1281 = vmatpush.msrb.mxu2 %v1183_v4 }
  0x3e   : > { %1251 = vmatpush.msrb.mxu0 %v1180_v47  ;;  %1339 = vmatpush.msrb.mxu1 %v1191_v6  ;;  %v1194_v6 = vld [vmem:[%s5501_s3] sm:$0xff] }
  0x40   : > { %1252 = vmatpush.msrb.mxu0 %v1179_v48 }
  0x42   : > { %1253 = vmatpush.msrb.mxu0 %v1178_v49 }
  0x43   : > { %4554 = vmatmul.msk.f32.gmra.mxu0 %vm1020_vm1, %v1005_v8 }
  0x44   : > { %1424 = vmatpush.msra.mxu0 %v1205_v22  ;;  %v1224_v22 = vld [vmem:[%s5556_s0 + $0x70] sm:$0xff] }
  0x46   : > { %1425 = vmatpush.msra.mxu0 %v1204_v23  ;;  %v1211_v23 = vld [vmem:[%s5556_s0 + $0x8] sm:$0xff] }
  0x4b   : > { %4555 = vmatmul.msk.f32.gmra.mxu0 %vm1020_vm1, %v1006_v9 }
  0x53   : > { %4556 = vmatmul.msk.f32.gmra.mxu0 %vm1020_vm1, %v1007_v10  ;;  %v1182_v10 = vld [vmem:[%s5476_s1 + $0x20] sm:$0xff] }
  0x54   : > { %1282 = vmatpush.msrb.mxu2 %v1182_v10  ;;  %v1220_v10 = vld [vmem:[%s5556_s0 + $0x50] sm:$0xff] }
  0xb8   : > { %v5408_v11 = vpop.f32.mrf.mxu0 }
  0xb9   : > { %v1069_v18 = vsel %vm1068_vm2, %v5408_v11, 0.0 }
  0xc0   : > { %v5410_v12 = vpop.f32.mrf.mxu0 }
  0xc1   : > { %v1072_v13 = vsel %vm1068_vm2, %v5410_v12, 0.0 }
  0xc2   : > { %1073 = vadd.xlane.f32.xlu1 %v1072_v13  ;;  %v1186_v13 = vld [vmem:[%s5476_s1 + $0x40] sm:$0xff] }
  0xc3   : > { %1311 = vmatpush.msra.mxu3 %v1186_v13  ;;  %v1219_v13 = vld [vmem:[%s5556_s0 + $0x48] sm:$0xff] }
  0xc8   : > { %v5414_v14 = vpop.f32.mrf.mxu0 }
  0xc9   : > { %v1075_v15 = vsel %vm1068_vm2, %v5414_v14, 0.0 }
  0xca   : > { %1076 = vadd.xlane.f32.xlu1 %v1075_v15  ;;  %v1190_v15 = vld [vmem:[%s5476_s1 + $0x60] sm:$0xff] }
  0xcb   : > { %1340 = vmatpush.msrb.mxu1 %v1190_v15  ;;  %v1218_v15 = vld [vmem:[%s5556_s0 + $0x40] sm:$0xff] }
  0xd0   : > { %v5418_v16 = vpop.f32.mrf.mxu0 }
  0xd1   : > { %v1078_v17 = vsel %vm1068_vm2, %v5418_v16, 0.0 }
  0xd2   : > { %1079 = vadd.xlane.f32.xlu0 %v1078_v17 }
  0xda   : > { %1070 = vadd.xlane.f32.xlu0 %v1069_v18 }
 0x135   : > { %v1074_v26 = vpop.xlane.xlu1 %1073 }
 0x136   : > { %v1089_v27 = vmul.f32 %v5439_v25, %v1074_v26 }
 0x138   : > { %v5443_v28 = vsub.f32 %v5410_v12, %v1089_v27 }
 0x13a   : > { %v1097_v29 = vmul.f32 %v5443_v28, %v5443_v28 }
 0x13c   : > { %v1103_v30 = vsel %vm1068_vm2, %v1097_v29, 0.0 }
 0x13d   : > { %v1077_v31 = vpop.xlane.xlu1 %1076  ;;  %1104 = vadd.xlane.f32.xlu0 %v1103_v30  ;;  %v1203_v30 = vld [vmem:[%s5501_s3 + $0x48] sm:$0xff] }
 0x13e   : > { %v1090_v32 = vmul.f32 %v5439_v25, %v1077_v31  ;;  %1426 = vmatpush.msra.mxu0 %v1203_v30  ;;  %v1222_v30 = vld [vmem:[%s5556_s0 + $0x60] sm:$0xff] }
 0x140   : > { %v5450_v33 = vsub.f32 %v5414_v14, %v1090_v32 }
 0x142   : > { %v1098_v34 = vmul.f32 %v5450_v33, %v5450_v33 }
 0x144   : > { %v1106_v35 = vsel %vm1068_vm2, %v1098_v34, 0.0 }
 0x145   : > { %1107 = vadd.xlane.f32.xlu1 %v1106_v35  ;;  %v1080_v36 = vpop.xlane.xlu0 %1079  ;;  %v1202_v35 = vld [vmem:[%s5501_s3 + $0x40] sm:$0xff] }
 0x146   : > { %v1091_v37 = vmul.f32 %v5439_v25, %v1080_v36  ;;  %1427 = vmatpush.msra.mxu0 %v1202_v35 }
 0x148   : > { %v5457_v38 = vsub.f32 %v5418_v16, %v1091_v37 }
 0x14a   : > { %v1099_v39 = vmul.f32 %v5457_v38, %v5457_v38 }
 0x14c   : > { %v1109_v40 = vsel %vm1068_vm2, %v1099_v39, 0.0 }
 0x14d   : > { %1110 = vadd.xlane.f32.xlu2 %v1109_v40  ;;  %v1071_v41 = vpop.xlane.xlu0 %1070 }
 0x14e   : > { %v1088_v42 = vmul.f32 %v5439_v25, %v1071_v41 }
 0x150   : > { %v5464_v43 = vsub.f32 %v5408_v11, %v1088_v42 }
 0x152   : > { %v1096_v44 = vmul.f32 %v5464_v43, %v5464_v43 }
 0x154   : > { %v1100_v45 = vsel %vm1068_vm2, %v1096_v44, 0.0 }
 0x155   : > { %1101 = vadd.xlane.f32.xlu2 %v1100_v45 }
 0x1b0   : > { %v1105_v50 = vpop.xlane.xlu0 %1104 }
 0x1b1   : > { %v1113_v51 = vmul.f32 %v1105_v50, %v5439_v25 }
 0x1b3   : > { %v1117_v52 = vadd.f32 1e-05, %v1113_v51 }
 0x1b5   : > { %4966 = vrsqrt.f32 %v1117_v52  ;;  %vm1136_vm5 = vweird.f32 %v1117_v52 }
 0x1b8   : > { %v1108_v53 = vpop.xlane.xlu1 %1107 }
 0x1b9   : > { %v1114_v54 = vmul.f32 %v1108_v53, %v5439_v25 }
 0x1bb   : > { %v4967_v55 = vpop.eup %4966  ;;  %v5484_v56 = vadd.f32 1e-05, %v1114_v54 }
 0x1bc   : > { %v1131_v57 = vmul.f32 %v4967_v55, %v1117_v52  ;;  %vm1137_vm4 = vweird.f32 %v4967_v55 }
 0x1bd   : > { %4968 = vrsqrt.f32 %v5484_v56  ;;  %vm1138_vm6 = vmor %vm1136_vm5, %vm1137_vm4  ;;  %vm1146_vm8 = vweird.f32 %v5484_v56 }
 0x1be   : > { %v1132_v60 = vmul.f32 %v4967_v55, %v1131_v57 }
 0x1c0   : > { %v1133_v1 = vmul.f32 0.5, %v1132_v60  ;;  %v1111_v2 = vpop.xlane.xlu2 %1110  ;;  %v1201_v60 = vld [vmem:[%s5501_s3 + $0x38] sm:$0xff] }
 0x1c1   : > { %v1115_v3 = vmul.f32 %v1111_v2, %v5439_v25  ;;  %1395 = vmatpush.msrb.mxu3 %v1201_v60  ;;  %v1195_v2 = vld [vmem:[%s5501_s3 + $0x8] sm:$0xff] }
 0x1c2   : > { %v1134_v7 = vsub.f32 1.5, %v1133_v1  ;;  %v1208_v1 = vld [vmem:[%s5501_s3 + $0x70] sm:$0xff] }
 0x1c3   : > { %v4969_v8 = vpop.eup %4968  ;;  %v1119_v9 = vadd.f32 1e-05, %v1115_v3  ;;  %v1199_v3 = vld [vmem:[%s5501_s3 + $0x28] sm:$0xff]  ;;  %1396 = vmatpush.msrb.mxu3 %v1200_v0 }
 0x1c4   : > { %v1135_v17 = vmul.f32 %v4967_v55, %v1134_v7  ;;  %v1141_v18 = vmul.f32 %v4969_v8, %v5484_v56  ;;  %vm1147_vm7 = vweird.f32 %v4969_v8  ;;  %v1198_v7 = vld [vmem:[%s5501_s3 + $0x20] sm:$0xff] }
 0x1c5   : > { %4970 = vrsqrt.f32 %v1119_v9  ;;  %vm1148_vm9 = vmor %vm1146_vm8, %vm1147_vm7  ;;  %vm1156_vm11 = vweird.f32 %v1119_v9  ;;  %1397 = vmatpush.msrb.mxu3 %v1199_v3 }
 0x1c6   : > { %v1139_v20 = vsel %vm1138_vm6, %v4967_v55, %v1135_v17  ;;  %v1142_v21 = vmul.f32 %v4969_v8, %v1141_v18  ;;  %v1213_v17 = vld [vmem:[%s5556_s0 + $0x18] sm:$0xff] }
 0x1c7   : > { %v1161_v26 = vmul.f32 %v1139_v20, %v5443_v28  ;;  %1398 = vmatpush.msrb.mxu3 %v1198_v7  ;;  %v1217_v18 = vld [vmem:[%s5556_s0 + $0x38] sm:$0xff]  ;;  %v1212_v20 = vld [vmem:[%s5556_s0 + $0x10] sm:$0xff] }
 0x1c8   : > { %v1143_v27 = vmul.f32 0.5, %v1142_v21  ;;  %v1102_v29 = vpop.xlane.xlu2 %1101  ;;  %v1216_v21 = vld [vmem:[%s5556_s0 + $0x30] sm:$0xff] }
 0x1c9   : > { %v1168_v31 = vmul.f32 %v5508_v19, %v1161_v26  ;;  %v1112_v32 = vmul.f32 %v1102_v29, %v5439_v25  ;;  %v1223_v26 = vld [vmem:[%s5556_s0 + $0x68] sm:$0xff]  ;;  %v1214_v29 = vld [vmem:[%s5556_s0 + $0x20] sm:$0xff] }
 0x1ca   : > { %v1144_v34 = vsub.f32 1.5, %v1143_v27  ;;  %v1210_v27 = vld [vmem:[%s5556_s0] sm:$0xff] }
 0x1cb   : > { %v4971_v36 = vpop.eup %4970  ;;  %v5522_v37 = vadd.f32 %v5514_v24, %v1168_v31  ;;  %v1116_v39 = vadd.f32 1e-05, %v1112_v32 }
 0x1cc   : > { %v1145_v40 = vmul.f32 %v4969_v8, %v1144_v34  ;;  %v1151_v28 = vmul.f32 %v4971_v36, %v1119_v9  ;;  %vm1157_vm10 = vweird.f32 %v4971_v36  ;;  %v1221_v9 = vld [vmem:[%s5556_s0 + $0x58] sm:$0xff] }
 0x1cd   : > { %4972 = vrsqrt.f32 %v1116_v39  ;;  %4558 = vmatmul.msk.f32.vlgmr.msra.gmra.mxu1 %vm1068_vm2, %v5522_v37  ;;  %vm1158_vm12 = vmor %vm1156_vm11, %vm1157_vm10  ;;  %vm1126_vm14 = vweird.f32 %v1116_v39 }
 0x1ce   : > { %v1149_v41 = vsel %vm1148_vm9, %v4969_v8, %v1145_v40  ;;  %v1152_v42 = vmul.f32 %v4971_v36, %v1151_v28  ;;  %1453 = vmatpush.msra.mxu1 %v1209_v61  ;;  %v1206_v8 = vld [vmem:[%s5501_s3 + $0x60] sm:$0xff] }
 0x1cf   : > { %v1162_v44 = vmul.f32 %v1149_v41, %v5450_v33 }
 0x1d0   : > { %v1153_v45 = vmul.f32 0.5, %v1152_v42  ;;  %1454 = vmatpush.msra.mxu1 %v1208_v1 }
 0x1d1   : > { %v1169_v46 = vmul.f32 %v5508_v19, %v1162_v44 }
 0x1d2   : > { %v1154_v47 = vsub.f32 1.5, %v1153_v45  ;;  %1455 = vmatpush.msra.mxu1 %v1207_v5 }
 0x1d3   : > { %v4973_v48 = vpop.eup %4972  ;;  %v5530_v49 = vadd.f32 %v5514_v24, %v1169_v46 }
 0x1d4   : > { %v1155_v50 = vmul.f32 %v4971_v36, %v1154_v47  ;;  %v1121_v51 = vmul.f32 %v4973_v48, %v1116_v39  ;;  %vm1127_vm13 = vweird.f32 %v4973_v48  ;;  %1456 = vmatpush.msra.mxu1 %v1206_v8 }
 0x1d5   : > { %4559 = vmatmul.msk.f32.gmra.mxu1 %vm1068_vm2, %v5530_v49  ;;  %vm1128_vm15 = vmor %vm1126_vm14, %vm1127_vm13  ;;  %vm2544_vm14 = vcmask 523264  }
 0x1d6   : > { %v1159_v33 = vsel %vm1158_vm12, %v4971_v36, %v1155_v50  ;;  %v1122_v52 = vmul.f32 %v4973_v48, %v1121_v51 }
 0x1d7   : > { %v1163_v53 = vmul.f32 %v1159_v33, %v5457_v38 }
 0x1d8   : > { %v1123_v54 = vmul.f32 0.5, %v1122_v52 }
 0x1d9   : > { %v1170_v55 = vmul.f32 %v5508_v19, %v1163_v53 }
 0x1da   : > { %v1124_v56 = vsub.f32 1.5, %v1123_v54 }
 0x1db   : > { %v5537_v57 = vadd.f32 %v5514_v24, %v1170_v55 }
 0x1dc   : > { %v1125_v58 = vmul.f32 %v4973_v48, %v1124_v56 }
 0x1dd   : > { %4560 = vmatmul.msk.f32.vlgmr.msra.gmra.mxu2 %vm1068_vm2, %v5537_v57 }
 0x1de   : > { %v1129_v38 = vsel %vm1128_vm15, %v4973_v48, %v1125_v58  ;;  %1366 = vmatpush.msra.mxu2 %v1197_v59 }
 0x1df   : > { %v1160_v62 = vmul.f32 %v1129_v38, %v5464_v43 }
 0x1e0   : > { %1367 = vmatpush.msra.mxu2 %v1196_v63 }
 0x1e1   : > { %v1167_v4 = vmul.f32 %v5508_v19, %v1160_v62  ;;  %v1225_v19 = vld [vmem:[%s5556_s0 + $0x78] sm:$0xff] }
 0x1e2   : > { %1368 = vmatpush.msra.mxu2 %v1195_v2 }
 0x1e3   : > { %v5559_v43 = vadd.f32 %v5514_v24, %v1167_v4  ;;  %v1215_v24 = vld [vmem:[%s5556_s0 + $0x28] sm:$0xff] }
 0x1e4   : > { %1369 = vmatpush.msra.mxu2 %v1194_v6 }
 0x1e5   : > { %4557 = vmatmul.msk.f32.vlgmr.msrb.gmra.mxu0 %vm1068_vm2, %v5559_v43  ;;  %4561 = vmatmul.msk.f32.vlgmr.msrb.gmra.mxu2 %vm1068_vm2, %v5559_v43 }
 0x1e6   : > { %4565 = vmatmul.msk.f32.vlgmr.msra.gmra.mxu3 %vm1068_vm2, %v5559_v43  ;;  %4569 = vmatmul.msk.f32.vlgmr.msrb.gmra.mxu1 %vm1068_vm2, %v5559_v43 }
 0x1e7   : > { %1540 = vmatpush.msrb.mxu0 %v1221_v9  ;;  %1482 = vmatpush.msrb.mxu2 %v1213_v17 }
 0x1e8   : > { %1511 = vmatpush.msra.mxu3 %v1217_v18  ;;  %1569 = vmatpush.msrb.mxu1 %v1225_v19  ;;  %v1009_v19 = vld [vmem:[%s6807_s29 + $0x8] sm:$0xff] }
 0x1e9   : > { %1541 = vmatpush.msrb.mxu0 %v1220_v10  ;;  %1483 = vmatpush.msrb.mxu2 %v1212_v20 }
 0x1ea   : > { %1512 = vmatpush.msra.mxu3 %v1216_v21  ;;  %1570 = vmatpush.msrb.mxu1 %v1224_v22 }
 0x1eb   : > { %1542 = vmatpush.msrb.mxu0 %v1219_v13  ;;  %1484 = vmatpush.msrb.mxu2 %v1211_v23  ;;  %v1008_v23 = vld [vmem:[%s6807_s29] sm:$0xff] }
 0x1ec   : > { %1513 = vmatpush.msra.mxu3 %v1215_v24  ;;  %1571 = vmatpush.msrb.mxu1 %v1223_v26 }
 0x1ed   : > { %4562 = vmatmul.msk.f32.gmra.mxu2 %vm1068_vm2, %v5522_v37  ;;  %4581 = vmatmul.msk.f32.vlgmr.msra.gmra.mxu0 %vm1068_vm2, %v5559_v43 }
 0x1ee   : > { %4566 = vmatmul.msk.f32.gmra.mxu3 %vm1068_vm2, %v5522_v37  ;;  %4570 = vmatmul.msk.f32.gmra.mxu1 %vm1068_vm2, %v5522_v37 }
 0x1ef   : > { %1543 = vmatpush.msrb.mxu0 %v1218_v15  ;;  %1485 = vmatpush.msrb.mxu2 %v1210_v27 }
 0x1f0   : > { %1514 = vmatpush.msra.mxu3 %v1214_v29  ;;  %1572 = vmatpush.msrb.mxu1 %v1222_v30 }
 0x1f5   : > { %4563 = vmatmul.msk.f32.gmra.mxu2 %vm1068_vm2, %v5530_v49  ;;  %4582 = vmatmul.msk.f32.gmra.mxu0 %vm1068_vm2, %v5522_v37 }
 0x1f6   : > { %4567 = vmatmul.msk.f32.gmra.mxu3 %vm1068_vm2, %v5530_v49  ;;  %4571 = vmatmul.msk.f32.gmra.mxu1 %vm1068_vm2, %v5530_v49 }
 0x1fd   : > { %4564 = vmatmul.msk.f32.gmra.mxu2 %vm1068_vm2, %v5537_v57  ;;  %4583 = vmatmul.msk.f32.gmra.mxu0 %vm1068_vm2, %v5530_v49 }
 0x1fe   : > { %4568 = vmatmul.msk.f32.gmra.mxu3 %vm1068_vm2, %v5537_v57  ;;  %4572 = vmatmul.msk.f32.gmra.mxu1 %vm1068_vm2, %v5537_v57 }
 0x205   : > { %4573 = vmatmul.msk.f32.vlgmr.msra.gmra.mxu2 %vm1068_vm2, %v5559_v43  ;;  %4584 = vmatmul.msk.f32.gmra.mxu0 %vm1068_vm2, %v5537_v57 }
 0x206   : > { %4577 = vmatmul.msk.f32.vlgmr.msrb.gmra.mxu3 %vm1068_vm2, %v5559_v43  ;;  %4585 = vmatmul.msk.f32.vlgmr.msra.gmra.mxu1 %vm1068_vm2, %v5559_v43 }
 0x20d   : > { %4574 = vmatmul.msk.f32.gmra.mxu2 %vm1068_vm2, %v5522_v37  ;;  %4597 = vmatmul.msk.f32.vlgmr.msrb.gmra.mxu0 %vm1068_vm2, %v5559_v43 }
 0x20e   : > { %4578 = vmatmul.msk.f32.gmra.mxu3 %vm1068_vm2, %v5522_v37  ;;  %4586 = vmatmul.msk.f32.gmra.mxu1 %vm1068_vm2, %v5522_v37 }
 0x215   : > { %4575 = vmatmul.msk.f32.gmra.mxu2 %vm1068_vm2, %v5530_v49  ;;  %4598 = vmatmul.msk.f32.gmra.mxu0 %vm1068_vm2, %v5522_v37 }
 0x216   : > { %4579 = vmatmul.msk.f32.gmra.mxu3 %vm1068_vm2, %v5530_v49  ;;  %4587 = vmatmul.msk.f32.gmra.mxu1 %vm1068_vm2, %v5530_v49 }
 0x21d   : > { %4576 = vmatmul.msk.f32.gmra.mxu2 %vm1068_vm2, %v5537_v57  ;;  %4599 = vmatmul.msk.f32.gmra.mxu0 %vm1068_vm2, %v5530_v49 }
 0x21e   : > { %4580 = vmatmul.msk.f32.gmra.mxu3 %vm1068_vm2, %v5537_v57  ;;  %4588 = vmatmul.msk.f32.gmra.mxu1 %vm1068_vm2, %v5537_v57 }
 0x225   : > { %4589 = vmatmul.msk.f32.vlgmr.msrb.gmra.mxu2 %vm1068_vm2, %v5559_v43  ;;  %4600 = vmatmul.msk.f32.gmra.mxu0 %vm1068_vm2, %v5537_v57 }
 0x226   : > { %4593 = vmatmul.msk.f32.vlgmr.msra.gmra.mxu3 %vm1068_vm2, %v5559_v43  ;;  %4601 = vmatmul.msk.f32.vlgmr.msrb.gmra.mxu1 %vm1068_vm2, %v5559_v43 }
 0x22d   : > { %4590 = vmatmul.msk.f32.gmra.mxu2 %vm1068_vm2, %v5522_v37 }
 0x22e   : > { %4594 = vmatmul.msk.f32.gmra.mxu3 %vm1068_vm2, %v5522_v37  ;;  %4602 = vmatmul.msk.f32.gmra.mxu1 %vm1068_vm2, %v5522_v37 }
 0x235   : > { %4591 = vmatmul.msk.f32.gmra.mxu2 %vm1068_vm2, %v5530_v49 }
 0x236   : > { %4595 = vmatmul.msk.f32.gmra.mxu3 %vm1068_vm2, %v5530_v49  ;;  %4603 = vmatmul.msk.f32.gmra.mxu1 %vm1068_vm2, %v5530_v49 }
 0x23d   : > { %4592 = vmatmul.msk.f32.gmra.mxu2 %vm1068_vm2, %v5537_v57 }
 0x23e   : > { %4596 = vmatmul.msk.f32.gmra.mxu3 %vm1068_vm2, %v5537_v57  ;;  %4604 = vmatmul.msk.f32.gmra.mxu1 %vm1068_vm2, %v5537_v57 }
 0x24a   : > { %v5670_v31 = vpop.f32.mrf.mxu1 }
 0x252   : > { %v5672_v32 = vpop.f32.mrf.mxu1 }
 0x260   : > { %v5674_v34 = vpop.f32.mrf.mxu2 }
 0x262   : > { %v5676_v35 = vpop.f32.mrf.mxu0 }
 0x263   : > { %v1342_v36 = vpop.f32.mrf.mxu1 }
 0x268   : > { %v5678_v37 = vpop.f32.mrf.mxu2 }
 0x269   : > { %v1313_v39 = vpop.f32.mrf.mxu3 }
 0x26a   : > { %v1429_v40 = vpop.f32.mrf.mxu0 }
 0x26b   : > { %v5680_v28 = vpop.f32.mrf.mxu1 }
 0x270   : > { %v5682_v41 = vpop.f32.mrf.mxu2 }
 0x271   : > { %v1316_v42 = vpop.f32.mrf.mxu3 }
 0x272   : > { %v1432_v44 = vpop.f32.mrf.mxu0 }
 0x273   : > { %v5684_v45 = vpop.f32.mrf.mxu1 }
 0x278   : > { %v5686_v46 = vpop.f32.mrf.mxu2 }
 0x279   : > { %v1319_v47 = vpop.f32.mrf.mxu3 }
 0x27a   : > { %v1435_v48 = vpop.f32.mrf.mxu0 }
 0x27b   : > { %v5688_v49 = vpop.f32.mrf.mxu1 }
 0x280   : > { %v5690_v50 = vpop.f32.mrf.mxu2 }
 0x281   : > { %v1322_v51 = vpop.f32.mrf.mxu3 }
 0x282   : > { %v1438_v33 = vpop.f32.mrf.mxu0 }
 0x283   : > { %v1458_v52 = vpop.f32.mrf.mxu1  ;;  %4621 = vmatpush.xpose.msk.msra.mxu0 %vm1586_vm0, %v1438_v33 }
 0x287   : > { %4622 = vmatpush.xpose.msk.msra.mxu0 %vm1586_vm0, %v1435_v48 }
 0x288   : > { %v1371_v53 = vpop.f32.mrf.mxu2 }
 0x289   : > { %v1400_v54 = vpop.f32.mrf.mxu3 }
 0x28a   : > { %v1545_v55 = vpop.f32.mrf.mxu0 }
 0x28b   : > { %v1461_v56 = vpop.f32.mrf.mxu1  ;;  %4623 = vmatpush.xpose.msk.msra.mxu0 %vm1586_vm0, %v1432_v44 }
 0x28f   : > { %4624 = vmatpush.xpose.msk.msra.mxu0 %vm1586_vm0, %v1429_v40 }
 0x290   : > { %v1374_v57 = vpop.f32.mrf.mxu2 }
 0x291   : > { %v1403_v58 = vpop.f32.mrf.mxu3 }
 0x292   : > { %v1548_v38 = vpop.f32.mrf.mxu0  ;;  %4625 = vmatmul.msk.f32.vlgmr.msra.gmra.mxu0 %vm1586_vm0, %v1313_v39 }
 0x293   : > { %v1464_v59 = vpop.f32.mrf.mxu1 }
 0x298   : > { %v1377_v60 = vpop.f32.mrf.mxu2 }
 0x299   : > { %v1406_v61 = vpop.f32.mrf.mxu3 }
 0x29a   : > { %v1551_v62 = vpop.f32.mrf.mxu0  ;;  %4626 = vmatmul.msk.f32.gmra.mxu0 %vm1586_vm0, %v1316_v42  ;;  %v1010_v42 = vld [vmem:[%s6807_s29 + $0x10] sm:$0xff] }
 0x29b   : > { %v1467_v63 = vpop.f32.mrf.mxu1 }
 0x29c   : > { %4629 = vmatpush.xpose.msk.msra.mxu1 %vm1586_vm0, %v1467_v63 }
 0x2a0   : > { %4630 = vmatpush.xpose.msk.msra.mxu1 %vm1586_vm0, %v1464_v59  ;;  %v1380_v0 = vpop.f32.mrf.mxu2 }
 0x2a1   : > { %v1409_v1 = vpop.f32.mrf.mxu3  ;;  %4605 = vmatpush.xpose.msk.msra.mxu2 %vm1586_vm0, %v1380_v0 }
 0x2a2   : > { %4613 = vmatpush.xpose.msk.msrb.mxu3 %vm1586_vm0, %v1409_v1  ;;  %v1554_v2 = vpop.f32.mrf.mxu0  ;;  %4627 = vmatmul.msk.f32.gmra.mxu0 %vm1586_vm0, %v1319_v47 }
 0x2a3   : > { %v1574_v3 = vpop.f32.mrf.mxu1  ;;  %2081 = vmatpush.msrb.mxu0 %v1554_v2 }
 0x2a4   : > { %4631 = vmatpush.xpose.msk.msra.mxu1 %vm1586_vm0, %v1461_v56 }
 0x2a5   : > { %4606 = vmatpush.xpose.msk.msra.mxu2 %vm1586_vm0, %v1377_v60  ;;  %2082 = vmatpush.msrb.mxu0 %v1551_v62 }
 0x2a6   : > { %4614 = vmatpush.xpose.msk.msrb.mxu3 %vm1586_vm0, %v1406_v61 }
 0x2a7   : > { %2083 = vmatpush.msrb.mxu0 %v1548_v38 }
 0x2a8   : > { %4632 = vmatpush.xpose.msk.msra.mxu1 %vm1586_vm0, %v1458_v52  ;;  %v1487_v4 = vpop.f32.mrf.mxu2 }
 0x2a9   : > { %v1516_v5 = vpop.f32.mrf.mxu3  ;;  %4607 = vmatpush.xpose.msk.msra.mxu2 %vm1586_vm0, %v1374_v57  ;;  %2084 = vmatpush.msrb.mxu0 %v1545_v55 }
 0x2aa   : > { %4615 = vmatpush.xpose.msk.msrb.mxu3 %vm1586_vm0, %v1403_v58  ;;  %4628 = vmatmul.msk.f32.gmra.mxu0 %vm1586_vm0, %v1322_v51 }
 0x2ab   : > { %v1577_v43 = vpop.f32.mrf.mxu1  ;;  %4633 = vmatmul.msk.f32.vlgmr.msra.gmra.mxu1 %vm1586_vm0, %v1342_v36 }
 0x2ad   : > { %4608 = vmatpush.xpose.msk.msra.mxu2 %vm1586_vm0, %v1371_v53 }
 0x2ae   : > { %4616 = vmatpush.xpose.msk.msrb.mxu3 %vm1586_vm0, %v1400_v54  ;;  %v1011_v54 = vld [vmem:[%s6807_s29 + $0x18] sm:$0xff] }
 0x2b0   : > { %v1490_v6 = vpop.f32.mrf.mxu2  ;;  %4609 = vmatmul.msk.f32.vlgmr.msra.gmra.mxu2 %vm1586_vm0, %v5676_v35 }
 0x2b1   : > { %v1519_v7 = vpop.f32.mrf.mxu3  ;;  %4617 = vmatmul.msk.f32.vlgmr.msrb.gmra.mxu3 %vm1586_vm0, %v5678_v37 }
 0x2b3   : > { %v1580_v8 = vpop.f32.mrf.mxu1  ;;  %4634 = vmatmul.msk.f32.gmra.mxu1 %vm1586_vm0, %v5680_v28 }
 0x2b8   : > { %v1493_v9 = vpop.f32.mrf.mxu2  ;;  %4610 = vmatmul.msk.f32.gmra.mxu2 %vm1586_vm0, %v5670_v31 }
 0x2b9   : > { %v1522_v10 = vpop.f32.mrf.mxu3  ;;  %4618 = vmatmul.msk.f32.gmra.mxu3 %vm1586_vm0, %v5682_v41 }
 0x2bb   : > { %v1583_v13 = vpop.f32.mrf.mxu1  ;;  %4635 = vmatmul.msk.f32.gmra.mxu1 %vm1586_vm0, %v5684_v45 }
 0x2bc   : > { %2122 = vmatpush.msrb.mxu1 %v1583_v13 }
 0x2be   : > { %2123 = vmatpush.msrb.mxu1 %v1580_v8 }
 0x2c0   : > { %2124 = vmatpush.msrb.mxu1 %v1577_v43  ;;  %v1496_v15 = vpop.f32.mrf.mxu2  ;;  %4611 = vmatmul.msk.f32.gmra.mxu2 %vm1586_vm0, %v5672_v32 }
 0x2c1   : > { %v1525_v17 = vpop.f32.mrf.mxu3  ;;  %4619 = vmatmul.msk.f32.gmra.mxu3 %vm1586_vm0, %v5686_v46  ;;  %1999 = vmatpush.msrb.mxu2 %v1496_v15 }
 0x2c2   : > { %2040 = vmatpush.msra.mxu3 %v1525_v17  ;;  %2125 = vmatpush.msrb.mxu1 %v1574_v3 }
 0x2c3   : > { %4636 = vmatmul.msk.f32.gmra.mxu1 %vm1586_vm0, %v5688_v49  ;;  %2000 = vmatpush.msrb.mxu2 %v1493_v9 }
 0x2c4   : > { %2041 = vmatpush.msra.mxu3 %v1522_v10 }
 0x2c5   : > { %2001 = vmatpush.msrb.mxu2 %v1490_v6 }
 0x2c6   : > { %2042 = vmatpush.msra.mxu3 %v1519_v7 }
 0x2c7   : > { %2002 = vmatpush.msrb.mxu2 %v1487_v4 }
 0x2c8   : > { %2043 = vmatpush.msra.mxu3 %v1516_v5  ;;  %4612 = vmatmul.msk.f32.gmra.mxu2 %vm1586_vm0, %v5674_v34 }
 0x2c9   : > { %4620 = vmatmul.msk.f32.gmra.mxu3 %vm1586_vm0, %v5690_v50 }
 0x30f   : > { %v1734_v18 = vpop.f32.mrf.mxu0 }
 0x310   : > { %v5753_v34 = vadd.f32 %v1734_v18, %v1008_v23 }
 0x312   : > { %v1823_v28 = vsel %vm1068_vm2, %v5753_v34, -inf }
 0x317   : > { %v1737_v20 = vpop.f32.mrf.mxu0 }
 0x318   : > { %v5738_v21 = vadd.f32 %v1737_v20, %v1009_v19 }
 0x31a   : > { %v1826_v22 = vsel %vm1068_vm2, %v5738_v21, -inf }
 0x31b   : > { %1827 = vmax.xlane.f32.xlu1 %v1826_v22 }
 0x31f   : > { %v1740_v49 = vpop.f32.mrf.mxu0 }
 0x320   : > { %v5797_v0 = vadd.f32 %v1740_v49, %v1010_v42 }
 0x322   : > { %v1829_v3 = vsel %vm1068_vm2, %v5797_v0, -inf }
 0x327   : > { %v1743_v61 = vpop.f32.mrf.mxu0 }
 0x328   : > { %v1787_v32 = vpop.f32.mrf.mxu1  ;;  %v5795_v63 = vadd.f32 %v1743_v61, %v1011_v54 }
 0x329   : > { %v5768_v44 = vadd.f32 %v1787_v32, %v1008_v23 }
 0x32a   : > { %v1832_v2 = vsel %vm1068_vm2, %v5795_v63, -inf }
 0x32b   : > { %v1835_v52 = vsel %vm1068_vm2, %v5768_v44, -inf }
 0x330   : > { %v1790_v46 = vpop.f32.mrf.mxu1 }
 0x331   : > { %v5780_v53 = vadd.f32 %v1790_v46, %v1009_v19 }
 0x333   : > { %v1628_v24 = vpop.f32.mrf.mxu2  ;;  %v1838_v60 = vsel %vm1068_vm2, %v5780_v53, -inf }
 0x334   : > { %v5745_v26 = vadd.f32 %v1628_v24, %v1008_v23  ;;  %v1681_v27 = vpop.f32.mrf.mxu3 }
 0x335   : > { %v5747_v29 = vadd.f32 %v1681_v27, %v1008_v23 }
 0x336   : > { %v1799_v30 = vsel %vm1068_vm2, %v5745_v26, -inf }
 0x337   : > { %v1811_v31 = vsel %vm1068_vm2, %v5747_v29, -inf  ;;  %1800 = vmax.xlane.f32.xlu2 %v1799_v30 }
 0x338   : > { %1812 = vmax.xlane.f32.xlu0 %v1811_v31  ;;  %v1793_v38 = vpop.f32.mrf.mxu1 }
 0x339   : > { %v5799_v1 = vadd.f32 %v1793_v38, %v1010_v42 }
 0x33b   : > { %v1631_v35 = vpop.f32.mrf.mxu2  ;;  %v1841_v4 = vsel %vm1068_vm2, %v5799_v1, -inf }
 0x33c   : > { %v5755_v36 = vadd.f32 %v1631_v35, %v1009_v19  ;;  %v1684_v37 = vpop.f32.mrf.mxu3 }
 0x33d   : > { %v5757_v39 = vadd.f32 %v1684_v37, %v1009_v19 }
 0x33e   : > { %v1802_v40 = vsel %vm1068_vm2, %v5755_v36, -inf }
 0x33f   : > { %v1814_v41 = vsel %vm1068_vm2, %v5757_v39, -inf  ;;  %1803 = vmax.xlane.f32.xlu1 %v1802_v40 }
 0x340   : > { %1824 = vmax.xlane.f32.xlu0 %v1823_v28  ;;  %1815 = vmax.xlane.f32.xlu2 %v1814_v41  ;;  %v1796_v5 = vpop.f32.mrf.mxu1 }
 0x341   : > { %v5807_v43 = vadd.f32 %v1796_v5, %v1011_v54 }
 0x343   : > { %v1634_v45 = vpop.f32.mrf.mxu2  ;;  %v1844_v6 = vsel %vm1068_vm2, %v5807_v43, -inf }
 0x344   : > { %v5770_v47 = vadd.f32 %v1634_v45, %v1010_v42  ;;  %v1687_v48 = vpop.f32.mrf.mxu3 }
 0x345   : > { %v5772_v50 = vadd.f32 %v1687_v48, %v1010_v42 }
 0x346   : > { %v1805_v51 = vsel %vm1068_vm2, %v5770_v47, -inf }
 0x347   : > { %v1817_v33 = vsel %vm1068_vm2, %v5772_v50, -inf  ;;  %1806 = vmax.xlane.f32.xlu1 %v1805_v51 }
 0x348   : > { %1818 = vmax.xlane.f32.xlu2 %v1817_v33  ;;  %1836 = vmax.xlane.f32.xlu0 %v1835_v52 }
 0x34b   : > { %v1637_v55 = vpop.f32.mrf.mxu2 }
 0x34c   : > { %v5785_v56 = vadd.f32 %v1637_v55, %v1011_v54  ;;  %v1690_v57 = vpop.f32.mrf.mxu3 }
 0x34d   : > { %v5787_v58 = vadd.f32 %v1690_v57, %v1011_v54 }
 0x34e   : > { %v1808_v59 = vsel %vm1068_vm2, %v5785_v56, -inf }
 0x34f   : > { %1839 = vmax.xlane.f32.xlu1 %v1838_v60  ;;  %v1820_v62 = vsel %vm1068_vm2, %v5787_v58, -inf }
 0x350   : > { %1809 = vmax.xlane.f32.xlu2 %v1808_v59  ;;  %1821 = vmax.xlane.f32.xlu0 %v1820_v62 }
 0x357   : > { %1833 = vmax.xlane.f32.xlu1 %v1832_v2 }
 0x358   : > { %1830 = vmax.xlane.f32.xlu2 %v1829_v3  ;;  %1842 = vmax.xlane.f32.xlu0 %v1841_v4 }
 0x360   : > { %1845 = vmax.xlane.f32.xlu2 %v1844_v6 }
 0x38e   : > { %v1828_v7 = vpop.xlane.xlu1 %1827 }
 0x38f   : > { %v1856_v8 = vsub.f32 %v5738_v21, %v1828_v7 }
 0x391   : > { %v1881_v9 = vmul.f32 1.442695, %v1856_v8 }
 0x393   : > { %4974 = vpow2.f32 %v1881_v9 }
 0x399   : > { %v5812_v10 = vpop.eup %4974 }
 0x39a   : > { %v1922_v13 = vsel %vm1068_vm2, %v5812_v10, 0.0 }
 0x39b   : > { %1923 = vadd.xlane.f32.xlu2 %v1922_v13 }
 0x3aa   : > { %v1801_v15 = vpop.xlane.xlu2 %1800 }
 0x3ab   : > { %v1813_v17 = vpop.xlane.xlu0 %1812  ;;  %v1847_v18 = vsub.f32 %v5745_v26, %v1801_v15 }
 0x3ac   : > { %v1851_v19 = vsub.f32 %v5747_v29, %v1813_v17 }
 0x3ad   : > { %v1863_v20 = vmul.f32 1.442695, %v1847_v18 }
 0x3ae   : > { %v1871_v22 = vmul.f32 1.442695, %v1851_v19 }
 0x3af   : > { %4976 = vpow2.f32 %v1863_v20 }
 0x3b0   : > { %4978 = vpow2.f32 %v1871_v22 }
 0x3b2   : > { %v1804_v23 = vpop.xlane.xlu1 %1803 }
 0x3b3   : > { %v1825_v21 = vpop.xlane.xlu0 %1824  ;;  %v1816_v24 = vpop.xlane.xlu2 %1815  ;;  %v1848_v27 = vsub.f32 %v5755_v36, %v1804_v23 }
 0x3b4   : > { %v1855_v30 = vsub.f32 %v5753_v34, %v1825_v21  ;;  %v1852_v31 = vsub.f32 %v5757_v39, %v1816_v24 }
 0x3b5   : > { %v5821_v32 = vpop.eup %4976  ;;  %v1865_v35 = vmul.f32 1.442695, %v1848_v27 }
 0x3b6   : > { %v5823_v37 = vpop.eup %4978  ;;  %v1879_v26 = vmul.f32 1.442695, %v1855_v30  ;;  %v1873_v29 = vmul.f32 1.442695, %v1852_v31  ;;  %v1895_v40 = vsel %vm1068_vm2, %v5821_v32, 0.0 }
 0x3b7   : > { %4980 = vpow2.f32 %v1865_v35  ;;  %v1907_v28 = vsel %vm1068_vm2, %v5823_v37, 0.0  ;;  %1896 = vadd.xlane.f32.xlu0 %v1895_v40 }
 0x3b8   : > { %4982 = vpow2.f32 %v1879_v26  ;;  %1908 = vadd.xlane.f32.xlu1 %v1907_v28 }
 0x3b9   : > { %4984 = vpow2.f32 %v1873_v29 }
 0x3ba   : > { %v1807_v34 = vpop.xlane.xlu1 %1806 }
 0x3bb   : > { %v1819_v36 = vpop.xlane.xlu2 %1818  ;;  %v1849_v39 = vsub.f32 %v5770_v47, %v1807_v34  ;;  %v1837_v41 = vpop.xlane.xlu0 %1836 }
 0x3bc   : > { %v1853_v42 = vsub.f32 %v5772_v50, %v1819_v36  ;;  %v1859_v45 = vsub.f32 %v5768_v44, %v1837_v41 }
 0x3bd   : > { %v5832_v46 = vpop.eup %4980  ;;  %v1867_v48 = vmul.f32 1.442695, %v1849_v39 }
 0x3be   : > { %v5834_v49 = vpop.eup %4982  ;;  %v1875_v51 = vmul.f32 1.442695, %v1853_v42  ;;  %v1887_v33 = vmul.f32 1.442695, %v1859_v45  ;;  %v1898_v52 = vsel %vm1068_vm2, %v5832_v46, 0.0 }
 0x3bf   : > { %v5838_v54 = vpop.eup %4984  ;;  %4986 = vpow2.f32 %v1867_v48  ;;  %1899 = vadd.xlane.f32.xlu2 %v1898_v52  ;;  %v1919_v47 = vsel %vm1068_vm2, %v5834_v49, 0.0 }
 0x3c0   : > { %4988 = vpow2.f32 %v1875_v51  ;;  %1920 = vadd.xlane.f32.xlu1 %v1919_v47  ;;  %v1910_v44 = vsel %vm1068_vm2, %v5838_v54, 0.0 }
 0x3c1   : > { %4990 = vpow2.f32 %v1887_v33  ;;  %1911 = vadd.xlane.f32.xlu0 %v1910_v44 }
 0x3c2   : > { %v1840_v50 = vpop.xlane.xlu1 %1839 }
 0x3c3   : > { %v1810_v55 = vpop.xlane.xlu2 %1809  ;;  %v1860_v57 = vsub.f32 %v5780_v53, %v1840_v50  ;;  %v1822_v38 = vpop.xlane.xlu0 %1821 }
 0x3c4   : > { %v1850_v59 = vsub.f32 %v5785_v56, %v1810_v55  ;;  %v1854_v60 = vsub.f32 %v5787_v58, %v1822_v38 }
 0x3c5   : > { %v5847_v61 = vpop.eup %4986  ;;  %v1889_v62 = vmul.f32 1.442695, %v1860_v57 }
 0x3c6   : > { %v5849_v2 = vpop.eup %4988  ;;  %v1869_v3 = vmul.f32 1.442695, %v1850_v59  ;;  %v1877_v4 = vmul.f32 1.442695, %v1854_v60  ;;  %v1901_v5 = vsel %vm1068_vm2, %v5847_v61, 0.0 }
 0x3c7   : > { %v5853_v6 = vpop.eup %4990  ;;  %4992 = vpow2.f32 %v1889_v62  ;;  %1902 = vadd.xlane.f32.xlu2 %v1901_v5  ;;  %v1913_v53 = vsel %vm1068_vm2, %v5849_v2, 0.0 }
 0x3c8   : > { %4994 = vpow2.f32 %v1869_v3  ;;  %v1931_v56 = vsel %vm1068_vm2, %v5853_v6, 0.0 }
 0x3c9   : > { %4996 = vpow2.f32 %v1877_v4  ;;  %1914 = vadd.xlane.f32.xlu0 %v1913_v53  ;;  %1932 = vadd.xlane.f32.xlu1 %v1931_v56 }
 0x3ca   : > { %v1834_v58 = vpop.xlane.xlu1 %1833 }
 0x3cb   : > { %v1831_v7 = vpop.xlane.xlu2 %1830  ;;  %v1858_v8 = vsub.f32 %v5795_v63, %v1834_v58  ;;  %v1843_v9 = vpop.xlane.xlu0 %1842 }
 0x3cc   : > { %v1857_v13 = vsub.f32 %v5797_v0, %v1831_v7  ;;  %v1861_v15 = vsub.f32 %v5799_v1, %v1843_v9 }
 0x3cd   : > { %v5862_v17 = vpop.eup %4992  ;;  %v1885_v18 = vmul.f32 1.442695, %v1858_v8 }
 0x3ce   : > { %v5864_v19 = vpop.eup %4994  ;;  %v1883_v20 = vmul.f32 1.442695, %v1857_v13  ;;  %v1891_v22 = vmul.f32 1.442695, %v1861_v15  ;;  %v1934_v23 = vsel %vm1068_vm2, %v5862_v17, 0.0 }
 0x3cf   : > { %v5868_v21 = vpop.eup %4996  ;;  %4998 = vpow2.f32 %v1885_v18  ;;  %1935 = vadd.xlane.f32.xlu2 %v1934_v23  ;;  %v1904_v63 = vsel %vm1068_vm2, %v5864_v19, 0.0 }
 0x3d0   : > { %5000 = vpow2.f32 %v1883_v20  ;;  %v1916_v0 = vsel %vm1068_vm2, %v5868_v21, 0.0 }
 0x3d1   : > { %5002 = vpow2.f32 %v1891_v22  ;;  %1905 = vadd.xlane.f32.xlu0 %v1904_v63  ;;  %1917 = vadd.xlane.f32.xlu1 %v1916_v0 }
 0x3d3   : > { %v1846_v1 = vpop.xlane.xlu2 %1845 }
 0x3d4   : > { %v1862_v24 = vsub.f32 %v5807_v43, %v1846_v1 }
 0x3d5   : > { %v5875_v27 = vpop.eup %4998 }
 0x3d6   : > { %v5877_v30 = vpop.eup %5000  ;;  %v1893_v31 = vmul.f32 1.442695, %v1862_v24  ;;  %v1928_v35 = vsel %vm1068_vm2, %v5875_v27, 0.0 }
 0x3d7   : > { %v5881_v26 = vpop.eup %5002  ;;  %1929 = vadd.xlane.f32.xlu2 %v1928_v35  ;;  %v1925_v29 = vsel %vm1068_vm2, %v5877_v30, 0.0  ;;  %v2142_v35 = vld [vmem:[%s5905_s4 + $0x18] sm:$0xff] }
 0x3d8   : > { %5004 = vpow2.f32 %v1893_v31  ;;  %v1937_v40 = vsel %vm1068_vm2, %v5881_v26, 0.0  ;;  %v2141_v31 = vld [vmem:[%s5905_s4 + $0x10] sm:$0xff]  ;;  %2293 = vmatpush.msra.mxu1 %v2142_v35 }
 0x3d9   : > { %1926 = vadd.xlane.f32.xlu0 %v1925_v29  ;;  %1938 = vadd.xlane.f32.xlu1 %v1937_v40 }
 0x3da   : > { %2252 = vmatpush.msra.mxu0 %v2141_v31 }
 0x3de   : > { %v5887_v43 = vpop.eup %5004 }
 0x3df   : > { %v1940_v28 = vsel %vm1068_vm2, %v5887_v43, 0.0 }
 0x3e1   : > { %1941 = vadd.xlane.f32.xlu0 %v1940_v28 }
 0x40e   : > { %v1924_v34 = vpop.xlane.xlu2 %1923 }
 0x42a   : > { %v1897_v36 = vpop.xlane.xlu0 %1896 }
 0x42b   : > { %v1909_v39 = vpop.xlane.xlu1 %1908  ;;  %5006 = vrcp.f32 %v1897_v36 }
 0x42c   : > { %5008 = vrcp.f32 %v1909_v39 }
 0x431   : > { %v5007_v41 = vpop.eup %5006 }
 0x432   : > { %v5009_v42 = vpop.eup %5008  ;;  %v1959_v45 = vmul.f32 %v5007_v41, %v5821_v32  ;;  %v1900_v48 = vpop.xlane.xlu2 %1899 }
 0x433   : > { %v1963_v51 = vmul.f32 %v5009_v42, %v5823_v37  ;;  %5010 = vrcp.f32 %v1900_v48  ;;  %v1921_v33 = vpop.xlane.xlu1 %1920 }
 0x434   : > { %5012 = vrcp.f32 %v1921_v33  ;;  %v1912_v52 = vpop.xlane.xlu0 %1911  ;;  %4637 = vmatmul.msk.f32.vlgmr.msrb.gmra.mxu2 %vm1068_vm2, %v1959_v45 }
 0x435   : > { %5014 = vrcp.f32 %v1912_v52  ;;  %4641 = vmatmul.msk.f32.vlgmr.msra.gmra.mxu3 %vm1068_vm2, %v1963_v51 }
 0x436   : > { %5016 = vrcp.f32 %v1924_v34 }
 0x439   : > { %v5011_v47 = vpop.eup %5010 }
 0x43a   : > { %v5013_v44 = vpop.eup %5012  ;;  %v1903_v50 = vpop.xlane.xlu2 %1902  ;;  %v1960_v32 = vmul.f32 %v5011_v47, %v5832_v46  ;;  %v2139_v46 = vld [vmem:[%s5905_s4] sm:$0xff] }
 0x43b   : > { %v5015_v55 = vpop.eup %5014  ;;  %v1967_v37 = vmul.f32 %v5013_v44, %v5834_v49  ;;  %5018 = vrcp.f32 %v1903_v50  ;;  %v2140_v49 = vld [vmem:[%s5905_s4 + $0x8] sm:$0xff]  ;;  %2170 = vmatpush.msra.mxu2 %v2139_v46 }
 0x43c   : > { %v1933_v57 = vpop.xlane.xlu1 %1932  ;;  %v1915_v38 = vpop.xlane.xlu0 %1914  ;;  %4638 = vmatmul.msk.f32.gmra.mxu2 %vm1068_vm2, %v1960_v32  ;;  %v1964_v59 = vmul.f32 %v5015_v55, %v5838_v54  ;;  %2211 = vmatpush.msrb.mxu3 %v2140_v49 }
 0x43d   : > { %5020 = vrcp.f32 %v1933_v57  ;;  %4645 = vmatmul.msk.f32.vlgmr.msrb.gmra.mxu0 %vm1068_vm2, %v1967_v37  ;;  %v5017_v60 = vpop.eup %5016 }
 0x43e   : > { %5022 = vrcp.f32 %v1915_v38  ;;  %4642 = vmatmul.msk.f32.gmra.mxu3 %vm1068_vm2, %v1964_v59  ;;  %v1968_v5 = vmul.f32 %v5017_v60, %v5812_v10  ;;  %v4949_v60 = vld [vmem:[%s5946_s6] ss:$0 sm:$0xff] }
 0x441   : > { %v5019_v54 = vpop.eup %5018 }
 0x442   : > { %v1936_v62 = vpop.xlane.xlu2 %1935  ;;  %v1961_v3 = vmul.f32 %v5019_v54, %v5847_v61 }
 0x443   : > { %v5021_v4 = vpop.eup %5020  ;;  %5024 = vrcp.f32 %v1936_v62 }
 0x444   : > { %v5023_v53 = vpop.eup %5022  ;;  %v1971_v56 = vmul.f32 %v5021_v4, %v5853_v6  ;;  %v1918_v58 = vpop.xlane.xlu1 %1917  ;;  %4639 = vmatmul.msk.f32.gmra.mxu2 %vm1068_vm2, %v1961_v3 }
 0x445   : > { %v1906_v7 = vpop.xlane.xlu0 %1905  ;;  %5026 = vrcp.f32 %v1918_v58  ;;  %v1965_v8 = vmul.f32 %v5023_v53, %v5849_v2  ;;  %4646 = vmatmul.msk.f32.gmra.mxu0 %vm1068_vm2, %v1968_v5 }
 0x446   : > { %5028 = vrcp.f32 %v1906_v7  ;;  %4649 = vmatmul.msk.f32.vlgmr.msrb.gmra.mxu1 %vm1068_vm2, %v1971_v56 }
 0x447   : > { %4643 = vmatmul.msk.f32.gmra.mxu3 %vm1068_vm2, %v1965_v8 }
 0x449   : > { %v5025_v61 = vpop.eup %5024 }
 0x44a   : > { %v1972_v10 = vmul.f32 %v5025_v61, %v5862_v17  ;;  %v1930_v2 = vpop.xlane.xlu2 %1929 }
 0x44b   : > { %v5027_v9 = vpop.eup %5026 }
 0x44c   : > { %v5029_v13 = vpop.eup %5028  ;;  %v1939_v6 = vpop.xlane.xlu1 %1938  ;;  %v1966_v18 = vmul.f32 %v5027_v9, %v5868_v21 }
 0x44d   : > { %v1927_v15 = vpop.xlane.xlu0 %1926  ;;  %5030 = vrcp.f32 %v1939_v6  ;;  %v1962_v20 = vmul.f32 %v5029_v13, %v5864_v19 }
 0x44e   : > { %5032 = vrcp.f32 %v1927_v15  ;;  %4650 = vmatmul.msk.f32.gmra.mxu1 %vm1068_vm2, %v1972_v10 }
 0x44f   : > { %4640 = vmatmul.msk.f32.gmra.mxu2 %vm1068_vm2, %v1962_v20  ;;  %4644 = vmatmul.msk.f32.gmra.mxu3 %vm1068_vm2, %v1966_v18  ;;  %5034 = vrcp.f32 %v1930_v2 }
 0x453   : > { %v5031_v22 = vpop.eup %5030 }
 0x454   : > { %v5033_v17 = vpop.eup %5032  ;;  %v1973_v63 = vmul.f32 %v5031_v22, %v5881_v26 }
 0x455   : > { %v1942_v23 = vpop.xlane.xlu0 %1941  ;;  %v1969_v21 = vmul.f32 %v5033_v17, %v5877_v30  ;;  %v5035_v19 = vpop.eup %5034 }
 0x456   : > { %5036 = vrcp.f32 %v1942_v23  ;;  %4651 = vmatmul.msk.f32.gmra.mxu1 %vm1068_vm2, %v1973_v63  ;;  %v1970_v24 = vmul.f32 %v5035_v19, %v5875_v27 }
 0x457   : > { %4647 = vmatmul.msk.f32.gmra.mxu0 %vm1068_vm2, %v1969_v21 }
 0x45c   : > { %v5037_v0 = vpop.eup %5036 }
 0x45d   : > { %v1974_v1 = vmul.f32 %v5037_v0, %v5887_v43 }
 0x45f   : > { %4652 = vmatmul.msk.f32.gmra.mxu1 %vm1068_vm2, %v1974_v1  ;;  %4648 = vmatmul.msk.f32.gmra.mxu0 %vm1068_vm2, %v1970_v24 }
 0x4b7   : > { %v2004_v30 = vpop.f32.mrf.mxu2 }
 0x4b8   : > { %v2045_v26 = vpop.f32.mrf.mxu3  ;;  %4653 = vmatmul.msk.f32.vlgmr.msra.gmra.mxu2 %vm1586_vm0, %v2004_v30 }
 0x4b9   : > { %4657 = vmatmul.msk.f32.vlgmr.msrb.gmra.mxu3 %vm1586_vm0, %v2045_v26 }
 0x4ba   : > { %v2086_v29 = vpop.f32.mrf.mxu0 }
 0x4bb   : > { %4661 = vmatmul.msk.f32.vlgmr.msra.gmra.mxu0 %vm1586_vm0, %v2086_v29 }
 0x4bf   : > { %v2007_v40 = vpop.f32.mrf.mxu2 }
 0x4c0   : > { %4654 = vmatmul.msk.f32.gmra.mxu2 %vm1586_vm0, %v2007_v40 }
 0x4c1   : > { %v2048_v27 = vpop.f32.mrf.mxu3 }
 0x4c2   : > { %4658 = vmatmul.msk.f32.gmra.mxu3 %vm1586_vm0, %v2048_v27  ;;  %v2089_v43 = vpop.f32.mrf.mxu0 }
 0x4c3   : > { %v2127_v28 = vpop.f32.mrf.mxu1  ;;  %4662 = vmatmul.msk.f32.gmra.mxu0 %vm1586_vm0, %v2089_v43 }
 0x4c4   : > { %4665 = vmatmul.msk.f32.vlgmr.msra.gmra.mxu1 %vm1586_vm0, %v2127_v28 }
 0x4c7   : > { %v2010_v34 = vpop.f32.mrf.mxu2 }
 0x4c8   : > { %4655 = vmatmul.msk.f32.gmra.mxu2 %vm1586_vm0, %v2010_v34 }
 0x4ca   : > { %v2051_v36 = vpop.f32.mrf.mxu3 }
 0x4cb   : > { %4659 = vmatmul.msk.f32.gmra.mxu3 %vm1586_vm0, %v2051_v36  ;;  %v2130_v39 = vpop.f32.mrf.mxu1 }
 0x4cc   : > { %4666 = vmatmul.msk.f32.gmra.mxu1 %vm1586_vm0, %v2130_v39 }
 0x4d2   : > { %v2013_v41 = vpop.f32.mrf.mxu2  ;;  %v2054_v42 = vpop.f32.mrf.mxu3 }
 0x4d3   : > { %4656 = vmatmul.msk.f32.gmra.mxu2 %vm1586_vm0, %v2013_v41  ;;  %4660 = vmatmul.msk.f32.gmra.mxu3 %vm1586_vm0, %v2054_v42  ;;  %v2133_v45 = vpop.f32.mrf.mxu1 }
 0x4d4   : > { %v2092_v48 = vpop.f32.mrf.mxu0  ;;  %4667 = vmatmul.msk.f32.gmra.mxu1 %vm1586_vm0, %v2133_v45 }
 0x4d5   : > { %4663 = vmatmul.msk.f32.gmra.mxu0 %vm1586_vm0, %v2092_v48 }
 0x4dc   : > { %v2136_v51 = vpop.f32.mrf.mxu1  ;;  %v2095_v33 = vpop.f32.mrf.mxu0 }
 0x4dd   : > { %4668 = vmatmul.msk.f32.gmra.mxu1 %vm1586_vm0, %v2136_v51  ;;  %4664 = vmatmul.msk.f32.gmra.mxu0 %vm1586_vm0, %v2095_v33 }
 0x538   : > { %v2254_v52 = vpop.f32.mrf.mxu0 }
 0x539   : > { %v2310_v37 = vsel %vm1068_vm2, %v2254_v52, 0.0 }
 0x53b   : > { %v2172_v47 = vpop.f32.mrf.mxu2 }
 0x53c   : > { %v2307_v44 = vsel %vm1068_vm2, %v2172_v47, 0.0  ;;  %v2213_v50 = vpop.f32.mrf.mxu3 }
 0x53d   : > { %v2308_v32 = vsel %vm1068_vm2, %v2213_v50, 0.0 }
 0x53e   : > { %v2309_v55 = vadd.f32 %v2308_v32, %v2307_v44 }
 0x540   : > { %v2311_v57 = vadd.f32 %v2310_v37, %v2309_v55  ;;  %v2257_v62 = vpop.f32.mrf.mxu0 }
 0x541   : > { %v2295_v38 = vpop.f32.mrf.mxu1  ;;  %v2317_v58 = vsel %vm1068_vm2, %v2257_v62, 0.0  ;;  %v2454_v62 = vld [vmem:[%s6041_s28 + $0x18] sm:$0xff] }
 0x542   : > { %v2312_v59 = vsel %vm1068_vm2, %v2295_v38, 0.0  ;;  %2483 = vmatpush.msrb.mxu2 %v2454_v62 }
 0x543   : > { %v2313_v46 = vadd.f32 %v2312_v59, %v2311_v57  ;;  %v2175_v49 = vpop.f32.mrf.mxu2 }
 0x544   : > { %v2314_v54 = vsel %vm1068_vm2, %v2175_v49, 0.0 }
 0x545   : > { %v2335_v3 = vadd.f32 %v2313_v46, %v5408_v11  ;;  %v2216_v4 = vpop.f32.mrf.mxu3 }
 0x546   : > { %v2315_v5 = vsel %vm1068_vm2, %v2216_v4, 0.0  ;;  %v2452_v4 = vld [vmem:[%s6041_s28 + $0x8] sm:$0xff] }
 0x547   : > { %v2316_v53 = vadd.f32 %v2315_v5, %v2314_v54  ;;  %v5965_v56 = vadd.f32 %v4949_v60, %v2335_v3  ;;  %v2453_v3 = vld [vmem:[%s6041_s28 + $0x10] sm:$0xff]  ;;  %v2451_v5 = vld [vmem:[%s6041_s28] sm:$0xff] }
 0x548   : > { %2484 = vmatpush.msrb.mxu2 %v2453_v3  ;;  %v2541_v3 = vld [vmem:[%s6070_s14 + $0x28] sm:$0xff] }
 0x549   : > { %v2298_v7 = vpop.f32.mrf.mxu1  ;;  %v2318_v8 = vadd.f32 %v2317_v58, %v2316_v53  ;;  %v2349_v61 = vsel %vm1068_vm2, %v5965_v56, 0.0 }
 0x54a   : > { %v2319_v10 = vsel %vm1068_vm2, %v2298_v7, 0.0  ;;  %2350 = vadd.xlane.f32.xlu1 %v2349_v61  ;;  %2485 = vmatpush.msrb.mxu2 %v2452_v4  ;;  %v2540_v4 = vld [vmem:[%s6070_s14 + $0x20] sm:$0xff] }
 0x54b   : > { %v2320_v9 = vadd.f32 %v2319_v10, %v2318_v8  ;;  %v2178_v13 = vpop.f32.mrf.mxu2 }
 0x54c   : > { %v2321_v15 = vsel %vm1068_vm2, %v2178_v13, 0.0  ;;  %2486 = vmatpush.msrb.mxu2 %v2451_v5  ;;  %v2539_v5 = vld [vmem:[%s6070_s14 + $0x18] sm:$0xff] }
 0x54d   : > { %v2336_v11 = vadd.f32 %v2320_v9, %v5410_v12 }
 0x54e   : > { %v2219_v6 = vpop.f32.mrf.mxu3 }
 0x54f   : > { %v2322_v18 = vsel %vm1068_vm2, %v2219_v6, 0.0  ;;  %v5974_v20 = vadd.f32 %v4949_v60, %v2336_v11 }
 0x550   : > { %v2323_v17 = vadd.f32 %v2322_v18, %v2321_v15 }
 0x551   : > { %v2301_v2 = vpop.f32.mrf.mxu1  ;;  %v2352_v22 = vsel %vm1068_vm2, %v5974_v20, 0.0 }
 0x552   : > { %v2260_v23 = vpop.f32.mrf.mxu0  ;;  %2353 = vadd.xlane.f32.xlu2 %v2352_v22  ;;  %v2326_v19 = vsel %vm1068_vm2, %v2301_v2, 0.0 }
 0x553   : > { %v2324_v63 = vsel %vm1068_vm2, %v2260_v23, 0.0 }
 0x554   : > { %v2325_v21 = vadd.f32 %v2324_v63, %v2323_v17  ;;  %v4950_v63 = vld [vmem:[%s5994_s7] ss:$0 sm:$0xff] }
 0x556   : > { %v2327_v12 = vadd.f32 %v2326_v19, %v2325_v21  ;;  %v2181_v0 = vpop.f32.mrf.mxu2  ;;  %v2222_v1 = vpop.f32.mrf.mxu3 }
 0x557   : > { %v2328_v24 = vsel %vm1068_vm2, %v2181_v0, 0.0  ;;  %v2329_v31 = vsel %vm1068_vm2, %v2222_v1, 0.0  ;;  %v4951_v0 = vld [vmem:[%s6000_s10] ss:$0 sm:$0xff] }
 0x558   : > { %v2337_v35 = vadd.f32 %v2327_v12, %v5414_v14  ;;  %v2330_v30 = vadd.f32 %v2329_v31, %v2328_v24 }
 0x55a   : > { %v2263_v26 = vpop.f32.mrf.mxu0  ;;  %v2304_v29 = vpop.f32.mrf.mxu1  ;;  %v5983_v40 = vadd.f32 %v4949_v60, %v2337_v35 }
 0x55b   : > { %v2331_v27 = vsel %vm1068_vm2, %v2263_v26, 0.0  ;;  %v2333_v34 = vsel %vm1068_vm2, %v2304_v29, 0.0 }
 0x55c   : > { %v2332_v43 = vadd.f32 %v2331_v27, %v2330_v30  ;;  %v2355_v28 = vsel %vm1068_vm2, %v5983_v40, 0.0 }
 0x55d   : > { %2356 = vadd.xlane.f32.xlu0 %v2355_v28 }
 0x55e   : > { %v2334_v36 = vadd.f32 %v2333_v34, %v2332_v43 }
 0x560   : > { %v2338_v39 = vadd.f32 %v2334_v36, %v5418_v16 }
 0x562   : > { %v6002_v14 = vadd.f32 %v4949_v60, %v2338_v39 }
 0x564   : > { %v2358_v41 = vsel %vm1068_vm2, %v6002_v14, 0.0 }
 0x565   : > { %2359 = vadd.xlane.f32.xlu1 %v2358_v41 }
 0x5bd   : > { %v2351_v42 = vpop.xlane.xlu1 %2350 }
 0x5be   : > { %v2361_v45 = vmul.f32 %v2351_v42, %v5439_v25 }
 0x5c0   : > { %v2365_v16 = vsub.f32 %v5965_v56, %v2361_v45 }
 0x5c2   : > { %v2369_v48 = vmul.f32 %v2365_v16, %v2365_v16 }
 0x5c4   : > { %v2373_v51 = vsel %vm1068_vm2, %v2369_v48, 0.0 }
 0x5c5   : > { %2374 = vadd.xlane.f32.xlu2 %v2373_v51  ;;  %v2354_v33 = vpop.xlane.xlu2 %2353 }
 0x5c6   : > { %v2362_v52 = vmul.f32 %v2354_v33, %v5439_v25 }
 0x5c8   : > { %v6011_v47 = vsub.f32 %v5974_v20, %v2362_v52 }
 0x5ca   : > { %v2370_v44 = vmul.f32 %v6011_v47, %v6011_v47 }
 0x5cc   : > { %v2376_v50 = vsel %vm1068_vm2, %v2370_v44, 0.0 }
 0x5cd   : > { %2377 = vadd.xlane.f32.xlu0 %v2376_v50 }
 0x5d0   : > { %v2357_v32 = vpop.xlane.xlu0 %2356 }
 0x5d1   : > { %v2363_v55 = vmul.f32 %v2357_v32, %v5439_v25 }
 0x5d3   : > { %v6018_v37 = vsub.f32 %v5983_v40, %v2363_v55 }
 0x5d5   : > { %v2371_v57 = vmul.f32 %v6018_v37, %v6018_v37 }
 0x5d7   : > { %v2379_v38 = vsel %vm1068_vm2, %v2371_v57, 0.0 }
 0x5d8   : > { %2380 = vadd.xlane.f32.xlu1 %v2379_v38  ;;  %v2360_v59 = vpop.xlane.xlu1 %2359 }
 0x5d9   : > { %v2364_v46 = vmul.f32 %v2360_v59, %v5439_v25 }
 0x5db   : > { %v6025_v49 = vsub.f32 %v6002_v14, %v2364_v46 }
 0x5dd   : > { %v2372_v60 = vmul.f32 %v6025_v49, %v6025_v49 }
 0x5df   : > { %v2382_v54 = vsel %vm1068_vm2, %v2372_v60, 0.0 }
 0x5e0   : > { %2383 = vadd.xlane.f32.xlu2 %v2382_v54 }
 0x638   : > { %v2375_v53 = vpop.xlane.xlu2 %2374 }
 0x639   : > { %v2385_v58 = vmul.f32 %v2375_v53, %v5439_v25  ;;  %v2538_v53 = vld [vmem:[%s6070_s14 + $0x10] sm:$0xff] }
 0x63b   : > { %v2389_v7 = vadd.f32 1e-05, %v2385_v58  ;;  %v2537_v58 = vld [vmem:[%s6070_s14 + $0x8] sm:$0xff] }
 0x63d   : > { %5038 = vrsqrt.f32 %v2389_v7  ;;  %vm2399_vm3 = vweird.f32 %v2389_v7 }
 0x640   : > { %v2378_v8 = vpop.xlane.xlu0 %2377 }
 0x641   : > { %v2386_v61 = vmul.f32 %v2378_v8, %v5439_v25  ;;  %v4952_v8 = vld [vmem:[%s6034_s30] ss:$0 sm:$0xff] }
 0x643   : > { %v5039_v10 = vpop.eup %5038  ;;  %v2390_v9 = vadd.f32 1e-05, %v2386_v61 }
 0x644   : > { %v2394_v13 = vmul.f32 %v5039_v10, %v2389_v7  ;;  %vm2400_vm1 = vweird.f32 %v5039_v10  ;;  %v2536_v7 = vld [vmem:[%s6070_s14] sm:$0xff] }
 0x645   : > { %5040 = vrsqrt.f32 %v2390_v9  ;;  %vm2401_vm4 = vmor %vm2399_vm3, %vm2400_vm1  ;;  %vm2409_vm6 = vweird.f32 %v2390_v9 }
 0x646   : > { %v2395_v11 = vmul.f32 %v5039_v10, %v2394_v13 }
 0x648   : > { %v2396_v6 = vmul.f32 0.5, %v2395_v11 }
 0x64a   : > { %v2397_v15 = vsub.f32 1.5, %v2396_v6 }
 0x64b   : > { %v5041_v18 = vpop.eup %5040  ;;  %v2381_v2 = vpop.xlane.xlu1 %2380 }
 0x64c   : > { %v2398_v22 = vmul.f32 %v5039_v10, %v2397_v15  ;;  %v2404_v17 = vmul.f32 %v5041_v18, %v2390_v9  ;;  %v2387_v23 = vmul.f32 %v2381_v2, %v5439_v25  ;;  %vm2410_vm5 = vweird.f32 %v5041_v18 }
 0x64d   : > { %vm2411_vm7 = vmor %vm2409_vm6, %vm2410_vm5 }
 0x64e   : > { %v2402_v21 = vsel %vm2401_vm4, %v5039_v10, %v2398_v22  ;;  %v2405_v19 = vmul.f32 %v5041_v18, %v2404_v17  ;;  %v2391_v12 = vadd.f32 1e-05, %v2387_v23 }
 0x64f   : > { %v2433_v1 = vmul.f32 %v2402_v21, %v2365_v16 }
 0x650   : > { %v2406_v24 = vmul.f32 0.5, %v2405_v19  ;;  %5042 = vrsqrt.f32 %v2391_v12  ;;  %vm2419_vm9 = vweird.f32 %v2391_v12 }
 0x651   : > { %v2440_v31 = vmul.f32 %v4950_v63, %v2433_v1 }
 0x652   : > { %v2407_v35 = vsub.f32 1.5, %v2406_v24 }
 0x653   : > { %v2447_v30 = vadd.f32 %v4951_v0, %v2440_v31  ;;  %v2384_v26 = vpop.xlane.xlu2 %2383 }
 0x654   : > { %v2408_v29 = vmul.f32 %v5041_v18, %v2407_v35  ;;  %v2388_v27 = vmul.f32 %v2384_v26, %v5439_v25 }
 0x655   : > { %4669 = vmatmul.msk.f32.vlgmr.msrb.gmra.mxu2 %vm1068_vm2, %v2447_v30 }
 0x656   : > { %v5043_v43 = vpop.eup %5042  ;;  %v2412_v28 = vsel %vm2411_vm7, %v5041_v18, %v2408_v29  ;;  %v2392_v34 = vadd.f32 1e-05, %v2388_v27 }
 0x657   : > { %v2434_v36 = vmul.f32 %v2412_v28, %v6011_v47  ;;  %v2414_v39 = vmul.f32 %v5043_v43, %v2391_v12  ;;  %vm2420_vm8 = vweird.f32 %v5043_v43 }
 0x658   : > { %5044 = vrsqrt.f32 %v2392_v34  ;;  %vm2421_vm10 = vmor %vm2419_vm9, %vm2420_vm8  ;;  %vm2429_vm12 = vweird.f32 %v2392_v34 }
 0x659   : > { %v2415_v41 = vmul.f32 %v5043_v43, %v2414_v39  ;;  %v2441_v42 = vmul.f32 %v4950_v63, %v2434_v36 }
 0x65b   : > { %v2416_v45 = vmul.f32 0.5, %v2415_v41  ;;  %v2448_v16 = vadd.f32 %v4951_v0, %v2441_v42 }
 0x65d   : > { %v2417_v48 = vsub.f32 1.5, %v2416_v45  ;;  %4670 = vmatmul.msk.f32.gmra.mxu2 %vm1068_vm2, %v2448_v16 }
 0x65e   : > { %v5045_v51 = vpop.eup %5044 }
 0x65f   : > { %v2418_v33 = vmul.f32 %v5043_v43, %v2417_v48  ;;  %v2424_v52 = vmul.f32 %v5045_v51, %v2392_v34  ;;  %vm2430_vm11 = vweird.f32 %v5045_v51 }
 0x660   : > { %vm2431_vm13 = vmor %vm2429_vm12, %vm2430_vm11 }
 0x661   : > { %v2422_v44 = vsel %vm2421_vm10, %v5043_v43, %v2418_v33  ;;  %v2425_v50 = vmul.f32 %v5045_v51, %v2424_v52 }
 0x662   : > { %v2435_v47 = vmul.f32 %v2422_v44, %v6018_v37  ;;  %v2543_v37 = vld [vmem:[%s6070_s14 + $0x38] sm:$0xff] }
 0x663   : > { %v2426_v32 = vmul.f32 0.5, %v2425_v50  ;;  %2565 = vmatpush.msra.mxu3 %v2543_v37 }
 0x664   : > { %v2442_v55 = vmul.f32 %v4950_v63, %v2435_v47 }
 0x665   : > { %v2427_v57 = vsub.f32 1.5, %v2426_v32 }
 0x666   : > { %v2449_v38 = vadd.f32 %v4951_v0, %v2442_v55 }
 0x667   : > { %v2428_v59 = vmul.f32 %v5045_v51, %v2427_v57 }
 0x668   : > { %4671 = vmatmul.msk.f32.gmra.mxu2 %vm1068_vm2, %v2449_v38  ;;  %v4953_v38 = vld [vmem:[%s6064_s8] ss:$0 sm:$0xff] }
 0x669   : > { %v2432_v46 = vsel %vm2431_vm13, %v5045_v51, %v2428_v59 }
 0x66a   : > { %v2436_v60 = vmul.f32 %v2432_v46, %v6025_v49  ;;  %v2542_v49 = vld [vmem:[%s6070_s14 + $0x30] sm:$0xff] }
 0x66b   : > { %2566 = vmatpush.msra.mxu3 %v2542_v49 }
 0x66c   : > { %v2443_v54 = vmul.f32 %v4950_v63, %v2436_v60 }
 0x66d   : > { %2567 = vmatpush.msra.mxu3 %v2541_v3 }
 0x66e   : > { %v2450_v62 = vadd.f32 %v4951_v0, %v2443_v54 }
 0x66f   : > { %2568 = vmatpush.msra.mxu3 %v2540_v4 }
 0x670   : > { %4672 = vmatmul.msk.f32.gmra.mxu2 %vm1068_vm2, %v2450_v62 }
 0x671   : > { %2569 = vmatpush.msra.mxu3 %v2539_v5 }
 0x673   : > { %2570 = vmatpush.msra.mxu3 %v2538_v53 }
 0x675   : > { %2571 = vmatpush.msra.mxu3 %v2537_v58 }
 0x677   : > { %2572 = vmatpush.msra.mxu3 %v2536_v7 }
 0x6d8   : > { %v2488_v61 = vpop.f32.mrf.mxu2 }
 0x6d9   : > { %v2489_v10 = vadd.f32 %v4952_v8, %v2488_v61 }
 0x6db   : > { %v2500_v9 = vmul.f32 %v2489_v10, %v2489_v10 }
 0x6dd   : > { %v2504_v13 = vmul.f32 %v2500_v9, %v2489_v10 }
 0x6df   : > { %v2508_v11 = vmul.f32 0.044715, %v2504_v13 }
 0x6e0   : > { %v2491_v6 = vpop.f32.mrf.mxu2 }
 0x6e1   : > { %v2512_v15 = vadd.f32 %v2508_v11, %v2489_v10  ;;  %v2492_v18 = vadd.f32 %v4952_v8, %v2491_v6 }
 0x6e3   : > { %v2516_v2 = vmul.f32 0.7978846, %v2512_v15  ;;  %v2501_v22 = vmul.f32 %v2492_v18, %v2492_v18 }
 0x6e5   : > { %5046 = vtanh.f32 %v2516_v2  ;;  %v2505_v17 = vmul.f32 %v2501_v22, %v2492_v18 }
 0x6e7   : > { %v2509_v23 = vmul.f32 0.044715, %v2505_v17 }
 0x6e9   : > { %v2513_v63 = vadd.f32 %v2509_v23, %v2492_v18 }
 0x6eb   : > { %v5047_v21 = vpop.eup %5046  ;;  %v2517_v19 = vmul.f32 0.7978846, %v2513_v63  ;;  %v2494_v12 = vpop.f32.mrf.mxu2 }
 0x6ec   : > { %v2524_v0 = vadd.f32 1.0, %v5047_v21  ;;  %v2495_v1 = vadd.f32 %v4952_v8, %v2494_v12 }
 0x6ed   : > { %5048 = vtanh.f32 %v2517_v19 }
 0x6ee   : > { %v2528_v24 = vmul.f32 0.5, %v2524_v0  ;;  %v2502_v31 = vmul.f32 %v2495_v1, %v2495_v1 }
 0x6f0   : > { %v2532_v35 = vmul.f32 %v2528_v24, %v2489_v10  ;;  %v2506_v30 = vmul.f32 %v2502_v31, %v2495_v1  ;;  %v4682_v24 = vld [vmem:[%s5476_s1 + $0x98] sm:$0xff] }
 0x6f1   : > { %v4686_v31 = vld [vmem:[%s5476_s1 + $0xb8] sm:$0xff]  ;;  %2779 = vmatpush.msrb.mxu0 %v4682_v24 }
 0x6f2   : > { %v2510_v26 = vmul.f32 0.044715, %v2506_v30  ;;  %4673 = vmatmul.msk.f32.vlgmr.msra.gmra.mxu3 %vm2544_vm14, %v2532_v35  ;;  %v4690_v35 = vld [vmem:[%s5476_s1 + $0xd8] sm:$0xff]  ;;  %2808 = vmatpush.msrb.mxu1 %v4686_v31 }
 0x6f3   : > { %v5049_v29 = vpop.eup %5048  ;;  %v2497_v27 = vpop.f32.mrf.mxu2  ;;  %v4694_v30 = vld [vmem:[%s5476_s1 + $0xf8] sm:$0xff]  ;;  %2837 = vmatpush.msra.mxu2 %v4690_v35  ;;  %v4704_v35 = vld [vmem:[%s5501_s3 + $0xc8] sm:$0xff] }
 0x6f4   : > { %v2514_v43 = vadd.f32 %v2510_v26, %v2495_v1  ;;  %v2498_v28 = vadd.f32 %v4952_v8, %v2497_v27  ;;  %v2525_v34 = vadd.f32 1.0, %v5049_v29  ;;  %2866 = vmatpush.msrb.mxu3 %v4694_v30  ;;  %v4681_v26 = vld [vmem:[%s5476_s1 + $0x90] sm:$0xff]  ;;  %v4708_v30 = vld [vmem:[%s5501_s3 + $0xe8] sm:$0xff] }
 0x6f5   : > { %v4685_v29 = vld [vmem:[%s5476_s1 + $0xb0] sm:$0xff]  ;;  %2780 = vmatpush.msrb.mxu0 %v4681_v26 }
 0x6f6   : > { %v2518_v36 = vmul.f32 0.7978846, %v2514_v43  ;;  %v2503_v39 = vmul.f32 %v2498_v28, %v2498_v28  ;;  %v2529_v41 = vmul.f32 0.5, %v2525_v34  ;;  %v4689_v27 = vld [vmem:[%s5476_s1 + $0xd0] sm:$0xff]  ;;  %2809 = vmatpush.msrb.mxu1 %v4685_v29  ;;  %v4684_v34 = vld [vmem:[%s5476_s1 + $0xa8] sm:$0xff] }
 0x6f7   : > { %v4693_v43 = vld [vmem:[%s5476_s1 + $0xf0] sm:$0xff]  ;;  %2838 = vmatpush.msra.mxu2 %v4689_v27  ;;  %v4695_v27 = vld [vmem:[%s5501_s3 + $0x80] sm:$0xff] }
 0x6f8   : > { %5050 = vtanh.f32 %v2518_v36  ;;  %v2507_v42 = vmul.f32 %v2503_v39, %v2498_v28  ;;  %v2533_v45 = vmul.f32 %v2529_v41, %v2492_v18  ;;  %2867 = vmatpush.msrb.mxu3 %v4693_v43  ;;  %v4688_v36 = vld [vmem:[%s5476_s1 + $0xc8] sm:$0xff]  ;;  %2810 = vmatpush.msrb.mxu1 %v4684_v34  ;;  %v4679_v41 = vld [vmem:[%s5476_s1 + $0x80] sm:$0xff] }
 0x6f9   : > { %v4692_v39 = vld [vmem:[%s5476_s1 + $0xe8] sm:$0xff]  ;;  %2839 = vmatpush.msra.mxu2 %v4688_v36  ;;  %v4699_v43 = vld [vmem:[%s5501_s3 + $0xa0] sm:$0xff] }
 0x6fa   : > { %v2511_v16 = vmul.f32 0.044715, %v2507_v42  ;;  %4674 = vmatmul.msk.f32.gmra.mxu3 %vm2544_vm14, %v2533_v45  ;;  %v4683_v42 = vld [vmem:[%s5476_s1 + $0xa0] sm:$0xff] }
 0x6fb   : > { %2868 = vmatpush.msrb.mxu3 %v4692_v39  ;;  %v4687_v45 = vld [vmem:[%s5476_s1 + $0xc0] sm:$0xff]  ;;  %2811 = vmatpush.msrb.mxu1 %v4683_v42 }
 0x6fc   : > { %v2515_v48 = vadd.f32 %v2511_v16, %v2498_v28  ;;  %v4691_v16 = vld [vmem:[%s5476_s1 + $0xe0] sm:$0xff]  ;;  %2840 = vmatpush.msra.mxu2 %v4687_v45 }
 0x6fd   : > { %2869 = vmatpush.msrb.mxu3 %v4691_v16  ;;  %v4707_v34 = vld [vmem:[%s5501_s3 + $0xe0] sm:$0xff] }
 0x6fe   : > { %v5051_v51 = vpop.eup %5050  ;;  %v2519_v33 = vmul.f32 0.7978846, %v2515_v48 }
 0x6ff   : > { %v2526_v52 = vadd.f32 1.0, %v5051_v51 }
 0x700   : > { %5052 = vtanh.f32 %v2519_v33 }
 0x701   : > { %v2530_v44 = vmul.f32 0.5, %v2526_v52 }
 0x703   : > { %v2534_v50 = vmul.f32 %v2530_v44, %v2495_v1 }
 0x705   : > { %4675 = vmatmul.msk.f32.gmra.mxu3 %vm2544_vm14, %v2534_v50 }
 0x706   : > { %v5053_v47 = vpop.eup %5052 }
 0x707   : > { %v2527_v32 = vadd.f32 1.0, %v5053_v47 }
 0x709   : > { %v2531_v55 = vmul.f32 0.5, %v2527_v32 }
 0x70b   : > { %v2535_v57 = vmul.f32 %v2531_v55, %v2498_v28  ;;  %v4680_v28 = vld [vmem:[%s5476_s1 + $0x88] sm:$0xff]  ;;  %s1000_s1 = scalar_lea.vmem %s6763_s19, %s6816_s2 }
 0x70c   : > { %2781 = vmatpush.msrb.mxu0 %v4680_v28  ;;  %v4703_v28 = vld [vmem:[%s5501_s3 + $0xc0] sm:$0xff] }
 0x70d   : > { %4676 = vmatmul.msk.f32.gmra.mxu3 %vm2544_vm14, %v2535_v57 }
 0x70e   : > { %2782 = vmatpush.msrb.mxu0 %v4679_v41 }
 0x775   : > { %v2574_v59 = vpop.f32.mrf.mxu3 }
 0x776   : > { %v2586_v46 = vadd.f32 %v2574_v59, %v5965_v56 }
 0x778   : > { %v6087_v60 = vadd.f32 %v4953_v38, %v2586_v46 }
 0x77a   : > { %v2602_v54 = vsel %vm1068_vm2, %v6087_v60, 0.0 }
 0x77b   : > { %2603 = vadd.xlane.f32.xlu0 %v2602_v54 }
 0x77d   : > { %v2577_v62 = vpop.f32.mrf.mxu3 }
 0x77e   : > { %v2587_v37 = vadd.f32 %v2577_v62, %v5974_v20 }
 0x780   : > { %v6092_v49 = vadd.f32 %v4953_v38, %v2587_v37 }
 0x782   : > { %v2605_v3 = vsel %vm1068_vm2, %v6092_v49, 0.0 }
 0x783   : > { %2606 = vadd.xlane.f32.xlu1 %v2605_v3  ;;  %v6154_v3 = vld [vmem:[%s5429_s23 + $0x1] ss:$0 sm:$0xff] }
 0x788   : > { %v2580_v4 = vpop.f32.mrf.mxu3 }
 0x789   : > { %v2588_v5 = vadd.f32 %v2580_v4, %v5983_v40 }
 0x78b   : > { %v6097_v53 = vadd.f32 %v4953_v38, %v2588_v5 }
 0x78d   : > { %v2608_v56 = vsel %vm1068_vm2, %v6097_v53, 0.0 }
 0x78e   : > { %2609 = vadd.xlane.f32.xlu2 %v2608_v56 }
 0x790   : > { %v2583_v58 = vpop.f32.mrf.mxu3 }
 0x791   : > { %v2589_v7 = vadd.f32 %v2583_v58, %v6002_v14  ;;  %v6159_v58 = vld [vmem:[%s5435_s22 + $0x1] ss:$0 sm:$0xff] }
 0x793   : > { %v6102_v8 = vadd.f32 %v4953_v38, %v2589_v7 }
 0x795   : > { %v2611_v20 = vsel %vm1068_vm2, %v6102_v8, 0.0 }
 0x796   : > { %2612 = vadd.xlane.f32.xlu0 %v2611_v20 }
 0x7ee   : > { %v2604_v61 = vpop.xlane.xlu0 %2603 }
 0x7ef   : > { %v2614_v10 = vmul.f32 %v2604_v61, %v5439_v25 }
 0x7f1   : > { %v6108_v40 = vsub.f32 %v6087_v60, %v2614_v10  ;;  %v4698_v10 = vld [vmem:[%s5501_s3 + $0x98] sm:$0xff] }
 0x7f2   : > { %2895 = vmatpush.msra.mxu0 %v4698_v10  ;;  %v4715_v10 = vld [vmem:[%s5556_s0 + $0xa0] sm:$0xff] }
 0x7f3   : > { %v2622_v9 = vmul.f32 %v6108_v40, %v6108_v40 }
 0x7f5   : > { %v2626_v13 = vsel %vm1068_vm2, %v2622_v9, 0.0  ;;  %v4702_v9 = vld [vmem:[%s5501_s3 + $0xb8] sm:$0xff] }
 0x7f6   : > { %2627 = vadd.xlane.f32.xlu1 %v2626_v13  ;;  %v2607_v11 = vpop.xlane.xlu1 %2606  ;;  %v4706_v13 = vld [vmem:[%s5501_s3 + $0xd8] sm:$0xff]  ;;  %2924 = vmatpush.msra.mxu1 %v4702_v9  ;;  %v4719_v9 = vld [vmem:[%s5556_s0 + $0xc0] sm:$0xff] }
 0x7f7   : > { %v2615_v14 = vmul.f32 %v2607_v11, %v5439_v25  ;;  %2953 = vmatpush.msrb.mxu2 %v4706_v13  ;;  %v4723_v13 = vld [vmem:[%s5556_s0 + $0xe0] sm:$0xff] }
 0x7f9   : > { %v6115_v6 = vsub.f32 %v6092_v49, %v2615_v14  ;;  %v4710_v14 = vld [vmem:[%s5501_s3 + $0xf8] sm:$0xff] }
 0x7fa   : > { %2982 = vmatpush.msra.mxu3 %v4710_v14 }
 0x7fb   : > { %v2623_v15 = vmul.f32 %v6115_v6, %v6115_v6 }
 0x7fd   : > { %v2629_v18 = vsel %vm1068_vm2, %v2623_v15, 0.0  ;;  %v4697_v15 = vld [vmem:[%s5501_s3 + $0x90] sm:$0xff] }
 0x7fe   : > { %2630 = vadd.xlane.f32.xlu2 %v2629_v18  ;;  %v4701_v18 = vld [vmem:[%s5501_s3 + $0xb0] sm:$0xff]  ;;  %2896 = vmatpush.msra.mxu0 %v4697_v15 }
 0x7ff   : > { %2925 = vmatpush.msra.mxu1 %v4701_v18 }
 0x801   : > { %v2610_v2 = vpop.xlane.xlu2 %2609 }
 0x802   : > { %v2616_v22 = vmul.f32 %v2610_v2, %v5439_v25 }
 0x804   : > { %v6122_v17 = vsub.f32 %v6097_v53, %v2616_v22 }
 0x806   : > { %v2624_v23 = vmul.f32 %v6122_v17, %v6122_v17 }
 0x808   : > { %v2632_v63 = vsel %vm1068_vm2, %v2624_v23, 0.0 }
 0x809   : > { %2633 = vadd.xlane.f32.xlu0 %v2632_v63  ;;  %v2613_v21 = vpop.xlane.xlu0 %2612  ;;  %v4705_v63 = vld [vmem:[%s5501_s3 + $0xd0] sm:$0xff] }
 0x80a   : > { %v2617_v19 = vmul.f32 %v2613_v21, %v5439_v25  ;;  %v4709_v21 = vld [vmem:[%s5501_s3 + $0xf0] sm:$0xff]  ;;  %2954 = vmatpush.msrb.mxu2 %v4705_v63 }
 0x80b   : > { %2983 = vmatpush.msra.mxu3 %v4709_v21 }
 0x80c   : > { %v6129_v12 = vsub.f32 %v6102_v8, %v2617_v19  ;;  %v4696_v19 = vld [vmem:[%s5501_s3 + $0x88] sm:$0xff]  ;;  %2955 = vmatpush.msrb.mxu2 %v4704_v35 }
 0x80d   : > { %2897 = vmatpush.msra.mxu0 %v4696_v19  ;;  %2984 = vmatpush.msra.mxu3 %v4708_v30 }
 0x80e   : > { %v2625_v0 = vmul.f32 %v6129_v12, %v6129_v12  ;;  %2956 = vmatpush.msrb.mxu2 %v4703_v28 }
 0x80f   : > { %2898 = vmatpush.msra.mxu0 %v4695_v27  ;;  %2985 = vmatpush.msra.mxu3 %v4707_v34 }
 0x810   : > { %v2635_v1 = vsel %vm1068_vm2, %v2625_v0, 0.0  ;;  %v4700_v0 = vld [vmem:[%s5501_s3 + $0xa8] sm:$0xff] }
 0x811   : > { %2636 = vadd.xlane.f32.xlu1 %v2635_v1  ;;  %2926 = vmatpush.msra.mxu1 %v4700_v0 }
 0x813   : > { %2927 = vmatpush.msra.mxu1 %v4699_v43 }
 0x869   : > { %v2628_v48 = vpop.xlane.xlu1 %2627 }
 0x86a   : > { %v2638_v51 = vmul.f32 %v2628_v48, %v5439_v25 }
 0x86c   : > { %v2642_v33 = vadd.f32 1e-05, %v2638_v51 }
 0x86e   : > { %5054 = vrsqrt.f32 %v2642_v33  ;;  %vm2652_vm1 = vweird.f32 %v2642_v33 }
 0x871   : > { %v2631_v52 = vpop.xlane.xlu2 %2630 }
 0x872   : > { %v2639_v44 = vmul.f32 %v2631_v52, %v5439_v25 }
 0x874   : > { %v5055_v50 = vpop.eup %5054  ;;  %v2643_v47 = vadd.f32 1e-05, %v2639_v44 }
 0x875   : > { %v2647_v32 = vmul.f32 %v5055_v50, %v2642_v33  ;;  %vm2653_vm15 = vweird.f32 %v5055_v50 }
 0x876   : > { %5056 = vrsqrt.f32 %v2643_v47  ;;  %vm2654_vm3 = vmor %vm2652_vm1, %vm2653_vm15  ;;  %vm2662_vm5 = vweird.f32 %v2643_v47 }
 0x877   : > { %v2648_v55 = vmul.f32 %v5055_v50, %v2647_v32 }
 0x879   : > { %v2649_v57 = vmul.f32 0.5, %v2648_v55 }
 0x87b   : > { %v2650_v38 = vsub.f32 1.5, %v2649_v57 }
 0x87c   : > { %v5057_v59 = vpop.eup %5056  ;;  %v2634_v46 = vpop.xlane.xlu0 %2633 }
 0x87d   : > { %v2651_v54 = vmul.f32 %v5055_v50, %v2650_v38  ;;  %v2657_v62 = vmul.f32 %v5057_v59, %v2643_v47  ;;  %v2640_v37 = vmul.f32 %v2634_v46, %v5439_v25  ;;  %vm2663_vm4 = vweird.f32 %v5057_v59  ;;  %v4718_v46 = vld [vmem:[%s5556_s0 + $0xb8] sm:$0xff] }
 0x87e   : > { %vm2664_vm6 = vmor %vm2662_vm5, %vm2663_vm4 }
 0x87f   : > { %v2655_v4 = vsel %vm2654_vm3, %v5055_v50, %v2651_v54  ;;  %v2658_v5 = vmul.f32 %v5057_v59, %v2657_v62  ;;  %v6156_v56 = vadd.f32 1e-05, %v2640_v37  ;;  %v4722_v54 = vld [vmem:[%s5556_s0 + $0xd8] sm:$0xff]  ;;  %v4713_v37 = vld [vmem:[%s5556_s0 + $0x90] sm:$0xff] }
 0x880   : > { %v2686_v7 = vmul.f32 %v2655_v4, %v6108_v40  ;;  %v4726_v62 = vld [vmem:[%s5556_s0 + $0xf8] sm:$0xff]  ;;  %v4721_v4 = vld [vmem:[%s5556_s0 + $0xd0] sm:$0xff] }
 0x881   : > { %v2659_v20 = vmul.f32 0.5, %v2658_v5  ;;  %5058 = vrsqrt.f32 %v6156_v56  ;;  %vm2672_vm8 = vweird.f32 %v6156_v56  ;;  %v4725_v5 = vld [vmem:[%s5556_s0 + $0xf0] sm:$0xff] }
 0x882   : > { %v2693_v61 = vmul.f32 %v6154_v3, %v2686_v7  ;;  %v4720_v7 = vld [vmem:[%s5556_s0 + $0xc8] sm:$0xff] }
 0x883   : > { %v2660_v11 = vsub.f32 1.5, %v2659_v20  ;;  %v4724_v20 = vld [vmem:[%s5556_s0 + $0xe8] sm:$0xff] }
 0x884   : > { %v6171_v40 = vadd.f32 %v6159_v58, %v2693_v61  ;;  %v2637_v2 = vpop.xlane.xlu1 %2636  ;;  %v4711_v61 = vld [vmem:[%s5556_s0 + $0x80] sm:$0xff] }
 0x885   : > { %v2661_v22 = vmul.f32 %v5057_v59, %v2660_v11  ;;  %v2641_v23 = vmul.f32 %v2637_v2, %v5439_v25 }
 0x886   : > { %4727 = vmatmul.msk.f32.vlgmr.msrb.gmra.mxu0 %vm1068_vm2, %v6171_v40  ;;  %4731 = vmatmul.msk.f32.vlgmr.msrb.gmra.mxu1 %vm1068_vm2, %v6171_v40 }
 0x887   : > { %v5059_v1 = vpop.eup %5058  ;;  %v2665_v24 = vsel %vm2664_vm6, %v5057_v59, %v2661_v22  ;;  %v2645_v31 = vadd.f32 1e-05, %v2641_v23  ;;  %4735 = vmatmul.msk.f32.vlgmr.msra.gmra.mxu2 %vm1068_vm2, %v6171_v40  ;;  %4739 = vmatmul.msk.f32.vlgmr.msrb.gmra.mxu3 %vm1068_vm2, %v6171_v40 }
 0x888   : > { %v2687_v26 = vmul.f32 %v2665_v24, %v6115_v6  ;;  %v2667_v29 = vmul.f32 %v5059_v1, %v6156_v56  ;;  %vm2673_vm7 = vweird.f32 %v5059_v1  ;;  %3040 = vmatpush.msrb.mxu1 %v4718_v46  ;;  %3069 = vmatpush.msra.mxu2 %v4722_v54  ;;  %v4712_v56 = vld [vmem:[%s5556_s0 + $0x88] sm:$0xff] }
 0x889   : > { %5060 = vrsqrt.f32 %v2645_v31  ;;  %vm2674_vm9 = vmor %vm2672_vm8, %vm2673_vm7  ;;  %vm2682_vm11 = vweird.f32 %v2645_v31  ;;  %3098 = vmatpush.msrb.mxu3 %v4726_v62 }
 0x88a   : > { %v2694_v36 = vmul.f32 %v6154_v3, %v2687_v26  ;;  %v2668_v39 = vmul.f32 %v5059_v1, %v2667_v29  ;;  %3070 = vmatpush.msra.mxu2 %v4721_v4  ;;  %v5144_v4 = vld [vmem:[%s6807_s29] sm:$0xff] }
 0x88b   : > { %3099 = vmatpush.msrb.mxu3 %v4725_v5 }
 0x88c   : > { %v6197_v6 = vadd.f32 %v6159_v58, %v2694_v36  ;;  %v2669_v41 = vmul.f32 0.5, %v2668_v39  ;;  %3071 = vmatpush.msra.mxu2 %v4720_v7 }
 0x88d   : > { %3100 = vmatpush.msrb.mxu3 %v4724_v20 }
 0x88e   : > { %v2670_v42 = vsub.f32 1.5, %v2669_v41  ;;  %4728 = vmatmul.msk.f32.gmra.mxu0 %vm1068_vm2, %v6197_v6  ;;  %4732 = vmatmul.msk.f32.gmra.mxu1 %vm1068_vm2, %v6197_v6 }
 0x88f   : > { %v5061_v45 = vpop.eup %5060  ;;  %4736 = vmatmul.msk.f32.gmra.mxu2 %vm1068_vm2, %v6197_v6  ;;  %4740 = vmatmul.msk.f32.gmra.mxu3 %vm1068_vm2, %v6197_v6 }
 0x890   : > { %v2671_v16 = vmul.f32 %v5059_v1, %v2670_v42  ;;  %v2677_v48 = vmul.f32 %v5061_v45, %v2645_v31  ;;  %vm2683_vm10 = vweird.f32 %v5061_v45  ;;  %3072 = vmatpush.msra.mxu2 %v4719_v9  ;;  %3101 = vmatpush.msrb.mxu3 %v4723_v13 }
 0x891   : > { %vm2684_vm12 = vmor %vm2682_vm11, %vm2683_vm10 }
 0x892   : > { %v2675_v51 = vsel %vm2674_vm9, %v5059_v1, %v2671_v16  ;;  %v2678_v33 = vmul.f32 %v5061_v45, %v2677_v48 }
 0x893   : > { %v2688_v52 = vmul.f32 %v2675_v51, %v6122_v17 }
 0x894   : > { %v2679_v44 = vmul.f32 0.5, %v2678_v33 }
 0x895   : > { %v2695_v50 = vmul.f32 %v6154_v3, %v2688_v52 }
 0x896   : > { %v2680_v47 = vsub.f32 1.5, %v2679_v44 }
 0x897   : > { %v6211_v32 = vadd.f32 %v6159_v58, %v2695_v50 }
 0x898   : > { %v2681_v55 = vmul.f32 %v5061_v45, %v2680_v47 }
 0x899   : > { %4729 = vmatmul.msk.f32.gmra.mxu0 %vm1068_vm2, %v6211_v32  ;;  %4733 = vmatmul.msk.f32.gmra.mxu1 %vm1068_vm2, %v6211_v32 }
 0x89a   : > { %v2685_v17 = vsel %vm2684_vm12, %v5061_v45, %v2681_v55  ;;  %4737 = vmatmul.msk.f32.gmra.mxu2 %vm1068_vm2, %v6211_v32  ;;  %4741 = vmatmul.msk.f32.gmra.mxu3 %vm1068_vm2, %v6211_v32 }
 0x89b   : > { %v2689_v57 = vmul.f32 %v2685_v17, %v6129_v12  ;;  %v4714_v12 = vld [vmem:[%s5556_s0 + $0x98] sm:$0xff] }
 0x89c   : > { %3011 = vmatpush.msrb.mxu0 %v4714_v12 }
 0x89d   : > { %v2696_v38 = vmul.f32 %v6154_v3, %v2689_v57  ;;  %v4717_v3 = vld [vmem:[%s5556_s0 + $0xb0] sm:$0xff] }
 0x89e   : > { %3012 = vmatpush.msrb.mxu0 %v4713_v37  ;;  %3041 = vmatpush.msrb.mxu1 %v4717_v3 }
 0x89f   : > { %v6224_v59 = vadd.f32 %v6159_v58, %v2696_v38  ;;  %v4716_v58 = vld [vmem:[%s5556_s0 + $0xa8] sm:$0xff] }
 0x8a0   : > { %3013 = vmatpush.msrb.mxu0 %v4712_v56  ;;  %3042 = vmatpush.msrb.mxu1 %v4716_v58 }
 0x8a1   : > { %4730 = vmatmul.msk.f32.gmra.mxu0 %vm1068_vm2, %v6224_v59  ;;  %4734 = vmatmul.msk.f32.gmra.mxu1 %vm1068_vm2, %v6224_v59 }
 0x8a2   : > { %4738 = vmatmul.msk.f32.gmra.mxu2 %vm1068_vm2, %v6224_v59  ;;  %4742 = vmatmul.msk.f32.gmra.mxu3 %vm1068_vm2, %v6224_v59 }
 0x8a3   : > { %3014 = vmatpush.msrb.mxu0 %v4711_v61  ;;  %3043 = vmatpush.msrb.mxu1 %v4715_v10 }
 0x8a9   : > { %4743 = vmatmul.msk.f32.vlgmr.msra.gmra.mxu0 %vm1068_vm2, %v6171_v40  ;;  %4747 = vmatmul.msk.f32.vlgmr.msra.gmra.mxu1 %vm1068_vm2, %v6171_v40 }
 0x8aa   : > { %4751 = vmatmul.msk.f32.vlgmr.msrb.gmra.mxu2 %vm1068_vm2, %v6171_v40  ;;  %4755 = vmatmul.msk.f32.vlgmr.msra.gmra.mxu3 %vm1068_vm2, %v6171_v40 }
 0x8b1   : > { %4744 = vmatmul.msk.f32.gmra.mxu0 %vm1068_vm2, %v6197_v6  ;;  %4748 = vmatmul.msk.f32.gmra.mxu1 %vm1068_vm2, %v6197_v6 }
 0x8b2   : > { %4752 = vmatmul.msk.f32.gmra.mxu2 %vm1068_vm2, %v6197_v6  ;;  %4756 = vmatmul.msk.f32.gmra.mxu3 %vm1068_vm2, %v6197_v6 }
 0x8b9   : > { %4745 = vmatmul.msk.f32.gmra.mxu0 %vm1068_vm2, %v6211_v32  ;;  %4749 = vmatmul.msk.f32.gmra.mxu1 %vm1068_vm2, %v6211_v32 }
 0x8ba   : > { %4753 = vmatmul.msk.f32.gmra.mxu2 %vm1068_vm2, %v6211_v32  ;;  %4757 = vmatmul.msk.f32.gmra.mxu3 %vm1068_vm2, %v6211_v32 }
 0x8c1   : > { %4746 = vmatmul.msk.f32.gmra.mxu0 %vm1068_vm2, %v6224_v59  ;;  %4750 = vmatmul.msk.f32.gmra.mxu1 %vm1068_vm2, %v6224_v59 }
 0x8c2   : > { %4754 = vmatmul.msk.f32.gmra.mxu2 %vm1068_vm2, %v6224_v59  ;;  %4758 = vmatmul.msk.f32.gmra.mxu3 %vm1068_vm2, %v6224_v59 }
 0x8c9   : > { %4759 = vmatmul.msk.f32.vlgmr.msrb.gmra.mxu0 %vm1068_vm2, %v6171_v40  ;;  %4763 = vmatmul.msk.f32.vlgmr.msrb.gmra.mxu1 %vm1068_vm2, %v6171_v40 }
 0x8ca   : > { %4767 = vmatmul.msk.f32.vlgmr.msra.gmra.mxu2 %vm1068_vm2, %v6171_v40  ;;  %4771 = vmatmul.msk.f32.vlgmr.msrb.gmra.mxu3 %vm1068_vm2, %v6171_v40 }
 0x8d1   : > { %4760 = vmatmul.msk.f32.gmra.mxu0 %vm1068_vm2, %v6197_v6  ;;  %4764 = vmatmul.msk.f32.gmra.mxu1 %vm1068_vm2, %v6197_v6 }
 0x8d2   : > { %4768 = vmatmul.msk.f32.gmra.mxu2 %vm1068_vm2, %v6197_v6  ;;  %4772 = vmatmul.msk.f32.gmra.mxu3 %vm1068_vm2, %v6197_v6 }
 0x8d9   : > { %4761 = vmatmul.msk.f32.gmra.mxu0 %vm1068_vm2, %v6211_v32  ;;  %4765 = vmatmul.msk.f32.gmra.mxu1 %vm1068_vm2, %v6211_v32 }
 0x8da   : > { %4769 = vmatmul.msk.f32.gmra.mxu2 %vm1068_vm2, %v6211_v32  ;;  %4773 = vmatmul.msk.f32.gmra.mxu3 %vm1068_vm2, %v6211_v32 }
 0x8e1   : > { %4762 = vmatmul.msk.f32.gmra.mxu0 %vm1068_vm2, %v6224_v59  ;;  %4766 = vmatmul.msk.f32.gmra.mxu1 %vm1068_vm2, %v6224_v59 }
 0x8e2   : > { %4770 = vmatmul.msk.f32.gmra.mxu2 %vm1068_vm2, %v6224_v59  ;;  %4774 = vmatmul.msk.f32.gmra.mxu3 %vm1068_vm2, %v6224_v59 }
 0x903   : > { %v2784_v11 = vpop.f32.mrf.mxu0  ;;  %v2813_v14 = vpop.f32.mrf.mxu1 }
 0x90a   : > { %v2842_v15 = vpop.f32.mrf.mxu2  ;;  %v2871_v18 = vpop.f32.mrf.mxu3 }
 0x90b   : > { %v2787_v40 = vpop.f32.mrf.mxu0  ;;  %v2816_v2 = vpop.f32.mrf.mxu1 }
 0x912   : > { %v2845_v22 = vpop.f32.mrf.mxu2  ;;  %v2874_v23 = vpop.f32.mrf.mxu3 }
 0x916   : > { %v2790_v63 = vpop.f32.mrf.mxu0  ;;  %v2819_v21 = vpop.f32.mrf.mxu1 }
 0x91d   : > { %v6314_v19 = vpop.f32.mrf.mxu2  ;;  %v6316_v0 = vpop.f32.mrf.mxu3 }
 0x91e   : > { %v6318_v1 = vpop.f32.mrf.mxu0  ;;  %v6320_v24 = vpop.f32.mrf.mxu1 }
 0x925   : > { %v6322_v31 = vpop.f32.mrf.mxu2  ;;  %v6324_v35 = vpop.f32.mrf.mxu3 }
 0x926   : > { %v2900_v30 = vpop.f32.mrf.mxu0  ;;  %v2929_v26 = vpop.f32.mrf.mxu1 }
 0x92d   : > { %v2958_v29 = vpop.f32.mrf.mxu2  ;;  %v2987_v27 = vpop.f32.mrf.mxu3 }
 0x92e   : > { %v2903_v43 = vpop.f32.mrf.mxu0  ;;  %v2932_v28 = vpop.f32.mrf.mxu1 }
 0x935   : > { %v2961_v34 = vpop.f32.mrf.mxu2  ;;  %v2990_v36 = vpop.f32.mrf.mxu3 }
 0x936   : > { %v2906_v39 = vpop.f32.mrf.mxu0  ;;  %v2935_v6 = vpop.f32.mrf.mxu1 }
 0x93d   : > { %v2964_v41 = vpop.f32.mrf.mxu2  ;;  %v2993_v42 = vpop.f32.mrf.mxu3 }
 0x93e   : > { %v2909_v45 = vpop.f32.mrf.mxu0  ;;  %v2938_v16 = vpop.f32.mrf.mxu1 }
 0x93f   : > { %4775 = vmatpush.xpose.msk.msra.mxu0 %vm1586_vm0, %v2909_v45  ;;  %4783 = vmatpush.xpose.msk.msra.mxu1 %vm1586_vm0, %v2938_v16 }
 0x943   : > { %4776 = vmatpush.xpose.msk.msra.mxu0 %vm1586_vm0, %v2906_v39  ;;  %4784 = vmatpush.xpose.msk.msra.mxu1 %vm1586_vm0, %v2935_v6 }
 0x945   : > { %v2967_v48 = vpop.f32.mrf.mxu2  ;;  %v2996_v51 = vpop.f32.mrf.mxu3 }
 0x946   : > { %4791 = vmatpush.xpose.msk.msrb.mxu2 %vm1586_vm0, %v2967_v48  ;;  %4799 = vmatpush.xpose.msk.msra.mxu3 %vm1586_vm0, %v2996_v51  ;;  %v3016_v33 = vpop.f32.mrf.mxu0  ;;  %v3045_v52 = vpop.f32.mrf.mxu1 }
 0x947   : > { %4777 = vmatpush.xpose.msk.msra.mxu0 %vm1586_vm0, %v2903_v43  ;;  %4785 = vmatpush.xpose.msk.msra.mxu1 %vm1586_vm0, %v2932_v28 }
 0x94a   : > { %4792 = vmatpush.xpose.msk.msrb.mxu2 %vm1586_vm0, %v2964_v41  ;;  %4800 = vmatpush.xpose.msk.msra.mxu3 %vm1586_vm0, %v2993_v42 }
 0x94b   : > { %4778 = vmatpush.xpose.msk.msra.mxu0 %vm1586_vm0, %v2900_v30  ;;  %4786 = vmatpush.xpose.msk.msra.mxu1 %vm1586_vm0, %v2929_v26 }
 0x94d   : > { %v3074_v44 = vpop.f32.mrf.mxu2  ;;  %v3103_v50 = vpop.f32.mrf.mxu3 }
 0x94e   : > { %4793 = vmatpush.xpose.msk.msrb.mxu2 %vm1586_vm0, %v2961_v34  ;;  %4801 = vmatpush.xpose.msk.msra.mxu3 %vm1586_vm0, %v2990_v36  ;;  %v3019_v47 = vpop.f32.mrf.mxu0  ;;  %v3048_v32 = vpop.f32.mrf.mxu1  ;;  %v5147_v34 = vld [vmem:[%s6807_s29 + $0x18] sm:$0xff] }
 0x94f   : > { %4779 = vmatmul.msk.f32.vlgmr.msra.gmra.mxu0 %vm1586_vm0, %v2784_v11  ;;  %4787 = vmatmul.msk.f32.vlgmr.msra.gmra.mxu1 %vm1586_vm0, %v2813_v14  ;;  %v5145_v14 = vld [vmem:[%s6807_s29 + $0x8] sm:$0xff] }
 0x952   : > { %4794 = vmatpush.xpose.msk.msrb.mxu2 %vm1586_vm0, %v2958_v29  ;;  %4802 = vmatpush.xpose.msk.msra.mxu3 %vm1586_vm0, %v2987_v27 }
 0x955   : > { %v3077_v55 = vpop.f32.mrf.mxu2  ;;  %v3106_v17 = vpop.f32.mrf.mxu3  ;;  %4795 = vmatmul.msk.f32.vlgmr.msrb.gmra.mxu2 %vm1586_vm0, %v2842_v15  ;;  %4803 = vmatmul.msk.f32.vlgmr.msra.gmra.mxu3 %vm1586_vm0, %v2871_v18 }
 0x956   : > { %v3022_v57 = vpop.f32.mrf.mxu0  ;;  %v3051_v38 = vpop.f32.mrf.mxu1 }
 0x957   : > { %4780 = vmatmul.msk.f32.gmra.mxu0 %vm1586_vm0, %v2787_v40  ;;  %4788 = vmatmul.msk.f32.gmra.mxu1 %vm1586_vm0, %v2816_v2 }
 0x95d   : > { %v3080_v59 = vpop.f32.mrf.mxu2  ;;  %v3109_v12 = vpop.f32.mrf.mxu3  ;;  %4796 = vmatmul.msk.f32.gmra.mxu2 %vm1586_vm0, %v2845_v22  ;;  %4804 = vmatmul.msk.f32.gmra.mxu3 %vm1586_vm0, %v2874_v23 }
 0x95e   : > { %v3025_v46 = vpop.f32.mrf.mxu0  ;;  %v3054_v54 = vpop.f32.mrf.mxu1 }
 0x95f   : > { %4781 = vmatmul.msk.f32.gmra.mxu0 %vm1586_vm0, %v2790_v63  ;;  %4789 = vmatmul.msk.f32.gmra.mxu1 %vm1586_vm0, %v2819_v21 }
 0x960   : > { %3527 = vmatpush.msrb.mxu0 %v3025_v46  ;;  %3568 = vmatpush.msrb.mxu1 %v3054_v54 }
 0x962   : > { %3528 = vmatpush.msrb.mxu0 %v3022_v57  ;;  %3569 = vmatpush.msrb.mxu1 %v3051_v38 }
 0x964   : > { %3529 = vmatpush.msrb.mxu0 %v3019_v47  ;;  %3570 = vmatpush.msrb.mxu1 %v3048_v32 }
 0x965   : > { %v3083_v62 = vpop.f32.mrf.mxu2  ;;  %v3112_v37 = vpop.f32.mrf.mxu3  ;;  %4797 = vmatmul.msk.f32.gmra.mxu2 %vm1586_vm0, %v6314_v19  ;;  %4805 = vmatmul.msk.f32.gmra.mxu3 %vm1586_vm0, %v6316_v0 }
 0x966   : > { %3530 = vmatpush.msrb.mxu0 %v3016_v33  ;;  %3571 = vmatpush.msrb.mxu1 %v3045_v52 }
 0x967   : > { %3609 = vmatpush.msra.mxu2 %v3083_v62  ;;  %3650 = vmatpush.msrb.mxu3 %v3112_v37 }
 0x968   : > { %4782 = vmatmul.msk.f32.gmra.mxu0 %vm1586_vm0, %v6318_v1  ;;  %4790 = vmatmul.msk.f32.gmra.mxu1 %vm1586_vm0, %v6320_v24  ;;  %v5146_v24 = vld [vmem:[%s6807_s29 + $0x10] sm:$0xff] }
 0x969   : > { %3610 = vmatpush.msra.mxu2 %v3080_v59  ;;  %3651 = vmatpush.msrb.mxu3 %v3109_v12 }
 0x96b   : > { %3611 = vmatpush.msra.mxu2 %v3077_v55  ;;  %3652 = vmatpush.msrb.mxu3 %v3106_v17 }
 0x96d   : > { %3612 = vmatpush.msra.mxu2 %v3074_v44  ;;  %3653 = vmatpush.msrb.mxu3 %v3103_v50 }
 0x96e   : > { %4798 = vmatmul.msk.f32.gmra.mxu2 %vm1586_vm0, %v6322_v31  ;;  %4806 = vmatmul.msk.f32.gmra.mxu3 %vm1586_vm0, %v6324_v35 }
 0x9cc   : > { %v3209_v3 = vpop.f32.mrf.mxu1  ;;  %v3156_v58 = vpop.f32.mrf.mxu0 }
 0x9cd   : > { %v6367_v5 = vadd.f32 %v5144_v4, %v3209_v3  ;;  %v6384_v18 = vadd.f32 %v5144_v4, %v3156_v58 }
 0x9cf   : > { %v3339_v56 = vsel %vm1068_vm2, %v6367_v5, -inf  ;;  %v3327_v21 = vsel %vm1068_vm2, %v6384_v18, -inf }
 0x9d0   : > { %3340 = vmax.xlane.f32.xlu0 %v3339_v56 }
 0x9d4   : > { %v3159_v11 = vpop.f32.mrf.mxu0  ;;  %v3212_v1 = vpop.f32.mrf.mxu1 }
 0x9d5   : > { %v6382_v15 = vadd.f32 %v5145_v14, %v3159_v11  ;;  %v6405_v29 = vadd.f32 %v5145_v14, %v3212_v1 }
 0x9d7   : > { %v3330_v63 = vsel %vm1068_vm2, %v6382_v15, -inf  ;;  %v3342_v6 = vsel %vm1068_vm2, %v6405_v29, -inf }
 0x9d8   : > { %v3262_v7 = vpop.f32.mrf.mxu2  ;;  %v3315_v20 = vpop.f32.mrf.mxu3 }
 0x9d9   : > { %v6371_v61 = vadd.f32 %v5144_v4, %v3262_v7  ;;  %v6373_v10 = vadd.f32 %v5144_v4, %v3315_v20 }
 0x9db   : > { %v3351_v9 = vsel %vm1068_vm2, %v6371_v61, -inf  ;;  %v3363_v13 = vsel %vm1068_vm2, %v6373_v10, -inf }
 0x9dc   : > { %3352 = vmax.xlane.f32.xlu2 %v3351_v9  ;;  %3364 = vmax.xlane.f32.xlu0 %v3363_v13  ;;  %v3162_v28 = vpop.f32.mrf.mxu0  ;;  %v3215_v39 = vpop.f32.mrf.mxu1 }
 0x9dd   : > { %v6420_v16 = vadd.f32 %v5146_v24, %v3162_v28  ;;  %v6422_v48 = vadd.f32 %v5146_v24, %v3215_v39 }
 0x9df   : > { %v3333_v33 = vsel %vm1068_vm2, %v6420_v16, -inf  ;;  %v3345_v50 = vsel %vm1068_vm2, %v6422_v48, -inf }
 0x9e0   : > { %v3265_v40 = vpop.f32.mrf.mxu2  ;;  %v3318_v22 = vpop.f32.mrf.mxu3 }
 0x9e1   : > { %v6386_v2 = vadd.f32 %v5145_v14, %v3265_v40  ;;  %v6394_v19 = vadd.f32 %v5145_v14, %v3318_v22 }
 0x9e3   : > { %v3354_v23 = vsel %vm1068_vm2, %v6386_v2, -inf  ;;  %v3366_v30 = vsel %vm1068_vm2, %v6394_v19, -inf }
 0x9e4   : > { %3355 = vmax.xlane.f32.xlu1 %v3354_v23  ;;  %3331 = vmax.xlane.f32.xlu0 %v3330_v63 }
 0x9e5   : > { %3328 = vmax.xlane.f32.xlu2 %v3327_v21  ;;  %v3165_v52 = vpop.f32.mrf.mxu0  ;;  %v3218_v47 = vpop.f32.mrf.mxu1 }
 0x9e6   : > { %v6432_v32 = vadd.f32 %v5147_v34, %v3165_v52  ;;  %v6434_v55 = vadd.f32 %v5147_v34, %v3218_v47 }
 0x9e8   : > { %v3268_v0 = vpop.f32.mrf.mxu2  ;;  %v3321_v35 = vpop.f32.mrf.mxu3  ;;  %v3336_v17 = vsel %vm1068_vm2, %v6432_v32, -inf  ;;  %v3348_v57 = vsel %vm1068_vm2, %v6434_v55, -inf }
 0x9e9   : > { %v6399_v31 = vadd.f32 %v5146_v24, %v3268_v0  ;;  %v6407_v27 = vadd.f32 %v5146_v24, %v3321_v35 }
 0x9eb   : > { %v3357_v26 = vsel %vm1068_vm2, %v6399_v31, -inf  ;;  %v3369_v42 = vsel %vm1068_vm2, %v6407_v27, -inf }
 0x9ec   : > { %3367 = vmax.xlane.f32.xlu1 %v3366_v30 }
 0x9ed   : > { %3358 = vmax.xlane.f32.xlu2 %v3357_v26 }
 0x9f1   : > { %v3271_v43 = vpop.f32.mrf.mxu2  ;;  %v3324_v45 = vpop.f32.mrf.mxu3 }
 0x9f2   : > { %v6412_v36 = vadd.f32 %v5147_v34, %v3271_v43  ;;  %v6424_v51 = vadd.f32 %v5147_v34, %v3324_v45 }
 0x9f4   : > { %3343 = vmax.xlane.f32.xlu1 %v3342_v6  ;;  %v3360_v41 = vsel %vm1068_vm2, %v6412_v36, -inf  ;;  %v3372_v44 = vsel %vm1068_vm2, %v6424_v51, -inf }
 0x9f5   : > { %3361 = vmax.xlane.f32.xlu0 %v3360_v41  ;;  %3370 = vmax.xlane.f32.xlu2 %v3369_v42 }
 0x9fc   : > { %3334 = vmax.xlane.f32.xlu1 %v3333_v33 }
 0x9fd   : > { %3373 = vmax.xlane.f32.xlu0 %v3372_v44  ;;  %3346 = vmax.xlane.f32.xlu2 %v3345_v50 }
 0xa04   : > { %3337 = vmax.xlane.f32.xlu1 %v3336_v17 }
 0xa05   : > { %3349 = vmax.xlane.f32.xlu2 %v3348_v57 }
 0xa43   : > { %v3341_v38 = vpop.xlane.xlu0 %3340 }
 0xa44   : > { %v3379_v59 = vsub.f32 %v6367_v5, %v3341_v38 }
 0xa46   : > { %v3399_v12 = vmul.f32 1.442695, %v3379_v59 }
 0xa48   : > { %5062 = vpow2.f32 %v3399_v12 }
 0xa4e   : > { %v6441_v46 = vpop.eup %5062 }
 0xa4f   : > { %v3353_v54 = vpop.xlane.xlu2 %3352  ;;  %v3365_v62 = vpop.xlane.xlu0 %3364  ;;  %v3435_v37 = vsel %vm1068_vm2, %v6441_v46, 0.0 }
 0xa50   : > { %v3383_v3 = vsub.f32 %v6371_v61, %v3353_v54  ;;  %v3387_v4 = vsub.f32 %v6373_v10, %v3365_v62  ;;  %3436 = vadd.xlane.f32.xlu1 %v3435_v37 }
 0xa52   : > { %v3407_v56 = vmul.f32 1.442695, %v3383_v3  ;;  %v3415_v58 = vmul.f32 1.442695, %v3387_v4 }
 0xa54   : > { %5064 = vpow2.f32 %v3407_v56 }
 0xa55   : > { %5066 = vpow2.f32 %v3415_v58 }
 0xa57   : > { %v3356_v7 = vpop.xlane.xlu1 %3355  ;;  %v3332_v5 = vpop.xlane.xlu0 %3331 }
 0xa58   : > { %v3384_v20 = vsub.f32 %v6386_v2, %v3356_v7  ;;  %v3376_v9 = vsub.f32 %v6382_v15, %v3332_v5  ;;  %v3329_v13 = vpop.xlane.xlu2 %3328 }
 0xa59   : > { %v3375_v11 = vsub.f32 %v6384_v18, %v3329_v13 }
 0xa5a   : > { %v6450_v14 = vpop.eup %5064  ;;  %v3409_v40 = vmul.f32 1.442695, %v3384_v20  ;;  %v3393_v61 = vmul.f32 1.442695, %v3376_v9 }
 0xa5b   : > { %v6452_v22 = vpop.eup %5066  ;;  %v3391_v10 = vmul.f32 1.442695, %v3375_v11  ;;  %v3447_v23 = vsel %vm1068_vm2, %v6450_v14, 0.0 }
 0xa5c   : > { %5068 = vpow2.f32 %v3409_v40  ;;  %v3459_v63 = vsel %vm1068_vm2, %v6452_v22, 0.0  ;;  %3448 = vadd.xlane.f32.xlu0 %v3447_v23 }
 0xa5d   : > { %5070 = vpow2.f32 %v3393_v61  ;;  %3460 = vadd.xlane.f32.xlu1 %v3459_v63 }
 0xa5e   : > { %5072 = vpow2.f32 %v3391_v10 }
 0xa5f   : > { %v3368_v15 = vpop.xlane.xlu1 %3367 }
 0xa60   : > { %v3388_v18 = vsub.f32 %v6394_v19, %v3368_v15  ;;  %v3359_v2 = vpop.xlane.xlu2 %3358 }
 0xa61   : > { %v3385_v21 = vsub.f32 %v6399_v31, %v3359_v2 }
 0xa62   : > { %v6460_v0 = vpop.eup %5068  ;;  %v3417_v1 = vmul.f32 1.442695, %v3388_v18 }
 0xa63   : > { %v6462_v24 = vpop.eup %5070  ;;  %v3411_v35 = vmul.f32 1.442695, %v3385_v21  ;;  %v3450_v30 = vsel %vm1068_vm2, %v6460_v0, 0.0 }
 0xa64   : > { %v6466_v26 = vpop.eup %5072  ;;  %5074 = vpow2.f32 %v3417_v1  ;;  %v3426_v43 = vsel %vm1068_vm2, %v6462_v24, 0.0  ;;  %3451 = vadd.xlane.f32.xlu2 %v3450_v30 }
 0xa65   : > { %5076 = vpow2.f32 %v3411_v35  ;;  %3427 = vadd.xlane.f32.xlu1 %v3426_v43  ;;  %v3423_v19 = vsel %vm1068_vm2, %v6466_v26, 0.0 }
 0xa66   : > { %3424 = vadd.xlane.f32.xlu0 %v3423_v19 }
 0xa67   : > { %v3344_v31 = vpop.xlane.xlu1 %3343 }
 0xa68   : > { %v3380_v28 = vsub.f32 %v6405_v29, %v3344_v31  ;;  %v3362_v34 = vpop.xlane.xlu0 %3361  ;;  %v3371_v39 = vpop.xlane.xlu2 %3370 }
 0xa69   : > { %v3386_v6 = vsub.f32 %v6412_v36, %v3362_v34  ;;  %v3389_v41 = vsub.f32 %v6407_v27, %v3371_v39 }
 0xa6a   : > { %v6475_v42 = vpop.eup %5074  ;;  %v3401_v45 = vmul.f32 1.442695, %v3380_v28 }
 0xa6b   : > { %v6477_v33 = vpop.eup %5076  ;;  %v3413_v52 = vmul.f32 1.442695, %v3386_v6  ;;  %v3419_v44 = vmul.f32 1.442695, %v3389_v41  ;;  %v3462_v50 = vsel %vm1068_vm2, %v6475_v42, 0.0 }
 0xa6c   : > { %5078 = vpow2.f32 %v3401_v45  ;;  %3463 = vadd.xlane.f32.xlu2 %v3462_v50  ;;  %v3453_v29 = vsel %vm1068_vm2, %v6477_v33, 0.0 }
 0xa6d   : > { %5080 = vpow2.f32 %v3413_v52 }
 0xa6e   : > { %5082 = vpow2.f32 %v3419_v44  ;;  %3454 = vadd.xlane.f32.xlu0 %v3453_v29 }
 0xa6f   : > { %v3335_v36 = vpop.xlane.xlu1 %3334 }
 0xa70   : > { %v3377_v27 = vsub.f32 %v6420_v16, %v3335_v36  ;;  %v3374_v47 = vpop.xlane.xlu0 %3373  ;;  %v3347_v17 = vpop.xlane.xlu2 %3346 }
 0xa71   : > { %v3390_v57 = vsub.f32 %v6424_v51, %v3374_v47  ;;  %v3381_v38 = vsub.f32 %v6422_v48, %v3347_v17 }
 0xa72   : > { %v6486_v59 = vpop.eup %5078  ;;  %v3395_v12 = vmul.f32 1.442695, %v3377_v27 }
 0xa73   : > { %v6488_v54 = vpop.eup %5080  ;;  %v3421_v62 = vmul.f32 1.442695, %v3390_v57  ;;  %v3403_v37 = vmul.f32 1.442695, %v3381_v38  ;;  %v3438_v3 = vsel %vm1068_vm2, %v6486_v59, 0.0 }
 0xa74   : > { %v6492_v4 = vpop.eup %5082  ;;  %5084 = vpow2.f32 %v3395_v12  ;;  %v3456_v16 = vsel %vm1068_vm2, %v6488_v54, 0.0  ;;  %3439 = vadd.xlane.f32.xlu2 %v3438_v3 }
 0xa75   : > { %5086 = vpow2.f32 %v3421_v62  ;;  %3457 = vadd.xlane.f32.xlu1 %v3456_v16  ;;  %v3465_v48 = vsel %vm1068_vm2, %v6492_v4, 0.0 }
 0xa76   : > { %5088 = vpow2.f32 %v3403_v37  ;;  %3466 = vadd.xlane.f32.xlu0 %v3465_v48 }
 0xa77   : > { %v3338_v51 = vpop.xlane.xlu1 %3337 }
 0xa78   : > { %v3378_v56 = vsub.f32 %v6432_v32, %v3338_v51  ;;  %v3350_v58 = vpop.xlane.xlu2 %3349 }
 0xa79   : > { %v3382_v7 = vsub.f32 %v6434_v55, %v3350_v58 }
 0xa7a   : > { %v6500_v5 = vpop.eup %5084  ;;  %v3397_v20 = vmul.f32 1.442695, %v3378_v56 }
 0xa7b   : > { %v6502_v9 = vpop.eup %5086  ;;  %v3405_v13 = vmul.f32 1.442695, %v3382_v7  ;;  %v3429_v11 = vsel %vm1068_vm2, %v6500_v5, 0.0 }
 0xa7c   : > { %v6506_v40 = vpop.eup %5088  ;;  %5090 = vpow2.f32 %v3397_v20  ;;  %v3468_v61 = vsel %vm1068_vm2, %v6502_v9, 0.0  ;;  %3430 = vadd.xlane.f32.xlu2 %v3429_v11  ;;  %v4824_v20 = vld [vmem:[%s5905_s4 + $0x28] sm:$0xff]  ;;  %v4823_v11 = vld [vmem:[%s5905_s4 + $0x20] sm:$0xff] }
 0xa7d   : > { %5092 = vpow2.f32 %v3405_v13  ;;  %3469 = vadd.xlane.f32.xlu1 %v3468_v61  ;;  %v3441_v32 = vsel %vm1068_vm2, %v6506_v40, 0.0  ;;  %3740 = vmatpush.msra.mxu1 %v4824_v20  ;;  %v4826_v13 = vld [vmem:[%s5905_s4 + $0x38] sm:$0xff] }
 0xa7e   : > { %3442 = vadd.xlane.f32.xlu0 %v3441_v32  ;;  %3822 = vmatpush.msra.mxu3 %v4826_v13 }
 0xa7f   : > { %3699 = vmatpush.msra.mxu0 %v4823_v11 }
 0xa82   : > { %v6512_v55 = vpop.eup %5090 }
 0xa83   : > { %v6514_v10 = vpop.eup %5092  ;;  %v3432_v23 = vsel %vm1068_vm2, %v6512_v55, 0.0 }
 0xa84   : > { %3433 = vadd.xlane.f32.xlu2 %v3432_v23  ;;  %v3444_v63 = vsel %vm1068_vm2, %v6514_v10, 0.0 }
 0xa86   : > { %3445 = vadd.xlane.f32.xlu0 %v3444_v63 }
 0xac3   : > { %v3437_v15 = vpop.xlane.xlu1 %3436 }
 0xac4   : > { %5094 = vrcp.f32 %v3437_v15 }
 0xaca   : > { %v5095_v18 = vpop.eup %5094 }
 0xacb   : > { %v3491_v2 = vmul.f32 %v5095_v18, %v6441_v46 }
 0xacd   : > { %4811 = vmatmul.msk.f32.vlgmr.msrb.gmra.mxu1 %vm1068_vm2, %v3491_v2 }
 0xacf   : > { %v3449_v21 = vpop.xlane.xlu0 %3448 }
 0xad0   : > { %v3461_v1 = vpop.xlane.xlu1 %3460  ;;  %5096 = vrcp.f32 %v3449_v21 }
 0xad1   : > { %5098 = vrcp.f32 %v3461_v1 }
 0xad6   : > { %v5097_v35 = vpop.eup %5096 }
 0xad7   : > { %v5099_v30 = vpop.eup %5098  ;;  %v3495_v43 = vmul.f32 %v5097_v35, %v6450_v14  ;;  %v3452_v19 = vpop.xlane.xlu2 %3451 }
 0xad8   : > { %v3499_v31 = vmul.f32 %v5099_v30, %v6452_v22  ;;  %5100 = vrcp.f32 %v3452_v19  ;;  %v3428_v46 = vpop.xlane.xlu1 %3427 }
 0xad9   : > { %v3425_v28 = vpop.xlane.xlu0 %3424  ;;  %4815 = vmatmul.msk.f32.vlgmr.msra.gmra.mxu2 %vm1068_vm2, %v3495_v43 }
 0xada   : > { %5102 = vrcp.f32 %v3425_v28  ;;  %4819 = vmatmul.msk.f32.vlgmr.msrb.gmra.mxu3 %vm1068_vm2, %v3499_v31 }
 0xadb   : > { %5104 = vrcp.f32 %v3428_v46 }
 0xade   : > { %v5101_v34 = vpop.eup %5100 }
 0xadf   : > { %v3464_v39 = vpop.xlane.xlu2 %3463  ;;  %v3496_v6 = vmul.f32 %v5101_v34, %v6460_v0 }
 0xae0   : > { %v5103_v41 = vpop.eup %5102  ;;  %5106 = vrcp.f32 %v3464_v39 }
 0xae1   : > { %v3487_v14 = vmul.f32 %v5103_v41, %v6466_v26  ;;  %v3455_v45 = vpop.xlane.xlu0 %3454  ;;  %4816 = vmatmul.msk.f32.gmra.mxu2 %vm1068_vm2, %v3496_v6  ;;  %v5105_v22 = vpop.eup %5104 }
 0xae2   : > { %5108 = vrcp.f32 %v3455_v45  ;;  %v3488_v27 = vmul.f32 %v5105_v22, %v6462_v24 }
 0xae3   : > { %4807 = vmatmul.msk.f32.vlgmr.msrb.gmra.mxu0 %vm1068_vm2, %v3487_v14 }
 0xae6   : > { %v5107_v52 = vpop.eup %5106 }
 0xae7   : > { %v3440_v44 = vpop.xlane.xlu2 %3439  ;;  %v3500_v50 = vmul.f32 %v5107_v52, %v6475_v42 }
 0xae8   : > { %v5109_v29 = vpop.eup %5108  ;;  %v3458_v36 = vpop.xlane.xlu1 %3457  ;;  %5110 = vrcp.f32 %v3440_v44  ;;  %v4956_v44 = vld [vmem:[%s5946_s6 + $0x1] ss:$0 sm:$0xff] }
 0xae9   : > { %5112 = vrcp.f32 %v3458_v36  ;;  %v3467_v0 = vpop.xlane.xlu0 %3466  ;;  %v3497_v26 = vmul.f32 %v5109_v29, %v6477_v33  ;;  %4820 = vmatmul.msk.f32.gmra.mxu3 %vm1068_vm2, %v3500_v50 }
 0xaea   : > { %5114 = vrcp.f32 %v3467_v0 }
 0xaeb   : > { %4808 = vmatmul.msk.f32.gmra.mxu0 %vm1068_vm2, %v3488_v27  ;;  %4817 = vmatmul.msk.f32.gmra.mxu2 %vm1068_vm2, %v3497_v26 }
 0xaee   : > { %v5111_v47 = vpop.eup %5110 }
 0xaef   : > { %v5113_v17 = vpop.eup %5112  ;;  %v3431_v57 = vpop.xlane.xlu2 %3430  ;;  %v3492_v42 = vmul.f32 %v5111_v47, %v6486_v59 }
 0xaf0   : > { %v5115_v38 = vpop.eup %5114  ;;  %v3470_v12 = vpop.xlane.xlu1 %3469  ;;  %5116 = vrcp.f32 %v3431_v57  ;;  %v3498_v62 = vmul.f32 %v5113_v17, %v6488_v54 }
 0xaf1   : > { %5118 = vrcp.f32 %v3470_v12  ;;  %v3443_v24 = vpop.xlane.xlu0 %3442  ;;  %4812 = vmatmul.msk.f32.gmra.mxu1 %vm1068_vm2, %v3492_v42  ;;  %v3501_v33 = vmul.f32 %v5115_v38, %v6492_v4 }
 0xaf2   : > { %5120 = vrcp.f32 %v3443_v24 }
 0xaf3   : > { %4818 = vmatmul.msk.f32.gmra.mxu2 %vm1068_vm2, %v3498_v62  ;;  %4821 = vmatmul.msk.f32.gmra.mxu3 %vm1068_vm2, %v3501_v33 }
 0xaf6   : > { %v5117_v37 = vpop.eup %5116 }
 0xaf7   : > { %v5119_v3 = vpop.eup %5118  ;;  %v3434_v16 = vpop.xlane.xlu2 %3433  ;;  %v3489_v59 = vmul.f32 %v5117_v37, %v6500_v5 }
 0xaf8   : > { %v5121_v48 = vpop.eup %5120  ;;  %5122 = vrcp.f32 %v3434_v16  ;;  %v3502_v54 = vmul.f32 %v5119_v3, %v6502_v9  ;;  %v4825_v9 = vld [vmem:[%s5905_s4 + $0x30] sm:$0xff]  ;;  %s992_s4 = scalar_lea.vmem %s6761_s17, %s5396_s24 }
 0xaf9   : > { %v3446_v51 = vpop.xlane.xlu0 %3445  ;;  %4809 = vmatmul.msk.f32.gmra.mxu0 %vm1068_vm2, %v3489_v59  ;;  %v3493_v4 = vmul.f32 %v5121_v48, %v6506_v40  ;;  %3781 = vmatpush.msrb.mxu2 %v4825_v9 }
 0xafa   : > { %5124 = vrcp.f32 %v3446_v51 }
 0xafb   : > { %4813 = vmatmul.msk.f32.gmra.mxu1 %vm1068_vm2, %v3493_v4  ;;  %4822 = vmatmul.msk.f32.gmra.mxu3 %vm1068_vm2, %v3502_v54 }
 0xafe   : > { %v5123_v56 = vpop.eup %5122 }
 0xaff   : > { %v3490_v58 = vmul.f32 %v5123_v56, %v6512_v55 }
 0xb00   : > { %v5125_v7 = vpop.eup %5124 }
 0xb01   : > { %4810 = vmatmul.msk.f32.gmra.mxu0 %vm1068_vm2, %v3490_v58  ;;  %v3494_v5 = vmul.f32 %v5125_v7, %v6514_v10 }
 0xb03   : > { %4814 = vmatmul.msk.f32.gmra.mxu1 %vm1068_vm2, %v3494_v5 }
 0xb4a   : > { %v3573_v40 = vpop.f32.mrf.mxu1 }
 0xb4b   : > { %4831 = vmatmul.msk.f32.vlgmr.msra.gmra.mxu1 %vm1586_vm0, %v3573_v40 }
 0xb5c   : > { %v3614_v61 = vpop.f32.mrf.mxu2 }
 0xb5d   : > { %v3655_v32 = vpop.f32.mrf.mxu3  ;;  %4835 = vmatmul.msk.f32.vlgmr.msrb.gmra.mxu2 %vm1586_vm0, %v3614_v61 }
 0xb5e   : > { %4839 = vmatmul.msk.f32.vlgmr.msra.gmra.mxu3 %vm1586_vm0, %v3655_v32 }
 0xb60   : > { %v3532_v55 = vpop.f32.mrf.mxu0 }
 0xb61   : > { %4827 = vmatmul.msk.f32.vlgmr.msra.gmra.mxu0 %vm1586_vm0, %v3532_v55 }
 0xb64   : > { %v3617_v10 = vpop.f32.mrf.mxu2 }
 0xb65   : > { %4836 = vmatmul.msk.f32.gmra.mxu2 %vm1586_vm0, %v3617_v10 }
 0xb68   : > { %v3535_v23 = vpop.f32.mrf.mxu0 }
 0xb69   : > { %4828 = vmatmul.msk.f32.gmra.mxu0 %vm1586_vm0, %v3535_v23 }
 0xb6c   : > { %v3658_v63 = vpop.f32.mrf.mxu3 }
 0xb6d   : > { %4840 = vmatmul.msk.f32.gmra.mxu3 %vm1586_vm0, %v3658_v63 }
 0xb6e   : > { %v3620_v15 = vpop.f32.mrf.mxu2  ;;  %v3576_v18 = vpop.f32.mrf.mxu1 }
 0xb6f   : > { %4837 = vmatmul.msk.f32.gmra.mxu2 %vm1586_vm0, %v3620_v15  ;;  %4832 = vmatmul.msk.f32.gmra.mxu1 %vm1586_vm0, %v3576_v18 }
 0xb76   : > { %v3623_v2 = vpop.f32.mrf.mxu2  ;;  %v3661_v21 = vpop.f32.mrf.mxu3 }
 0xb77   : > { %4838 = vmatmul.msk.f32.gmra.mxu2 %vm1586_vm0, %v3623_v2  ;;  %4841 = vmatmul.msk.f32.gmra.mxu3 %vm1586_vm0, %v3661_v21  ;;  %v3538_v1 = vpop.f32.mrf.mxu0 }
 0xb78   : > { %v3579_v35 = vpop.f32.mrf.mxu1  ;;  %4829 = vmatmul.msk.f32.gmra.mxu0 %vm1586_vm0, %v3538_v1 }
 0xb79   : > { %4833 = vmatmul.msk.f32.gmra.mxu1 %vm1586_vm0, %v3579_v35 }
 0xb7e   : > { %v3664_v30 = vpop.f32.mrf.mxu3 }
 0xb7f   : > { %4842 = vmatmul.msk.f32.gmra.mxu3 %vm1586_vm0, %v3664_v30  ;;  %v3541_v43 = vpop.f32.mrf.mxu0 }
 0xb80   : > { %v3582_v19 = vpop.f32.mrf.mxu1  ;;  %4830 = vmatmul.msk.f32.gmra.mxu0 %vm1586_vm0, %v3541_v43 }
 0xb81   : > { %4834 = vmatmul.msk.f32.gmra.mxu1 %vm1586_vm0, %v3582_v19 }
 0xbc8   : > { %v3742_v31 = vpop.f32.mrf.mxu1 }
 0xbc9   : > { %v3837_v46 = vsel %vm1068_vm2, %v3742_v31, 0.0 }
 0xbde   : > { %v3701_v28 = vpop.f32.mrf.mxu0 }
 0xbdf   : > { %v3836_v34 = vsel %vm1068_vm2, %v3701_v28, 0.0 }
 0xbe0   : > { %v3838_v39 = vadd.f32 %v3837_v46, %v3836_v34  ;;  %v3783_v6 = vpop.f32.mrf.mxu2 }
 0xbe1   : > { %v3839_v41 = vsel %vm1068_vm2, %v3783_v6, 0.0  ;;  %v3824_v14 = vpop.f32.mrf.mxu3 }
 0xbe2   : > { %v3840_v45 = vadd.f32 %v3839_v41, %v3838_v39  ;;  %v3841_v22 = vsel %vm1068_vm2, %v3824_v14, 0.0 }
 0xbe4   : > { %v3842_v52 = vadd.f32 %v3841_v22, %v3840_v45 }
 0xbe6   : > { %v3864_v50 = vadd.f32 %v3842_v52, %v6087_v60  ;;  %v3704_v36 = vpop.f32.mrf.mxu0 }
 0xbe7   : > { %v3843_v47 = vsel %vm1068_vm2, %v3704_v36, 0.0 }
 0xbe8   : > { %v6578_v29 = vadd.f32 %v4956_v44, %v3864_v50  ;;  %v3786_v0 = vpop.f32.mrf.mxu2 }
 0xbe9   : > { %v3846_v42 = vsel %vm1068_vm2, %v3786_v0, 0.0  ;;  %v4849_v0 = vld [vmem:[%s6041_s28 + $0x38] sm:$0xff] }
 0xbea   : > { %v3881_v27 = vsel %vm1068_vm2, %v6578_v29, 0.0  ;;  %4017 = vmatpush.msrb.mxu0 %v4849_v0  ;;  %v4862_v0 = vld [vmem:[%s6070_s14 + $0x78] sm:$0xff] }
 0xbeb   : > { %3882 = vadd.xlane.f32.xlu1 %v3881_v27  ;;  %v4848_v27 = vld [vmem:[%s6041_s28 + $0x30] sm:$0xff]  ;;  %4099 = vmatpush.msrb.mxu1 %v4862_v0 }
 0xbec   : > { %v3745_v26 = vpop.f32.mrf.mxu1  ;;  %4018 = vmatpush.msrb.mxu0 %v4848_v27  ;;  %v4861_v27 = vld [vmem:[%s6070_s14 + $0x70] sm:$0xff] }
 0xbed   : > { %v3844_v17 = vsel %vm1068_vm2, %v3745_v26, 0.0  ;;  %v4847_v26 = vld [vmem:[%s6041_s28 + $0x28] sm:$0xff]  ;;  %4100 = vmatpush.msrb.mxu1 %v4861_v27 }
 0xbee   : > { %v3845_v57 = vadd.f32 %v3844_v17, %v3843_v47  ;;  %4019 = vmatpush.msrb.mxu0 %v4847_v26  ;;  %v4846_v47 = vld [vmem:[%s6041_s28 + $0x20] sm:$0xff]  ;;  %v4860_v26 = vld [vmem:[%s6070_s14 + $0x68] sm:$0xff]  ;;  %s4871_s28 = sshll.u32 %s5218_s27, 1 }
 0xbef   : > { %4101 = vmatpush.msrb.mxu1 %v4860_v26 }
 0xbf0   : > { %v3827_v38 = vpop.f32.mrf.mxu3  ;;  %v3847_v12 = vadd.f32 %v3846_v42, %v3845_v57  ;;  %4020 = vmatpush.msrb.mxu0 %v4846_v47  ;;  %v4859_v47 = vld [vmem:[%s6070_s14 + $0x60] sm:$0xff] }
 0xbf1   : > { %v3848_v60 = vsel %vm1068_vm2, %v3827_v38, 0.0  ;;  %4102 = vmatpush.msrb.mxu1 %v4859_v47 }
 0xbf2   : > { %v3849_v62 = vadd.f32 %v3848_v60, %v3847_v12  ;;  %v3789_v24 = vpop.f32.mrf.mxu2 }
 0xbf3   : > { %v3853_v4 = vsel %vm1068_vm2, %v3789_v24, 0.0 }
 0xbf4   : > { %v3865_v33 = vadd.f32 %v3849_v62, %v6092_v49 }
 0xbf5   : > { %v3707_v37 = vpop.f32.mrf.mxu0 }
 0xbf6   : > { %v3850_v3 = vsel %vm1068_vm2, %v3707_v37, 0.0  ;;  %v3748_v16 = vpop.f32.mrf.mxu1  ;;  %v6588_v59 = vadd.f32 %v4956_v44, %v3865_v33 }
 0xbf7   : > { %v3851_v48 = vsel %vm1068_vm2, %v3748_v16, 0.0 }
 0xbf8   : > { %v3852_v54 = vadd.f32 %v3851_v48, %v3850_v3  ;;  %v3884_v51 = vsel %vm1068_vm2, %v6588_v59, 0.0  ;;  %v4957_v48 = vld [vmem:[%s5994_s7 + $0x1] ss:$0 sm:$0xff] }
 0xbf9   : > { %3885 = vadd.xlane.f32.xlu2 %v3884_v51  ;;  %v4958_v51 = vld [vmem:[%s6000_s10 + $0x1] ss:$0 sm:$0xff]  ;;  %s915_s10 = sand.u32 1, %s5210_s25  }
 0xbfa   : > { %v3830_v56 = vpop.f32.mrf.mxu3  ;;  %v3854_v58 = vadd.f32 %v3853_v4, %v3852_v54  ;;  %v3792_v20 = vpop.f32.mrf.mxu2  ;;  %s4222_s23 = scalar_lea.sflag [#allocation3], %s915_s10 }
 0xbfb   : > { %v3855_v7 = vsel %vm1068_vm2, %v3830_v56, 0.0  ;;  %v3860_v55 = vsel %vm1068_vm2, %v3792_v20, 0.0 }
 0xbfc   : > { %v3856_v49 = vadd.f32 %v3855_v7, %v3854_v58 }
 0xbfd   : > { %v3710_v5 = vpop.f32.mrf.mxu0 }
 0xbfe   : > { %v3866_v9 = vadd.f32 %v3856_v49, %v6097_v53  ;;  %v3857_v13 = vsel %vm1068_vm2, %v3710_v5, 0.0  ;;  %v3751_v11 = vpop.f32.mrf.mxu1 }
 0xbff   : > { %v3858_v40 = vsel %vm1068_vm2, %v3751_v11, 0.0 }
 0xc00   : > { %v3859_v61 = vadd.f32 %v3858_v40, %v3857_v13  ;;  %v6598_v32 = vadd.f32 %v4956_v44, %v3866_v9 }
 0xc02   : > { %v3833_v10 = vpop.f32.mrf.mxu3  ;;  %v3861_v23 = vadd.f32 %v3860_v55, %v3859_v61  ;;  %v3887_v63 = vsel %vm1068_vm2, %v6598_v32, 0.0 }
 0xc03   : > { %v3862_v15 = vsel %vm1068_vm2, %v3833_v10, 0.0  ;;  %3888 = vadd.xlane.f32.xlu0 %v3887_v63 }
 0xc04   : > { %v3863_v18 = vadd.f32 %v3862_v15, %v3861_v23 }
 0xc06   : > { %v3867_v53 = vadd.f32 %v3863_v18, %v6102_v8 }
 0xc08   : > { %v6605_v2 = vadd.f32 %v4956_v44, %v3867_v53 }
 0xc0a   : > { %v3890_v21 = vsel %vm1068_vm2, %v6605_v2, 0.0 }
 0xc0b   : > { %3891 = vadd.xlane.f32.xlu1 %v3890_v21 }
 0xc5e   : > { %v3883_v1 = vpop.xlane.xlu1 %3882 }
 0xc5f   : > { %v3893_v35 = vmul.f32 %v3883_v1, %v5439_v25 }
 0xc61   : > { %v3897_v30 = vsub.f32 %v6578_v29, %v3893_v35 }
 0xc63   : > { %v3901_v43 = vmul.f32 %v3897_v30, %v3897_v30 }
 0xc65   : > { %v3905_v19 = vsel %vm1068_vm2, %v3901_v43, 0.0 }
 0xc66   : > { %3906 = vadd.xlane.f32.xlu2 %v3905_v19 }
 0xc6c   : > { %v3886_v31 = vpop.xlane.xlu2 %3885 }
 0xc6d   : > { %v3894_v28 = vmul.f32 %v3886_v31, %v5439_v25 }
 0xc6f   : > { %v6614_v8 = vsub.f32 %v6588_v59, %v3894_v28 }
 0xc71   : > { %v3902_v46 = vmul.f32 %v6614_v8, %v6614_v8 }
 0xc73   : > { %v3908_v34 = vsel %vm1068_vm2, %v3902_v46, 0.0 }
 0xc74   : > { %3909 = vadd.xlane.f32.xlu0 %v3908_v34 }
 0xc76   : > { %v3889_v39 = vpop.xlane.xlu0 %3888 }
 0xc77   : > { %v3895_v6 = vmul.f32 %v3889_v39, %v5439_v25 }
 0xc79   : > { %v6621_v41 = vsub.f32 %v6598_v32, %v3895_v6 }
 0xc7b   : > { %v3903_v14 = vmul.f32 %v6621_v41, %v6621_v41 }
 0xc7d   : > { %v3911_v45 = vsel %vm1068_vm2, %v3903_v14, 0.0 }
 0xc7e   : > { %3912 = vadd.xlane.f32.xlu1 %v3911_v45  ;;  %v3892_v22 = vpop.xlane.xlu1 %3891 }
 0xc7f   : > { %v3896_v52 = vmul.f32 %v3892_v22, %v5439_v25 }
 0xc81   : > { %v6628_v44 = vsub.f32 %v6605_v2, %v3896_v52 }
 0xc83   : > { %v3904_v50 = vmul.f32 %v6628_v44, %v6628_v44 }
 0xc85   : > { %v3914_v36 = vsel %vm1068_vm2, %v3904_v50, 0.0 }
 0xc86   : > { %3915 = vadd.xlane.f32.xlu2 %v3914_v36 }
 0xcd9   : > { %v3907_v17 = vpop.xlane.xlu2 %3906 }
 0xcda   : > { %v3917_v57 = vmul.f32 %v3907_v17, %v5439_v25  ;;  %v4858_v17 = vld [vmem:[%s6070_s14 + $0x58] sm:$0xff] }
 0xcdb   : > { %4103 = vmatpush.msrb.mxu1 %v4858_v17 }
 0xcdc   : > { %v3921_v42 = vadd.f32 1e-05, %v3917_v57  ;;  %v4857_v57 = vld [vmem:[%s6070_s14 + $0x50] sm:$0xff] }
 0xcdd   : > { %4104 = vmatpush.msrb.mxu1 %v4857_v57 }
 0xcde   : > { %5126 = vrsqrt.f32 %v3921_v42  ;;  %vm3931_vm13 = vweird.f32 %v3921_v42 }
 0xce4   : > { %v5127_v38 = vpop.eup %5126 }
 0xce5   : > { %v3926_v12 = vmul.f32 %v5127_v38, %v3921_v42  ;;  %vm3932_vm0 = vweird.f32 %v5127_v38  ;;  %v4855_v42 = vld [vmem:[%s6070_s14 + $0x40] sm:$0xff] }
 0xce6   : > { %vm3933_vm15 = vmor %vm3931_vm13, %vm3932_vm0 }
 0xce7   : > { %v3927_v60 = vmul.f32 %v5127_v38, %v3926_v12  ;;  %v3910_v62 = vpop.xlane.xlu0 %3909 }
 0xce8   : > { %v3918_v24 = vmul.f32 %v3910_v62, %v5439_v25 }
 0xce9   : > { %v3928_v33 = vmul.f32 0.5, %v3927_v60 }
 0xcea   : > { %v3922_v37 = vadd.f32 1e-05, %v3918_v24 }
 0xceb   : > { %v3929_v3 = vsub.f32 1.5, %v3928_v33 }
 0xcec   : > { %5128 = vrsqrt.f32 %v3922_v37  ;;  %vm3941_vm3 = vweird.f32 %v3922_v37 }
 0xced   : > { %v3930_v16 = vmul.f32 %v5127_v38, %v3929_v3 }
 0xcef   : > { %v3934_v54 = vsel %vm3933_vm15, %v5127_v38, %v3930_v16  ;;  %v4959_v38 = vld [vmem:[%s6034_s30 + $0x1] ss:$0 sm:$0xff] }
 0xcf0   : > { %v3965_v4 = vmul.f32 %v3934_v54, %v3897_v30 }
 0xcf1   : > { %v3913_v56 = vpop.xlane.xlu1 %3912 }
 0xcf2   : > { %v5129_v58 = vpop.eup %5128  ;;  %v3972_v7 = vmul.f32 %v4957_v48, %v3965_v4  ;;  %v3919_v49 = vmul.f32 %v3913_v56, %v5439_v25 }
 0xcf3   : > { %v3936_v5 = vmul.f32 %v5129_v58, %v3922_v37  ;;  %vm3942_vm1 = vweird.f32 %v5129_v58 }
 0xcf4   : > { %v3979_v20 = vadd.f32 %v4958_v51, %v3972_v7  ;;  %v3923_v9 = vadd.f32 1e-05, %v3919_v49  ;;  %vm3943_vm4 = vmor %vm3941_vm3, %vm3942_vm1 }
 0xcf5   : > { %v3937_v13 = vmul.f32 %v5129_v58, %v3936_v5 }
 0xcf6   : > { %5130 = vrsqrt.f32 %v3923_v9  ;;  %4851 = vmatmul.msk.f32.vlgmr.msrb.gmra.mxu0 %vm1068_vm2, %v3979_v20  ;;  %vm3951_vm6 = vweird.f32 %v3923_v9 }
 0xcf7   : > { %v3938_v11 = vmul.f32 0.5, %v3937_v13 }
 0xcf9   : > { %v3939_v40 = vsub.f32 1.5, %v3938_v11  ;;  %v3916_v61 = vpop.xlane.xlu2 %3915 }
 0xcfa   : > { %v3920_v55 = vmul.f32 %v3916_v61, %v5439_v25 }
 0xcfb   : > { %v3940_v10 = vmul.f32 %v5129_v58, %v3939_v40 }
 0xcfc   : > { %v5131_v23 = vpop.eup %5130  ;;  %v3924_v63 = vadd.f32 1e-05, %v3920_v55 }
 0xcfd   : > { %v3944_v15 = vsel %vm3943_vm4, %v5129_v58, %v3940_v10  ;;  %v3946_v18 = vmul.f32 %v5131_v23, %v3923_v9  ;;  %vm3952_vm5 = vweird.f32 %v5131_v23 }
 0xcfe   : > { %v3966_v53 = vmul.f32 %v3944_v15, %v6614_v8  ;;  %5132 = vrsqrt.f32 %v3924_v63  ;;  %vm3953_vm7 = vmor %vm3951_vm6, %vm3952_vm5  ;;  %vm3961_vm9 = vweird.f32 %v3924_v63 }
 0xcff   : > { %v3947_v21 = vmul.f32 %v5131_v23, %v3946_v18 }
 0xd00   : > { %v3973_v1 = vmul.f32 %v4957_v48, %v3966_v53 }
 0xd01   : > { %v3948_v35 = vmul.f32 0.5, %v3947_v21 }
 0xd02   : > { %v3980_v30 = vadd.f32 %v4958_v51, %v3973_v1 }
 0xd03   : > { %v3949_v43 = vsub.f32 1.5, %v3948_v35 }
 0xd04   : > { %v5133_v19 = vpop.eup %5132  ;;  %4852 = vmatmul.msk.f32.gmra.mxu0 %vm1068_vm2, %v3980_v30 }
 0xd05   : > { %v3950_v31 = vmul.f32 %v5131_v23, %v3949_v43  ;;  %v3956_v28 = vmul.f32 %v5133_v19, %v3924_v63  ;;  %vm3962_vm8 = vweird.f32 %v5133_v19 }
 0xd06   : > { %vm3963_vm10 = vmor %vm3961_vm9, %vm3962_vm8 }
 0xd07   : > { %v3954_v46 = vsel %vm3953_vm7, %v5131_v23, %v3950_v31  ;;  %v3957_v34 = vmul.f32 %v5133_v19, %v3956_v28 }
 0xd08   : > { %v3967_v39 = vmul.f32 %v3954_v46, %v6621_v41 }
 0xd09   : > { %v3958_v8 = vmul.f32 0.5, %v3957_v34 }
 0xd0a   : > { %v3974_v6 = vmul.f32 %v4957_v48, %v3967_v39 }
 0xd0b   : > { %v3959_v14 = vsub.f32 1.5, %v3958_v8 }
 0xd0c   : > { %v3981_v45 = vadd.f32 %v4958_v51, %v3974_v6 }
 0xd0d   : > { %v3960_v22 = vmul.f32 %v5133_v19, %v3959_v14 }
 0xd0e   : > { %4853 = vmatmul.msk.f32.gmra.mxu0 %vm1068_vm2, %v3981_v45 }
 0xd0f   : > { %v3964_v52 = vsel %vm3963_vm10, %v5133_v19, %v3960_v22 }
 0xd10   : > { %v3968_v50 = vmul.f32 %v3964_v52, %v6628_v44  ;;  %v4856_v44 = vld [vmem:[%s6070_s14 + $0x48] sm:$0xff]  ;;  %s6815_s14 = sld [smem:[#allocation14_spill]] }
 0xd11   : > { %4105 = vmatpush.msrb.mxu1 %v4856_v44 }
 0xd12   : > { %v3975_v41 = vmul.f32 %v4957_v48, %v3968_v50 }
 0xd13   : > { %4106 = vmatpush.msrb.mxu1 %v4855_v42 }
 0xd14   : > { %v3982_v36 = vadd.f32 %v4958_v51, %v3975_v41  ;;  %v4960_v41 = vld [vmem:[%s6064_s8 + $0x1] ss:$0 sm:$0xff]  ;;  %s995_s8 = scalar_lea.vmem %s6762_s18, %s5396_s24  ;;  %s5168_s24 = scalar_lea.hbm %s6765_s21, 4 }
 0xd16   : > { %4854 = vmatmul.msk.f32.gmra.mxu0 %vm1068_vm2, %v3982_v36  ;;  %v1012_v42 = vld [vmem:[%s6815_s14] sm:$0x3]  ;;  %s4527_s14 = sshll.u32 %s915_s10, 1 }
 0xd17   : > { %s917_s26 = scalar_lea.vmem [#allocation2], %s4527_s14 }
 0xd73   : > { %v4022_v12 = vpop.f32.mrf.mxu0 }
 0xd74   : > { %v4023_v60 = vadd.f32 %v4959_v38, %v4022_v12 }
 0xd76   : > { %v4034_v62 = vmul.f32 %v4023_v60, %v4023_v60 }
 0xd78   : > { %v4038_v24 = vmul.f32 %v4034_v62, %v4023_v60  ;;  %v4192_v62 = vld [vmem:[%s1000_s1 + $0x18] sm:$0xff] }
 0xd79   : > { %4212 = vmatpush.msrb.mxu3 %v4192_v62 }
 0xd7a   : > { %v4042_v33 = vmul.f32 0.044715, %v4038_v24  ;;  %v4191_v24 = vld [vmem:[%s1000_s1 + $0x10] sm:$0xff] }
 0xd7b   : > { %4213 = vmatpush.msrb.mxu3 %v4191_v24 }
 0xd7c   : > { %v4046_v37 = vadd.f32 %v4042_v33, %v4023_v60  ;;  %v4190_v33 = vld [vmem:[%s1000_s1 + $0x8] sm:$0xff] }
 0xd7d   : > { %4214 = vmatpush.msrb.mxu3 %v4190_v33 }
 0xd7e   : > { %v4050_v3 = vmul.f32 0.7978846, %v4046_v37  ;;  %v4189_v37 = vld [vmem:[%s1000_s1] sm:$0xff] }
 0xd7f   : > { %4215 = vmatpush.msrb.mxu3 %v4189_v37 }
 0xd80   : > { %5134 = vtanh.f32 %v4050_v3 }
 0xd81   : > { %v4025_v16 = vpop.f32.mrf.mxu0 }
 0xd82   : > { %v4026_v48 = vadd.f32 %v4959_v38, %v4025_v16 }
 0xd84   : > { %v4035_v54 = vmul.f32 %v4026_v48, %v4026_v48 }
 0xd86   : > { %v5135_v51 = vpop.eup %5134  ;;  %v4039_v4 = vmul.f32 %v4035_v54, %v4026_v48 }
 0xd87   : > { %v4058_v56 = vadd.f32 1.0, %v5135_v51 }
 0xd88   : > { %v4043_v58 = vmul.f32 0.044715, %v4039_v4 }
 0xd89   : > { %v4062_v7 = vmul.f32 0.5, %v4058_v56 }
 0xd8a   : > { %v4047_v49 = vadd.f32 %v4043_v58, %v4026_v48 }
 0xd8b   : > { %v4066_v5 = vmul.f32 %v4062_v7, %v4023_v60  ;;  %v4028_v20 = vpop.f32.mrf.mxu0 }
 0xd8c   : > { %v4051_v9 = vmul.f32 0.7978846, %v4047_v49  ;;  %v4029_v13 = vadd.f32 %v4959_v38, %v4028_v20  ;;  %v4961_v49 = vld [vmem:[%s992_s4] ss:$0 sm:$0xff]  ;;  %s4233_s4 = scalar_lea.hbm %s6765_s21, %s4871_s28 }
 0xd8d   : > { %4863 = vmatmul.msk.f32.vlgmr.msrb.gmra.mxu1 %vm2544_vm14, %v4066_v5  ;;  %v4962_v5 = vld [vmem:[%s995_s8] ss:$0 sm:$0xff]  ;;  %s4235_s8 = sshll.u32 %s917_s26, 4  ;;  %s4237_s2 = sshll.u32 %s4233_s4, 4  ;;  %s4236_s8 = int_to_ptr.vmem [resolvable:$true] %s4235_s8  ;;  %s4238_s2 = int_to_ptr.hbm [resolvable:$true] %s4237_s2 }
 0xd8e   : > { %5136 = vtanh.f32 %v4051_v9  ;;  %v4036_v11 = vmul.f32 %v4029_v13, %v4029_v13  ;;  %s5162_s27 = sshra.s32 %s4238_s2, 4  ;;  %s5163_s27 = int_to_ptr.hbm [resolvable:$true] %s5162_s27 }
 0xd8f   : > { %s5164_s22 = scalar_lea.hbm %s5163_s27, 2  ;;  %p5169_p1 = scmp.lt.s32.totalorder %s5163_s27, %s6765_s21 }
 0xd90   : > { %v4040_v40 = vmul.f32 %v4036_v11, %v4029_v13  ;;  %v4963_v11 = vld [vmem:[%s1003_s13] ss:$0 sm:$0xff]  ;;  %p5165_p12 = scmp.ne.s32.totalorder %s5163_s27, %s5164_s22  ;;  %p5170_p2 = scmp.lt.s32.totalorder %s5168_s24, %s5164_s22 }
 0xd92   : > { %v4044_v61 = vmul.f32 0.044715, %v4040_v40  ;;  %p5166_p13 = pnand %p5165_p12, %p5379_p4  ;;  %p5171_p3 = por %p5170_p2, %p5169_p1 }
 0xd93   : > { %v4031_v55 = vpop.f32.mrf.mxu0 }
 0xd94   : > { %v5137_v10 = vpop.eup %5136  ;;  %v4048_v23 = vadd.f32 %v4044_v61, %v4029_v13  ;;  %v4032_v63 = vadd.f32 %v4959_v38, %v4031_v55  ;;  %p5167_p0 = pneg %p5166_p13 }
 0xd95   : > { %v4059_v15 = vadd.f32 1.0, %v5137_v10 }
 0xd96   : > { %v4052_v18 = vmul.f32 0.7978846, %v4048_v23  ;;  %v4037_v53 = vmul.f32 %v4032_v63, %v4032_v63  ;;  %p5172_p5 = pnand %p5171_p3, %p5167_p0 }
 0xd97   : > { %v4063_v21 = vmul.f32 0.5, %v4059_v15 }
 0xd98   : > { %5138 = vtanh.f32 %v4052_v18  ;;  %v4041_v1 = vmul.f32 %v4037_v53, %v4032_v63 }
 0xd99   : > { %v4067_v35 = vmul.f32 %v4063_v21, %v4026_v48 }
 0xd9a   : > { %v4045_v30 = vmul.f32 0.044715, %v4041_v1 }
 0xd9b   : > { %4864 = vmatmul.msk.f32.gmra.mxu1 %vm2544_vm14, %v4067_v35 }
 0xd9c   : > { %v4049_v43 = vadd.f32 %v4045_v30, %v4032_v63 }
 0xd9e   : > { %v5139_v19 = vpop.eup %5138  ;;  %v4053_v31 = vmul.f32 0.7978846, %v4049_v43 }
 0xd9f   : > { %v4060_v28 = vadd.f32 1.0, %v5139_v19 }
 0xda0   : > { %5140 = vtanh.f32 %v4053_v31 }
 0xda1   : > { %v4064_v46 = vmul.f32 0.5, %v4060_v28 }
 0xda3   : > { %v4068_v34 = vmul.f32 %v4064_v46, %v4029_v13 }
 0xda5   : > { %4865 = vmatmul.msk.f32.gmra.mxu1 %vm2544_vm14, %v4068_v34 }
 0xda6   : > { %v5141_v39 = vpop.eup %5140 }
 0xda7   : > { %v4061_v8 = vadd.f32 1.0, %v5141_v39 }
 0xda9   : > { %v4065_v6 = vmul.f32 0.5, %v4061_v8 }
 0xdab   : > { %v4069_v14 = vmul.f32 %v4065_v6, %v4032_v63 }
 0xdad   : > { %4866 = vmatmul.msk.f32.gmra.mxu1 %vm2544_vm14, %v4069_v14  ;;  %vm4158_vm14 = vcmask 254976  }
 0xe0a   : > { %v4108_v45 = vpop.f32.mrf.mxu1 }
 0xe0b   : > { %v4120_v47 = vadd.f32 %v4108_v45, %v6578_v29 }
 0xe0d   : > { %v4129_v44 = vadd.f32 %v4960_v41, %v4120_v47 }
 0xe18   : > { %v4111_v22 = vpop.f32.mrf.mxu1 }
 0xe19   : > { %v4121_v27 = vadd.f32 %v4111_v22, %v6588_v59 }
 0xe1b   : > { %v4130_v57 = vadd.f32 %v4960_v41, %v4121_v27 }
 0xe22   : > { %v4114_v52 = vpop.f32.mrf.mxu1 }
 0xe23   : > { %v4122_v36 = vadd.f32 %v4114_v52, %v6598_v32 }
 0xe25   : > { %v4131_v17 = vadd.f32 %v4960_v41, %v4122_v36 }
 0xe2a   : > { %v4117_v50 = vpop.f32.mrf.mxu1 }
 0xe2b   : > { %v4123_v0 = vadd.f32 %v4117_v50, %v6605_v2 }
 0xe2d   : > { %v4132_v26 = vadd.f32 %v4960_v41, %v4123_v0 }
 0xe2f   : > { %4148 = vmatpush.msra.mxu2 %v4132_v26 }
 0xe31   : > { %4149 = vmatpush.msra.mxu2 %v4131_v17 }
 0xe33   : > { %4150 = vmatpush.msra.mxu2 %v4130_v57 }
 0xe35   : > { %4151 = vmatpush.msra.mxu2 %v4129_v44 }
 0xe36   : > { %4868 = vmatmul.msk.f32.vlgmr.msra.gmra.mxu2 %vm1068_vm2, %v1012_v42 }
 0xeb9   : > { %v4153_v29 = vpop.f32.mrf.mxu2 }
 0xeba   : > { %v4159_v59 = vsel %vm4158_vm14, %v4153_v29, 0.0 }
 0xebb   : > { %4160 = vadd.xlane.f32.xlu0 %v4159_v59 }
 0xf2e   : > { %v4161_v32 = vpop.xlane.xlu0 %4160 }
 0xf2f   : > { %v4162_v2 = vmul.f32 %v4161_v32, %v5439_v25 }
 0xf31   : > { %v4163_v38 = vsub.f32 %v4153_v29, %v4162_v2 }
 0xf33   : > { %v4164_v12 = vmul.f32 %v4163_v38, %v4163_v38 }
 0xf35   : > { %v4165_v60 = vsel %vm4158_vm14, %v4164_v12, 0.0 }
 0xf36   : > { %4166 = vadd.xlane.f32.xlu1 %v4165_v60 }
 0xfa9   : > { %v4167_v3 = vpop.xlane.xlu1 %4166 }
 0xfaa   : > { %v4168_v16 = vmul.f32 %v4167_v3, %v5439_v25 }
 0xfac   : > { %v4169_v48 = vadd.f32 1e-05, %v4168_v16 }
 0xfae   : > { %5142 = vrsqrt.f32 %v4169_v48  ;;  %vm4176_vm12 = vweird.f32 %v4169_v48 }
 0xfb4   : > { %v5143_v54 = vpop.eup %5142 }
 0xfb5   : > { %v4171_v51 = vmul.f32 %v5143_v54, %v4169_v48  ;;  %vm4177_vm11 = vweird.f32 %v5143_v54 }
 0xfb6   : > { %vm4178_vm0 = vmor %vm4176_vm12, %vm4177_vm11 }
 0xfb7   : > { %v4172_v4 = vmul.f32 %v5143_v54, %v4171_v51 }
 0xfb9   : > { %v4173_v56 = vmul.f32 0.5, %v4172_v4 }
 0xfbb   : > { %v4174_v58 = vsub.f32 1.5, %v4173_v56 }
 0xfbd   : > { %v4175_v7 = vmul.f32 %v5143_v54, %v4174_v58 }
 0xfbf   : > { %v4179_v25 = vsel %vm4178_vm0, %v5143_v54, %v4175_v7 }
 0xfc0   : > { %v4180_v20 = vmul.f32 %v4179_v25, %v4163_v38 }
 0xfc2   : > { %v4184_v9 = vmul.f32 %v4961_v49, %v4180_v20 }
 0xfc4   : > { %v4188_v13 = vadd.f32 %v4962_v5, %v4184_v9 }
 0xfc6   : > { %4869 = vmatmul.msk.f32.vlgmr.msrb.gmra.mxu3 %vm1068_vm2, %v4188_v13 }
0x1049   : > { %v4217_v40 = vpop.f32.mrf.mxu3 }
0x104a   : > { %v4218_v61 = vadd.f32 %v4963_v11, %v4217_v40 }
0x104c   : > { %4220 = vst [vmem:[%s917_s26] sm:$0x3] %v4218_v61 }
0x104d   : > { %5175 = shalt.err (!%p5172_p5)
}
0x104e   : > { %4891 = dma.vmem_to_hbm [thread:$0]  (%p5379_p4), %s4236_s8, 32, %s4238_s2, %s4222_s23  }
0x104f PF: > { %s6817_s11 = sld [smem:[#allocation8_spill]] }
0x1050   : > { %s6818_s7 = sld [smem:[#allocation5_spill]] }
0x1055   : > { %p4897_p6 = scmp.ge.s32.totalorder %s6817_s11, 2 }
0x1056   : > { %s4249_s14 = sand.u32 1, %s6818_s7  }
0x1057   : > { %p4894_p7 = pnand %p4897_p6, %p5386_p8  ;;  %s4250_s28 = scalar_lea.sflag [#allocation3], %s4249_s14 }
0x1059   : > { %p4895_p9 = pneg %p4894_p7 }
0x105b   : > { %5201 = dma.done.wait (%p4895_p9), %s4250_s28, 32  }
0x105c   : > { %5203 = vsyncadd (%p4895_p9), %s4250_s28, 4294967264  ;;  %s34_s28 = sadd.s32 1, %s6817_s11   ;;  %s6820_s6 = sld [smem:[#allocation6_spill]] }
0x105d   : > { %p31_p10 = scmp.ge.s32.totalorder %s34_s28, 4   ;;  %s6821_s26 = sld [smem:[#allocation11_spill]] }
0x105e   : > { %s6822_s27 = sld [smem:[#allocation7_spill]]  ;;  %s6824_s2 = smov %s5210_s25 }
0x105f   : > { %s6823_s3 = sld [smem:[#allocation9_spill]]  ;;  %33 = sbr.rel (!%p31_p10) target bundleno = 20 (0x14), region = 206 }
0x1062   : > { %s6825_s25 = smov %s6820_s6 }
0x1064   :  { %4256 = vsyncpa [#allocation3], 1 }
0x1065   :  { %4258 = vsyncpa [#allocation3 + $0x1], 1 }

</bundles_post_ra>
